<compile_context>
chip_gen: v7x
topology: tpu7x:2x2x1
jax: 0.10.0
libtpu: 0.0.40
codegen_flags: <defaults>
</compile_context>

<pallas_src>
import functools

import numpy as np
import jax
import jax.numpy as jnp
from jax.experimental import pallas as pl
from jax.experimental.pallas import tpu as pltpu

F32 = jnp.float32
_VMEM = pl.BlockSpec(memory_space=pltpu.MemorySpace.VMEM)


def _silu(x):
    # Stable SiLU: sigmoid via exp(-|x|); the divide goes to the EUP
    # reciprocal slot instead of the VPU divide path.
    z = jnp.exp(-jnp.abs(x))
    r = pl.reciprocal(1.0 + z, approx=True)
    sig = jnp.where(x >= 0, r, z * r)
    return x * sig


# --------------------------------------------------------------------------
# Fused forward kernel
# --------------------------------------------------------------------------
def _egnn_kernel(nodef_ref, pos_ref, dis_ref, ei_e2_ref, ei_2e_ref,
                 wn_ref, bn_ref, we_ref, be_ref,
                 ew1s_ref, ew1t_ref, ew1r_ref, ew1e_ref, eb1_ref,
                 ew2_ref, eb2_ref,
                 cw1_ref, cb1_ref, cw2_ref,
                 nw1x_ref, nw1a_ref, nb1_ref, nw2_ref, nb2_ref,
                 ln_g_ref, ln_b_ref,
                 out_ref, *, n_layers, residual, normalize,
                 d_min, d_max, d_count):
    N = pos_ref.shape[0]
    E = dis_ref.shape[0]

    # ---- one-hot gather / scatter matrices from int32 indices (in-kernel) ----
    ei_e2 = ei_e2_ref[...]                                  # [E, 2] int32
    row_e1 = ei_e2[:, 0:1]                                  # [E, 1]
    col_e1 = ei_e2[:, 1:2]                                  # [E, 1]
    iota_en = jax.lax.broadcasted_iota(jnp.int32, (E, N), 1)
    grow = (row_e1 == iota_en).astype(F32)                  # [E, N]  h[row] gather
    gcol = (col_e1 == iota_en).astype(F32)                  # [E, N]  h[col] gather
    gdiff = grow - gcol                                     # [E, N]

    row_1e = ei_2e_ref[...][0:1, :]                         # [1, E]
    iota_ne = jax.lax.broadcasted_iota(jnp.int32, (N, E), 0)
    srow = (iota_ne == row_1e).astype(F32)                  # [N, E]  scatter (= grow^T)

    # ---- loop-invariant node degree (segment_mean denominator) ----
    count = jnp.sum(srow, axis=-1, keepdims=True)           # [N, 1]
    inv_count = 1.0 / jnp.maximum(count, 1.0)

    # ---- input embeddings ----
    h = _silu(jnp.dot(nodef_ref[...], wn_ref[...],
                      preferred_element_type=F32) + bn_ref[...])        # [N, H]
    re_h = h

    dis = dis_ref[...]                                      # [E, 3]
    dnorm = jnp.sqrt(jnp.sum(dis * dis, axis=-1, keepdims=True))        # [E, 1]
    d_sigma = (d_max - d_min) / d_count
    mu_step = (d_max - d_min) / (d_count - 1)
    d_mu = d_min + jax.lax.broadcasted_iota(
        jnp.int32, (1, d_count), 1).astype(F32) * mu_step               # [1, 9]
    z = (dnorm - d_mu) / d_sigma
    rbf = jnp.exp(-(z * z))                                             # [E, 9]
    e_attr = _silu(jnp.dot(rbf, we_ref[...],
                           preferred_element_type=F32) + be_ref[...])   # [E, EF]

    coord = pos_ref[...]                                    # [N, 3]

    # ---- E_GCL layers (all state stays in VMEM / vregs) ----
    for i in range(n_layers):
        # coord2radial: coord_diff = coord[row] - coord[col] = (grow-gcol) @ coord
        coord_diff = jnp.dot(gdiff, coord, preferred_element_type=F32)  # [E, 3]
        radial = jnp.sum(coord_diff * coord_diff, axis=-1, keepdims=True)
        if normalize:
            norm = jnp.sqrt(radial) + 1e-8
            coord_diff = coord_diff / norm

        # edge_model: project at N rows first, then gather to E rows
        hs = jnp.dot(h, ew1s_ref[i], preferred_element_type=F32)        # [N, H]
        ht = jnp.dot(h, ew1t_ref[i], preferred_element_type=F32)        # [N, H]
        pre1 = (jnp.dot(grow, hs, preferred_element_type=F32)
                + jnp.dot(gcol, ht, preferred_element_type=F32)
                + radial * ew1r_ref[i]
                + jnp.dot(e_attr, ew1e_ref[i], preferred_element_type=F32)
                + eb1_ref[i])
        m1 = _silu(pre1)
        edge_feat = _silu(jnp.dot(m1, ew2_ref[i],
                                  preferred_element_type=F32) + eb2_ref[i])  # [E, H]

        # coord_model (coords_agg='mean')
        c1 = _silu(jnp.dot(edge_feat, cw1_ref[i],
                           preferred_element_type=F32) + cb1_ref[i])
        phi = jnp.dot(c1, cw2_ref[i], preferred_element_type=F32)       # [E, 1]
        trans = coord_diff * phi                                        # [E, 3]
        agg_c = jnp.dot(srow, trans, preferred_element_type=F32)        # [N, 3]
        coord = coord + agg_c * inv_count

        # node_model (residual)
        agg_h = jnp.dot(srow, edge_feat, preferred_element_type=F32)    # [N, H]
        n1 = _silu(jnp.dot(h, nw1x_ref[i], preferred_element_type=F32)
                   + jnp.dot(agg_h, nw1a_ref[i], preferred_element_type=F32)
                   + nb1_ref[i])
        out = jnp.dot(n1, nw2_ref[i], preferred_element_type=F32) + nb2_ref[i]
        if residual:
            out = h + out
        h = out
        # NOTE: last layer's coord is intentionally never written to HBM.

    # ---- residual + LayerNorm + 'sum' pooling ----
    x = re_h + h
    mu = jnp.mean(x, axis=-1, keepdims=True)
    xc = x - mu
    var = jnp.mean(xc * xc, axis=-1, keepdims=True)
    y = xc * jax.lax.rsqrt(var + 1e-5) * ln_g_ref[...] + ln_b_ref[...]
    out_ref[...] = jnp.sum(y, axis=0, keepdims=True)        # [1, H]


def egnn_forward(node_f, pos, edge_index_e2, edge_index_2e, dis, params, cfg):
    H = cfg['hidden_size']
    kern = functools.partial(
        _egnn_kernel,
        n_layers=cfg['n_layers'],
        residual=cfg['residual'],
        normalize=cfg['normalize'],
        d_min=0.0, d_max=6.0, d_count=9)
    L = params['layers']
    inputs = (node_f, pos, dis, edge_index_e2, edge_index_2e,
              params['wn'], params['bn'], params['we'], params['be'],
              L['ew1s'], L['ew1t'], L['ew1r'], L['ew1e'], L['eb1'],
              L['ew2'], L['eb2'],
              L['cw1'], L['cb1'], L['cw2'],
              L['nw1x'], L['nw1a'], L['nb1'], L['nw2'], L['nb2'],
              params['ln_g'], params['ln_b'])
    return pl.pallas_call(
        kern,
        out_shape=jax.ShapeDtypeStruct((1, H), F32),
        in_specs=[_VMEM] * len(inputs),
        out_specs=_VMEM,
    )(*inputs)
    # TODO(synk): for batches of graphs, add a 'parallel' grid axis over graphs
    # (dimension_semantics=("parallel",)) so v7x's second TensorCore is used.


# --------------------------------------------------------------------------
# Deterministic parameter init (synthetic; mirrors shapes of the PyTorch module)
# --------------------------------------------------------------------------
def _unif(key, shape, scale):
    return jax.random.uniform(key, shape, F32, -scale, scale)


def init_egcl_params(key, H, EF):
    ks = jax.random.split(key, 16)
    in_e = 2 * H + 1 + EF
    se = 1.0 / np.sqrt(in_e)
    sh = 1.0 / np.sqrt(H)
    sn = 1.0 / np.sqrt(2 * H)
    p = {}
    # edge_mlp: Linear(2H+1+EF, H) [split by input block] -> SiLU -> Linear(H,H) -> SiLU
    p['ew1s'] = _unif(ks[0], (H, H), se)
    p['ew1t'] = _unif(ks[1], (H, H), se)
    p['ew1r'] = _unif(ks[2], (1, H), se)
    p['ew1e'] = _unif(ks[3], (EF, H), se)
    p['eb1'] = _unif(ks[4], (1, H), se)
    p['ew2'] = _unif(ks[5], (H, H), sh)
    p['eb2'] = _unif(ks[6], (1, H), sh)
    # coord_mlp: Linear(H,H) -> SiLU -> Linear(H,1,bias=False, xavier gain 1e-3)
    p['cw1'] = _unif(ks[7], (H, H), sh)
    p['cb1'] = _unif(ks[8], (1, H), sh)
    xavier = 0.001 * np.sqrt(6.0 / (H + 1))
    p['cw2'] = _unif(ks[9], (H, 1), xavier)
    # node_mlp: Linear(2H, H) [split] -> SiLU -> Linear(H, H)
    p['nw1x'] = _unif(ks[10], (H, H), sn)
    p['nw1a'] = _unif(ks[11], (H, H), sn)
    p['nb1'] = _unif(ks[12], (1, H), sn)
    p['nw2'] = _unif(ks[13], (H, H), sh)
    p['nb2'] = _unif(ks[14], (1, H), sh)
    return p


def stack_layer_params(layer_list):
    return {k: jnp.stack([lp[k] for lp in layer_list], axis=0)
            for k in layer_list[0]}


if __name__ == "__main__":
    cfg = dict(hidden_size=32, n_layers=2, input_size=11, edge_fea_size=8,
               residual=True, normalize=False, pooling='sum')
    H, F_IN, EF = cfg['hidden_size'], cfg['input_size'], cfg['edge_fea_size']
    N, E = 16, 48

    key = jax.random.PRNGKey(0)
    k_nf, k_pos, k_row, k_col, k_par = jax.random.split(key, 5)

    node_f = jax.random.normal(k_nf, (N, F_IN), F32)
    pos = jax.random.normal(k_pos, (N, 3), F32)
    row = jax.random.randint(k_row, (E,), 0, N, dtype=jnp.int32)
    col = jax.random.randint(k_col, (E,), 0, N, dtype=jnp.int32)
    edge_index_e2 = jnp.stack([row, col], axis=1)        # [E, 2] int32
    edge_index_2e = jnp.stack([row, col], axis=0)        # [2, E] int32
    dis = pos[row] - pos[col]                            # edata['d'] : [E, 3]

    kp = jax.random.split(k_par, 6 + cfg['n_layers'])
    sn = 1.0 / np.sqrt(F_IN)
    se = 1.0 / np.sqrt(9.0)
    params = {
        'wn': _unif(kp[0], (F_IN, H), sn),   # lin_node
        'bn': _unif(kp[1], (1, H), sn),
        'we': _unif(kp[2], (9, EF), se),     # e_lin
        'be': _unif(kp[3], (1, EF), se),
        'ln_g': jnp.ones((1, H), F32),       # layernorm
        'ln_b': jnp.zeros((1, H), F32),
        'layers': stack_layer_params(
            [init_egcl_params(kp[6 + i], H, EF) for i in range(cfg['n_layers'])]),
    }

    out = egnn_forward(node_f, pos, edge_index_e2, edge_index_2e, dis,
                       params, cfg)
    jax.block_until_ready(out)
    assert out.shape == (1, H)
    assert bool(jnp.all(jnp.isfinite(out)))
    # TODO(synk): 'avg'/'max'/'weight_sum' pooling variants and the unused
    # submodules (FC head, EdgeWeightedSumAndMax readout, p_gcl_* stack,
    # dropout) are not on this forward path and are not implemented.
    print("KERNEL_OK")
</pallas_src>

<mosaic_0001>
module attributes {stable_mosaic.version = 11 : i64} {
  func.func @_egnn_kernel(%arg0: memref<16x11xf32, #tpu.memory_space<vmem>>, %arg1: memref<16x3xf32, #tpu.memory_space<vmem>>, %arg2: memref<48x3xf32, #tpu.memory_space<vmem>>, %arg3: memref<48x2xi32, #tpu.memory_space<vmem>>, %arg4: memref<2x48xi32, #tpu.memory_space<vmem>>, %arg5: memref<11x32xf32, #tpu.memory_space<vmem>>, %arg6: memref<1x32xf32, #tpu.memory_space<vmem>>, %arg7: memref<9x8xf32, #tpu.memory_space<vmem>>, %arg8: memref<1x8xf32, #tpu.memory_space<vmem>>, %arg9: memref<2x32x32xf32, #tpu.memory_space<vmem>>, %arg10: memref<2x32x32xf32, #tpu.memory_space<vmem>>, %arg11: memref<2x1x32xf32, #tpu.memory_space<vmem>>, %arg12: memref<2x8x32xf32, #tpu.memory_space<vmem>>, %arg13: memref<2x1x32xf32, #tpu.memory_space<vmem>>, %arg14: memref<2x32x32xf32, #tpu.memory_space<vmem>>, %arg15: memref<2x1x32xf32, #tpu.memory_space<vmem>>, %arg16: memref<2x32x32xf32, #tpu.memory_space<vmem>>, %arg17: memref<2x1x32xf32, #tpu.memory_space<vmem>>, %arg18: memref<2x32x1xf32, #tpu.memory_space<vmem>>, %arg19: memref<2x32x32xf32, #tpu.memory_space<vmem>>, %arg20: memref<2x32x32xf32, #tpu.memory_space<vmem>>, %arg21: memref<2x1x32xf32, #tpu.memory_space<vmem>>, %arg22: memref<2x32x32xf32, #tpu.memory_space<vmem>>, %arg23: memref<2x1x32xf32, #tpu.memory_space<vmem>>, %arg24: memref<1x32xf32, #tpu.memory_space<vmem>>, %arg25: memref<1x32xf32, #tpu.memory_space<vmem>>, %arg26: memref<1x32xf32, #tpu.memory_space<vmem>>) attributes {dimension_semantics = [], scalar_prefetch = 0 : i64, scratch_operands = 0 : i64, tpu.core_type = #tpu.core_type<tc>} {
    %c0 = arith.constant 0 : index
    %c0_0 = arith.constant 0 : index
    %0 = vector.load %arg3[%c0, %c0_0] : memref<48x2xi32, #tpu.memory_space<vmem>>, vector<48x2xi32>
    %1 = vector.extract_strided_slice %0 {offsets = [0, 0], sizes = [48, 1], strides = [1, 1]} : vector<48x2xi32> to vector<48x1xi32>
    %2 = vector.extract_strided_slice %0 {offsets = [0, 1], sizes = [48, 1], strides = [1, 1]} : vector<48x2xi32> to vector<48x1xi32>
    %3 = tpu.iota {dimensions = array<i32: 1>} : vector<48x16xi32>
    %4 = vector.broadcast %1 : vector<48x1xi32> to vector<48x16xi32>
    %5 = arith.cmpi eq, %4, %3 : vector<48x16xi32>
    %6 = arith.extui %5 : vector<48x16xi1> to vector<48x16xi32>
    %7 = arith.sitofp %6 : vector<48x16xi32> to vector<48x16xf32>
    %8 = vector.broadcast %2 : vector<48x1xi32> to vector<48x16xi32>
    %9 = arith.cmpi eq, %8, %3 : vector<48x16xi32>
    %10 = arith.extui %9 : vector<48x16xi1> to vector<48x16xi32>
    %11 = arith.sitofp %10 : vector<48x16xi32> to vector<48x16xf32>
    %12 = arith.subf %7, %11 : vector<48x16xf32>
    %c0_1 = arith.constant 0 : index
    %c0_2 = arith.constant 0 : index
    %13 = vector.load %arg4[%c0_1, %c0_2] : memref<2x48xi32, #tpu.memory_space<vmem>>, vector<2x48xi32>
    %14 = vector.extract_strided_slice %13 {offsets = [0, 0], sizes = [1, 48], strides = [1, 1]} : vector<2x48xi32> to vector<1x48xi32>
    %15 = tpu.iota {dimensions = array<i32: 0>} : vector<16x48xi32>
    %16 = vector.broadcast %14 : vector<1x48xi32> to vector<16x48xi32>
    %17 = arith.cmpi eq, %15, %16 : vector<16x48xi32>
    %18 = arith.extui %17 : vector<16x48xi1> to vector<16x48xi32>
    %19 = arith.sitofp %18 : vector<16x48xi32> to vector<16x48xf32>
    %cst = arith.constant dense<0.000000e+00> : vector<16xf32>
    %20 = vector.multi_reduction <add>, %19, %cst [1] : vector<16x48xf32> to vector<16xf32>
    %21 = vector.shape_cast %20 : vector<16xf32> to vector<16x1xf32>
    %cst_3 = arith.constant 1.000000e+00 : f32
    %22 = vector.broadcast %cst_3 : f32 to vector<16x1xf32>
    %23 = arith.maximumf %21, %22 : vector<16x1xf32>
    %cst_4 = arith.constant 1.000000e+00 : f32
    %24 = vector.broadcast %cst_4 : f32 to vector<16x1xf32>
    %25 = arith.divf %24, %23 : vector<16x1xf32>
    %c0_5 = arith.constant 0 : index
    %c0_6 = arith.constant 0 : index
    %26 = vector.load %arg0[%c0_5, %c0_6] : memref<16x11xf32, #tpu.memory_space<vmem>>, vector<16x11xf32>
    %c0_7 = arith.constant 0 : index
    %c0_8 = arith.constant 0 : index
    %27 = vector.load %arg5[%c0_7, %c0_8] : memref<11x32xf32, #tpu.memory_space<vmem>>, vector<11x32xf32>
    %cst_9 = arith.constant dense<0.000000e+00> : vector<16x32xf32>
    %28 = tpu.matmul %26, %27, %cst_9 {dimension_numbers = #tpu.dot_dimension_numbers<[1], [0], [0], [1], [0, 0, 1, 1], [], []>} : vector<16x11xf32>, vector<11x32xf32>, vector<16x32xf32> -> vector<16x32xf32>
    %c0_10 = arith.constant 0 : index
    %c0_11 = arith.constant 0 : index
    %29 = vector.load %arg6[%c0_10, %c0_11] : memref<1x32xf32, #tpu.memory_space<vmem>>, vector<1x32xf32>
    %30 = vector.broadcast %29 : vector<1x32xf32> to vector<16x32xf32>
    %31 = arith.addf %28, %30 : vector<16x32xf32>
    %32 = math.absf %31 : vector<16x32xf32>
    %cst_12 = arith.constant 0.000000e+00 : f32
    %33 = vector.broadcast %cst_12 : f32 to vector<16x32xf32>
    %34 = arith.subf %33, %32 : vector<16x32xf32>
    %35 = math.exp %34 : vector<16x32xf32>
    %cst_13 = arith.constant 1.000000e+00 : f32
    %36 = vector.broadcast %cst_13 : f32 to vector<16x32xf32>
    %37 = arith.addf %36, %35 : vector<16x32xf32>
    %38 = tpu.reciprocal %37 {approx = true} : vector<16x32xf32> -> vector<16x32xf32>
    %cst_14 = arith.constant 0.000000e+00 : f32
    %39 = vector.broadcast %cst_14 : f32 to vector<16x32xf32>
    %40 = arith.cmpf oge, %31, %39 : vector<16x32xf32>
    %41 = arith.mulf %35, %38 : vector<16x32xf32>
    %42 = arith.select %40, %38, %41 : vector<16x32xi1>, vector<16x32xf32>
    %43 = arith.mulf %31, %42 : vector<16x32xf32>
    %c0_15 = arith.constant 0 : index
    %c0_16 = arith.constant 0 : index
    %44 = vector.load %arg2[%c0_15, %c0_16] : memref<48x3xf32, #tpu.memory_space<vmem>>, vector<48x3xf32>
    %45 = arith.mulf %44, %44 : vector<48x3xf32>
    %cst_17 = arith.constant dense<0.000000e+00> : vector<48xf32>
    %46 = vector.multi_reduction <add>, %45, %cst_17 [1] : vector<48x3xf32> to vector<48xf32>
    %47 = vector.shape_cast %46 : vector<48xf32> to vector<48x1xf32>
    %48 = math.sqrt %47 : vector<48x1xf32>
    %49 = tpu.iota {dimensions = array<i32: 1>} : vector<1x9xi32>
    %50 = arith.sitofp %49 : vector<1x9xi32> to vector<1x9xf32>
    %cst_18 = arith.constant 7.500000e-01 : f32
    %51 = vector.broadcast %cst_18 : f32 to vector<1x9xf32>
    %52 = arith.mulf %50, %51 : vector<1x9xf32>
    %cst_19 = arith.constant 0.000000e+00 : f32
    %53 = vector.broadcast %cst_19 : f32 to vector<1x9xf32>
    %54 = arith.addf %53, %52 : vector<1x9xf32>
    %55 = vector.broadcast %48 : vector<48x1xf32> to vector<48x9xf32>
    %56 = vector.broadcast %54 : vector<1x9xf32> to vector<48x9xf32>
    %57 = arith.subf %55, %56 : vector<48x9xf32>
    %cst_20 = arith.constant 0.666666686 : f32
    %58 = vector.broadcast %cst_20 : f32 to vector<48x9xf32>
    %59 = arith.divf %57, %58 : vector<48x9xf32>
    %60 = arith.mulf %59, %59 : vector<48x9xf32>
    %cst_21 = arith.constant 0.000000e+00 : f32
    %61 = vector.broadcast %cst_21 : f32 to vector<48x9xf32>
    %62 = arith.subf %61, %60 : vector<48x9xf32>
    %63 = math.exp %62 : vector<48x9xf32>
    %c0_22 = arith.constant 0 : index
    %c0_23 = arith.constant 0 : index
    %64 = vector.load %arg7[%c0_22, %c0_23] : memref<9x8xf32, #tpu.memory_space<vmem>>, vector<9x8xf32>
    %cst_24 = arith.constant dense<0.000000e+00> : vector<48x8xf32>
    %65 = tpu.matmul %63, %64, %cst_24 {dimension_numbers = #tpu.dot_dimension_numbers<[1], [0], [0], [1], [0, 0, 1, 1], [], []>} : vector<48x9xf32>, vector<9x8xf32>, vector<48x8xf32> -> vector<48x8xf32>
    %c0_25 = arith.constant 0 : index
    %c0_26 = arith.constant 0 : index
    %66 = vector.load %arg8[%c0_25, %c0_26] : memref<1x8xf32, #tpu.memory_space<vmem>>, vector<1x8xf32>
    %67 = vector.broadcast %66 : vector<1x8xf32> to vector<48x8xf32>
    %68 = arith.addf %65, %67 : vector<48x8xf32>
    %69 = math.absf %68 : vector<48x8xf32>
    %cst_27 = arith.constant 0.000000e+00 : f32
    %70 = vector.broadcast %cst_27 : f32 to vector<48x8xf32>
    %71 = arith.subf %70, %69 : vector<48x8xf32>
    %72 = math.exp %71 : vector<48x8xf32>
    %cst_28 = arith.constant 1.000000e+00 : f32
    %73 = vector.broadcast %cst_28 : f32 to vector<48x8xf32>
    %74 = arith.addf %73, %72 : vector<48x8xf32>
    %75 = tpu.reciprocal %74 {approx = true} : vector<48x8xf32> -> vector<48x8xf32>
    %cst_29 = arith.constant 0.000000e+00 : f32
    %76 = vector.broadcast %cst_29 : f32 to vector<48x8xf32>
    %77 = arith.cmpf oge, %68, %76 : vector<48x8xf32>
    %78 = arith.mulf %72, %75 : vector<48x8xf32>
    %79 = arith.select %77, %75, %78 : vector<48x8xi1>, vector<48x8xf32>
    %80 = arith.mulf %68, %79 : vector<48x8xf32>
    %c0_30 = arith.constant 0 : index
    %c0_31 = arith.constant 0 : index
    %81 = vector.load %arg1[%c0_30, %c0_31] : memref<16x3xf32, #tpu.memory_space<vmem>>, vector<16x3xf32>
    %cst_32 = arith.constant dense<0.000000e+00> : vector<48x3xf32>
    %82 = tpu.matmul %12, %81, %cst_32 {dimension_numbers = #tpu.dot_dimension_numbers<[1], [0], [0], [1], [0, 0, 1, 1], [], []>} : vector<48x16xf32>, vector<16x3xf32>, vector<48x3xf32> -> vector<48x3xf32>
    %83 = arith.mulf %82, %82 : vector<48x3xf32>
    %cst_33 = arith.constant dense<0.000000e+00> : vector<48xf32>
    %84 = vector.multi_reduction <add>, %83, %cst_33 [1] : vector<48x3xf32> to vector<48xf32>
    %85 = vector.shape_cast %84 : vector<48xf32> to vector<48x1xf32>
    %c0_34 = arith.constant 0 : index
    %c0_35 = arith.constant 0 : index
    %c0_36 = arith.constant 0 : index
    %86 = vector.load %arg9[%c0_34, %c0_35, %c0_36] : memref<2x32x32xf32, #tpu.memory_space<vmem>>, vector<1x32x32xf32>
    %87 = vector.shape_cast %86 : vector<1x32x32xf32> to vector<32x32xf32>
    %cst_37 = arith.constant dense<0.000000e+00> : vector<16x32xf32>
    %88 = tpu.matmul %43, %87, %cst_37 {dimension_numbers = #tpu.dot_dimension_numbers<[1], [0], [0], [1], [0, 0, 1, 1], [], []>} : vector<16x32xf32>, vector<32x32xf32>, vector<16x32xf32> -> vector<16x32xf32>
    %c0_38 = arith.constant 0 : index
    %c0_39 = arith.constant 0 : index
    %c0_40 = arith.constant 0 : index
    %89 = vector.load %arg10[%c0_38, %c0_39, %c0_40] : memref<2x32x32xf32, #tpu.memory_space<vmem>>, vector<1x32x32xf32>
    %90 = vector.shape_cast %89 : vector<1x32x32xf32> to vector<32x32xf32>
    %cst_41 = arith.constant dense<0.000000e+00> : vector<16x32xf32>
    %91 = tpu.matmul %43, %90, %cst_41 {dimension_numbers = #tpu.dot_dimension_numbers<[1], [0], [0], [1], [0, 0, 1, 1], [], []>} : vector<16x32xf32>, vector<32x32xf32>, vector<16x32xf32> -> vector<16x32xf32>
    %cst_42 = arith.constant dense<0.000000e+00> : vector<48x32xf32>
    %92 = tpu.matmul %7, %88, %cst_42 {dimension_numbers = #tpu.dot_dimension_numbers<[1], [0], [0], [1], [0, 0, 1, 1], [], []>} : vector<48x16xf32>, vector<16x32xf32>, vector<48x32xf32> -> vector<48x32xf32>
    %cst_43 = arith.constant dense<0.000000e+00> : vector<48x32xf32>
    %93 = tpu.matmul %11, %91, %cst_43 {dimension_numbers = #tpu.dot_dimension_numbers<[1], [0], [0], [1], [0, 0, 1, 1], [], []>} : vector<48x16xf32>, vector<16x32xf32>, vector<48x32xf32> -> vector<48x32xf32>
    %94 = arith.addf %92, %93 : vector<48x32xf32>
    %c0_44 = arith.constant 0 : index
    %c0_45 = arith.constant 0 : index
    %c0_46 = arith.constant 0 : index
    %95 = vector.load %arg11[%c0_44, %c0_45, %c0_46] : memref<2x1x32xf32, #tpu.memory_space<vmem>>, vector<1x1x32xf32>
    %96 = vector.shape_cast %95 : vector<1x1x32xf32> to vector<1x32xf32>
    %97 = vector.broadcast %85 : vector<48x1xf32> to vector<48x32xf32>
    %98 = vector.broadcast %96 : vector<1x32xf32> to vector<48x32xf32>
    %99 = arith.mulf %97, %98 : vector<48x32xf32>
    %100 = arith.addf %94, %99 : vector<48x32xf32>
    %c0_47 = arith.constant 0 : index
    %c0_48 = arith.constant 0 : index
    %c0_49 = arith.constant 0 : index
    %101 = vector.load %arg12[%c0_47, %c0_48, %c0_49] : memref<2x8x32xf32, #tpu.memory_space<vmem>>, vector<1x8x32xf32>
    %102 = vector.shape_cast %101 : vector<1x8x32xf32> to vector<8x32xf32>
    %cst_50 = arith.constant dense<0.000000e+00> : vector<48x32xf32>
    %103 = tpu.matmul %80, %102, %cst_50 {dimension_numbers = #tpu.dot_dimension_numbers<[1], [0], [0], [1], [0, 0, 1, 1], [], []>} : vector<48x8xf32>, vector<8x32xf32>, vector<48x32xf32> -> vector<48x32xf32>
    %104 = arith.addf %100, %103 : vector<48x32xf32>
    %c0_51 = arith.constant 0 : index
    %c0_52 = arith.constant 0 : index
    %c0_53 = arith.constant 0 : index
    %105 = vector.load %arg13[%c0_51, %c0_52, %c0_53] : memref<2x1x32xf32, #tpu.memory_space<vmem>>, vector<1x1x32xf32>
    %106 = vector.shape_cast %105 : vector<1x1x32xf32> to vector<1x32xf32>
    %107 = vector.broadcast %106 : vector<1x32xf32> to vector<48x32xf32>
    %108 = arith.addf %104, %107 : vector<48x32xf32>
    %109 = math.absf %108 : vector<48x32xf32>
    %cst_54 = arith.constant 0.000000e+00 : f32
    %110 = vector.broadcast %cst_54 : f32 to vector<48x32xf32>
    %111 = arith.subf %110, %109 : vector<48x32xf32>
    %112 = math.exp %111 : vector<48x32xf32>
    %cst_55 = arith.constant 1.000000e+00 : f32
    %113 = vector.broadcast %cst_55 : f32 to vector<48x32xf32>
    %114 = arith.addf %113, %112 : vector<48x32xf32>
    %115 = tpu.reciprocal %114 {approx = true} : vector<48x32xf32> -> vector<48x32xf32>
    %cst_56 = arith.constant 0.000000e+00 : f32
    %116 = vector.broadcast %cst_56 : f32 to vector<48x32xf32>
    %117 = arith.cmpf oge, %108, %116 : vector<48x32xf32>
    %118 = arith.mulf %112, %115 : vector<48x32xf32>
    %119 = arith.select %117, %115, %118 : vector<48x32xi1>, vector<48x32xf32>
    %120 = arith.mulf %108, %119 : vector<48x32xf32>
    %c0_57 = arith.constant 0 : index
    %c0_58 = arith.constant 0 : index
    %c0_59 = arith.constant 0 : index
    %121 = vector.load %arg14[%c0_57, %c0_58, %c0_59] : memref<2x32x32xf32, #tpu.memory_space<vmem>>, vector<1x32x32xf32>
    %122 = vector.shape_cast %121 : vector<1x32x32xf32> to vector<32x32xf32>
    %cst_60 = arith.constant dense<0.000000e+00> : vector<48x32xf32>
    %123 = tpu.matmul %120, %122, %cst_60 {dimension_numbers = #tpu.dot_dimension_numbers<[1], [0], [0], [1], [0, 0, 1, 1], [], []>} : vector<48x32xf32>, vector<32x32xf32>, vector<48x32xf32> -> vector<48x32xf32>
    %c0_61 = arith.constant 0 : index
    %c0_62 = arith.constant 0 : index
    %c0_63 = arith.constant 0 : index
    %124 = vector.load %arg15[%c0_61, %c0_62, %c0_63] : memref<2x1x32xf32, #tpu.memory_space<vmem>>, vector<1x1x32xf32>
    %125 = vector.shape_cast %124 : vector<1x1x32xf32> to vector<1x32xf32>
    %126 = vector.broadcast %125 : vector<1x32xf32> to vector<48x32xf32>
    %127 = arith.addf %123, %126 : vector<48x32xf32>
    %128 = math.absf %127 : vector<48x32xf32>
    %cst_64 = arith.constant 0.000000e+00 : f32
    %129 = vector.broadcast %cst_64 : f32 to vector<48x32xf32>
    %130 = arith.subf %129, %128 : vector<48x32xf32>
    %131 = math.exp %130 : vector<48x32xf32>
    %cst_65 = arith.constant 1.000000e+00 : f32
    %132 = vector.broadcast %cst_65 : f32 to vector<48x32xf32>
    %133 = arith.addf %132, %131 : vector<48x32xf32>
    %134 = tpu.reciprocal %133 {approx = true} : vector<48x32xf32> -> vector<48x32xf32>
    %cst_66 = arith.constant 0.000000e+00 : f32
    %135 = vector.broadcast %cst_66 : f32 to vector<48x32xf32>
    %136 = arith.cmpf oge, %127, %135 : vector<48x32xf32>
    %137 = arith.mulf %131, %134 : vector<48x32xf32>
    %138 = arith.select %136, %134, %137 : vector<48x32xi1>, vector<48x32xf32>
    %139 = arith.mulf %127, %138 : vector<48x32xf32>
    %c0_67 = arith.constant 0 : index
    %c0_68 = arith.constant 0 : index
    %c0_69 = arith.constant 0 : index
    %140 = vector.load %arg16[%c0_67, %c0_68, %c0_69] : memref<2x32x32xf32, #tpu.memory_space<vmem>>, vector<1x32x32xf32>
    %141 = vector.shape_cast %140 : vector<1x32x32xf32> to vector<32x32xf32>
    %cst_70 = arith.constant dense<0.000000e+00> : vector<48x32xf32>
    %142 = tpu.matmul %139, %141, %cst_70 {dimension_numbers = #tpu.dot_dimension_numbers<[1], [0], [0], [1], [0, 0, 1, 1], [], []>} : vector<48x32xf32>, vector<32x32xf32>, vector<48x32xf32> -> vector<48x32xf32>
    %c0_71 = arith.constant 0 : index
    %c0_72 = arith.constant 0 : index
    %c0_73 = arith.constant 0 : index
    %143 = vector.load %arg17[%c0_71, %c0_72, %c0_73] : memref<2x1x32xf32, #tpu.memory_space<vmem>>, vector<1x1x32xf32>
    %144 = vector.shape_cast %143 : vector<1x1x32xf32> to vector<1x32xf32>
    %145 = vector.broadcast %144 : vector<1x32xf32> to vector<48x32xf32>
    %146 = arith.addf %142, %145 : vector<48x32xf32>
    %147 = math.absf %146 : vector<48x32xf32>
    %cst_74 = arith.constant 0.000000e+00 : f32
    %148 = vector.broadcast %cst_74 : f32 to vector<48x32xf32>
    %149 = arith.subf %148, %147 : vector<48x32xf32>
    %150 = math.exp %149 : vector<48x32xf32>
    %cst_75 = arith.constant 1.000000e+00 : f32
    %151 = vector.broadcast %cst_75 : f32 to vector<48x32xf32>
    %152 = arith.addf %151, %150 : vector<48x32xf32>
    %153 = tpu.reciprocal %152 {approx = true} : vector<48x32xf32> -> vector<48x32xf32>
    %cst_76 = arith.constant 0.000000e+00 : f32
    %154 = vector.broadcast %cst_76 : f32 to vector<48x32xf32>
    %155 = arith.cmpf oge, %146, %154 : vector<48x32xf32>
    %156 = arith.mulf %150, %153 : vector<48x32xf32>
    %157 = arith.select %155, %153, %156 : vector<48x32xi1>, vector<48x32xf32>
    %158 = arith.mulf %146, %157 : vector<48x32xf32>
    %c0_77 = arith.constant 0 : index
    %c0_78 = arith.constant 0 : index
    %c0_79 = arith.constant 0 : index
    %159 = vector.load %arg18[%c0_77, %c0_78, %c0_79] : memref<2x32x1xf32, #tpu.memory_space<vmem>>, vector<1x32x1xf32>
    %160 = vector.shape_cast %159 : vector<1x32x1xf32> to vector<32x1xf32>
    %cst_80 = arith.constant dense<0.000000e+00> : vector<48x1xf32>
    %161 = tpu.matmul %158, %160, %cst_80 {dimension_numbers = #tpu.dot_dimension_numbers<[1], [0], [0], [1], [0, 0, 1, 1], [], []>} : vector<48x32xf32>, vector<32x1xf32>, vector<48x1xf32> -> vector<48x1xf32>
    %162 = vector.broadcast %161 : vector<48x1xf32> to vector<48x3xf32>
    %163 = arith.mulf %82, %162 : vector<48x3xf32>
    %cst_81 = arith.constant dense<0.000000e+00> : vector<16x3xf32>
    %164 = tpu.matmul %19, %163, %cst_81 {dimension_numbers = #tpu.dot_dimension_numbers<[1], [0], [0], [1], [0, 0, 1, 1], [], []>} : vector<16x48xf32>, vector<48x3xf32>, vector<16x3xf32> -> vector<16x3xf32>
    %165 = vector.broadcast %25 : vector<16x1xf32> to vector<16x3xf32>
    %166 = arith.mulf %164, %165 : vector<16x3xf32>
    %167 = arith.addf %81, %166 : vector<16x3xf32>
    %cst_82 = arith.constant dense<0.000000e+00> : vector<16x32xf32>
    %168 = tpu.matmul %19, %139, %cst_82 {dimension_numbers = #tpu.dot_dimension_numbers<[1], [0], [0], [1], [0, 0, 1, 1], [], []>} : vector<16x48xf32>, vector<48x32xf32>, vector<16x32xf32> -> vector<16x32xf32>
    %c0_83 = arith.constant 0 : index
    %c0_84 = arith.constant 0 : index
    %c0_85 = arith.constant 0 : index
    %169 = vector.load %arg19[%c0_83, %c0_84, %c0_85] : memref<2x32x32xf32, #tpu.memory_space<vmem>>, vector<1x32x32xf32>
    %170 = vector.shape_cast %169 : vector<1x32x32xf32> to vector<32x32xf32>
    %cst_86 = arith.constant dense<0.000000e+00> : vector<16x32xf32>
    %171 = tpu.matmul %43, %170, %cst_86 {dimension_numbers = #tpu.dot_dimension_numbers<[1], [0], [0], [1], [0, 0, 1, 1], [], []>} : vector<16x32xf32>, vector<32x32xf32>, vector<16x32xf32> -> vector<16x32xf32>
    %c0_87 = arith.constant 0 : index
    %c0_88 = arith.constant 0 : index
    %c0_89 = arith.constant 0 : index
    %172 = vector.load %arg20[%c0_87, %c0_88, %c0_89] : memref<2x32x32xf32, #tpu.memory_space<vmem>>, vector<1x32x32xf32>
    %173 = vector.shape_cast %172 : vector<1x32x32xf32> to vector<32x32xf32>
    %cst_90 = arith.constant dense<0.000000e+00> : vector<16x32xf32>
    %174 = tpu.matmul %168, %173, %cst_90 {dimension_numbers = #tpu.dot_dimension_numbers<[1], [0], [0], [1], [0, 0, 1, 1], [], []>} : vector<16x32xf32>, vector<32x32xf32>, vector<16x32xf32> -> vector<16x32xf32>
    %175 = arith.addf %171, %174 : vector<16x32xf32>
    %c0_91 = arith.constant 0 : index
    %c0_92 = arith.constant 0 : index
    %c0_93 = arith.constant 0 : index
    %176 = vector.load %arg21[%c0_91, %c0_92, %c0_93] : memref<2x1x32xf32, #tpu.memory_space<vmem>>, vector<1x1x32xf32>
    %177 = vector.shape_cast %176 : vector<1x1x32xf32> to vector<1x32xf32>
    %178 = vector.broadcast %177 : vector<1x32xf32> to vector<16x32xf32>
    %179 = arith.addf %175, %178 : vector<16x32xf32>
    %180 = math.absf %179 : vector<16x32xf32>
    %cst_94 = arith.constant 0.000000e+00 : f32
    %181 = vector.broadcast %cst_94 : f32 to vector<16x32xf32>
    %182 = arith.subf %181, %180 : vector<16x32xf32>
    %183 = math.exp %182 : vector<16x32xf32>
    %cst_95 = arith.constant 1.000000e+00 : f32
    %184 = vector.broadcast %cst_95 : f32 to vector<16x32xf32>
    %185 = arith.addf %184, %183 : vector<16x32xf32>
    %186 = tpu.reciprocal %185 {approx = true} : vector<16x32xf32> -> vector<16x32xf32>
    %cst_96 = arith.constant 0.000000e+00 : f32
    %187 = vector.broadcast %cst_96 : f32 to vector<16x32xf32>
    %188 = arith.cmpf oge, %179, %187 : vector<16x32xf32>
    %189 = arith.mulf %183, %186 : vector<16x32xf32>
    %190 = arith.select %188, %186, %189 : vector<16x32xi1>, vector<16x32xf32>
    %191 = arith.mulf %179, %190 : vector<16x32xf32>
    %c0_97 = arith.constant 0 : index
    %c0_98 = arith.constant 0 : index
    %c0_99 = arith.constant 0 : index
    %192 = vector.load %arg22[%c0_97, %c0_98, %c0_99] : memref<2x32x32xf32, #tpu.memory_space<vmem>>, vector<1x32x32xf32>
    %193 = vector.shape_cast %192 : vector<1x32x32xf32> to vector<32x32xf32>
    %cst_100 = arith.constant dense<0.000000e+00> : vector<16x32xf32>
    %194 = tpu.matmul %191, %193, %cst_100 {dimension_numbers = #tpu.dot_dimension_numbers<[1], [0], [0], [1], [0, 0, 1, 1], [], []>} : vector<16x32xf32>, vector<32x32xf32>, vector<16x32xf32> -> vector<16x32xf32>
    %c0_101 = arith.constant 0 : index
    %c0_102 = arith.constant 0 : index
    %c0_103 = arith.constant 0 : index
    %195 = vector.load %arg23[%c0_101, %c0_102, %c0_103] : memref<2x1x32xf32, #tpu.memory_space<vmem>>, vector<1x1x32xf32>
    %196 = vector.shape_cast %195 : vector<1x1x32xf32> to vector<1x32xf32>
    %197 = vector.broadcast %196 : vector<1x32xf32> to vector<16x32xf32>
    %198 = arith.addf %194, %197 : vector<16x32xf32>
    %199 = arith.addf %43, %198 : vector<16x32xf32>
    %cst_104 = arith.constant dense<0.000000e+00> : vector<48x3xf32>
    %200 = tpu.matmul %12, %167, %cst_104 {dimension_numbers = #tpu.dot_dimension_numbers<[1], [0], [0], [1], [0, 0, 1, 1], [], []>} : vector<48x16xf32>, vector<16x3xf32>, vector<48x3xf32> -> vector<48x3xf32>
    %201 = arith.mulf %200, %200 : vector<48x3xf32>
    %cst_105 = arith.constant dense<0.000000e+00> : vector<48xf32>
    %202 = vector.multi_reduction <add>, %201, %cst_105 [1] : vector<48x3xf32> to vector<48xf32>
    %203 = vector.shape_cast %202 : vector<48xf32> to vector<48x1xf32>
    %c1 = arith.constant 1 : index
    %c0_106 = arith.constant 0 : index
    %c0_107 = arith.constant 0 : index
    %204 = vector.load %arg9[%c1, %c0_106, %c0_107] : memref<2x32x32xf32, #tpu.memory_space<vmem>>, vector<1x32x32xf32>
    %205 = vector.shape_cast %204 : vector<1x32x32xf32> to vector<32x32xf32>
    %cst_108 = arith.constant dense<0.000000e+00> : vector<16x32xf32>
    %206 = tpu.matmul %199, %205, %cst_108 {dimension_numbers = #tpu.dot_dimension_numbers<[1], [0], [0], [1], [0, 0, 1, 1], [], []>} : vector<16x32xf32>, vector<32x32xf32>, vector<16x32xf32> -> vector<16x32xf32>
    %c1_109 = arith.constant 1 : index
    %c0_110 = arith.constant 0 : index
    %c0_111 = arith.constant 0 : index
    %207 = vector.load %arg10[%c1_109, %c0_110, %c0_111] : memref<2x32x32xf32, #tpu.memory_space<vmem>>, vector<1x32x32xf32>
    %208 = vector.shape_cast %207 : vector<1x32x32xf32> to vector<32x32xf32>
    %cst_112 = arith.constant dense<0.000000e+00> : vector<16x32xf32>
    %209 = tpu.matmul %199, %208, %cst_112 {dimension_numbers = #tpu.dot_dimension_numbers<[1], [0], [0], [1], [0, 0, 1, 1], [], []>} : vector<16x32xf32>, vector<32x32xf32>, vector<16x32xf32> -> vector<16x32xf32>
    %cst_113 = arith.constant dense<0.000000e+00> : vector<48x32xf32>
    %210 = tpu.matmul %7, %206, %cst_113 {dimension_numbers = #tpu.dot_dimension_numbers<[1], [0], [0], [1], [0, 0, 1, 1], [], []>} : vector<48x16xf32>, vector<16x32xf32>, vector<48x32xf32> -> vector<48x32xf32>
    %cst_114 = arith.constant dense<0.000000e+00> : vector<48x32xf32>
    %211 = tpu.matmul %11, %209, %cst_114 {dimension_numbers = #tpu.dot_dimension_numbers<[1], [0], [0], [1], [0, 0, 1, 1], [], []>} : vector<48x16xf32>, vector<16x32xf32>, vector<48x32xf32> -> vector<48x32xf32>
    %212 = arith.addf %210, %211 : vector<48x32xf32>
    %c1_115 = arith.constant 1 : index
    %c0_116 = arith.constant 0 : index
    %c0_117 = arith.constant 0 : index
    %213 = vector.load %arg11[%c1_115, %c0_116, %c0_117] : memref<2x1x32xf32, #tpu.memory_space<vmem>>, vector<1x1x32xf32>
    %214 = vector.shape_cast %213 : vector<1x1x32xf32> to vector<1x32xf32>
    %215 = vector.broadcast %203 : vector<48x1xf32> to vector<48x32xf32>
    %216 = vector.broadcast %214 : vector<1x32xf32> to vector<48x32xf32>
    %217 = arith.mulf %215, %216 : vector<48x32xf32>
    %218 = arith.addf %212, %217 : vector<48x32xf32>
    %c1_118 = arith.constant 1 : index
    %c0_119 = arith.constant 0 : index
    %c0_120 = arith.constant 0 : index
    %219 = vector.load %arg12[%c1_118, %c0_119, %c0_120] : memref<2x8x32xf32, #tpu.memory_space<vmem>>, vector<1x8x32xf32>
    %220 = vector.shape_cast %219 : vector<1x8x32xf32> to vector<8x32xf32>
    %cst_121 = arith.constant dense<0.000000e+00> : vector<48x32xf32>
    %221 = tpu.matmul %80, %220, %cst_121 {dimension_numbers = #tpu.dot_dimension_numbers<[1], [0], [0], [1], [0, 0, 1, 1], [], []>} : vector<48x8xf32>, vector<8x32xf32>, vector<48x32xf32> -> vector<48x32xf32>
    %222 = arith.addf %218, %221 : vector<48x32xf32>
    %c1_122 = arith.constant 1 : index
    %c0_123 = arith.constant 0 : index
    %c0_124 = arith.constant 0 : index
    %223 = vector.load %arg13[%c1_122, %c0_123, %c0_124] : memref<2x1x32xf32, #tpu.memory_space<vmem>>, vector<1x1x32xf32>
    %224 = vector.shape_cast %223 : vector<1x1x32xf32> to vector<1x32xf32>
    %225 = vector.broadcast %224 : vector<1x32xf32> to vector<48x32xf32>
    %226 = arith.addf %222, %225 : vector<48x32xf32>
    %227 = math.absf %226 : vector<48x32xf32>
    %cst_125 = arith.constant 0.000000e+00 : f32
    %228 = vector.broadcast %cst_125 : f32 to vector<48x32xf32>
    %229 = arith.subf %228, %227 : vector<48x32xf32>
    %230 = math.exp %229 : vector<48x32xf32>
    %cst_126 = arith.constant 1.000000e+00 : f32
    %231 = vector.broadcast %cst_126 : f32 to vector<48x32xf32>
    %232 = arith.addf %231, %230 : vector<48x32xf32>
    %233 = tpu.reciprocal %232 {approx = true} : vector<48x32xf32> -> vector<48x32xf32>
    %cst_127 = arith.constant 0.000000e+00 : f32
    %234 = vector.broadcast %cst_127 : f32 to vector<48x32xf32>
    %235 = arith.cmpf oge, %226, %234 : vector<48x32xf32>
    %236 = arith.mulf %230, %233 : vector<48x32xf32>
    %237 = arith.select %235, %233, %236 : vector<48x32xi1>, vector<48x32xf32>
    %238 = arith.mulf %226, %237 : vector<48x32xf32>
    %c1_128 = arith.constant 1 : index
    %c0_129 = arith.constant 0 : index
    %c0_130 = arith.constant 0 : index
    %239 = vector.load %arg14[%c1_128, %c0_129, %c0_130] : memref<2x32x32xf32, #tpu.memory_space<vmem>>, vector<1x32x32xf32>
    %240 = vector.shape_cast %239 : vector<1x32x32xf32> to vector<32x32xf32>
    %cst_131 = arith.constant dense<0.000000e+00> : vector<48x32xf32>
    %241 = tpu.matmul %238, %240, %cst_131 {dimension_numbers = #tpu.dot_dimension_numbers<[1], [0], [0], [1], [0, 0, 1, 1], [], []>} : vector<48x32xf32>, vector<32x32xf32>, vector<48x32xf32> -> vector<48x32xf32>
    %c1_132 = arith.constant 1 : index
    %c0_133 = arith.constant 0 : index
    %c0_134 = arith.constant 0 : index
    %242 = vector.load %arg15[%c1_132, %c0_133, %c0_134] : memref<2x1x32xf32, #tpu.memory_space<vmem>>, vector<1x1x32xf32>
    %243 = vector.shape_cast %242 : vector<1x1x32xf32> to vector<1x32xf32>
    %244 = vector.broadcast %243 : vector<1x32xf32> to vector<48x32xf32>
    %245 = arith.addf %241, %244 : vector<48x32xf32>
    %246 = math.absf %245 : vector<48x32xf32>
    %cst_135 = arith.constant 0.000000e+00 : f32
    %247 = vector.broadcast %cst_135 : f32 to vector<48x32xf32>
    %248 = arith.subf %247, %246 : vector<48x32xf32>
    %249 = math.exp %248 : vector<48x32xf32>
    %cst_136 = arith.constant 1.000000e+00 : f32
    %250 = vector.broadcast %cst_136 : f32 to vector<48x32xf32>
    %251 = arith.addf %250, %249 : vector<48x32xf32>
    %252 = tpu.reciprocal %251 {approx = true} : vector<48x32xf32> -> vector<48x32xf32>
    %cst_137 = arith.constant 0.000000e+00 : f32
    %253 = vector.broadcast %cst_137 : f32 to vector<48x32xf32>
    %254 = arith.cmpf oge, %245, %253 : vector<48x32xf32>
    %255 = arith.mulf %249, %252 : vector<48x32xf32>
    %256 = arith.select %254, %252, %255 : vector<48x32xi1>, vector<48x32xf32>
    %257 = arith.mulf %245, %256 : vector<48x32xf32>
    %cst_138 = arith.constant dense<0.000000e+00> : vector<16x32xf32>
    %258 = tpu.matmul %19, %257, %cst_138 {dimension_numbers = #tpu.dot_dimension_numbers<[1], [0], [0], [1], [0, 0, 1, 1], [], []>} : vector<16x48xf32>, vector<48x32xf32>, vector<16x32xf32> -> vector<16x32xf32>
    %c1_139 = arith.constant 1 : index
    %c0_140 = arith.constant 0 : index
    %c0_141 = arith.constant 0 : index
    %259 = vector.load %arg19[%c1_139, %c0_140, %c0_141] : memref<2x32x32xf32, #tpu.memory_space<vmem>>, vector<1x32x32xf32>
    %260 = vector.shape_cast %259 : vector<1x32x32xf32> to vector<32x32xf32>
    %cst_142 = arith.constant dense<0.000000e+00> : vector<16x32xf32>
    %261 = tpu.matmul %199, %260, %cst_142 {dimension_numbers = #tpu.dot_dimension_numbers<[1], [0], [0], [1], [0, 0, 1, 1], [], []>} : vector<16x32xf32>, vector<32x32xf32>, vector<16x32xf32> -> vector<16x32xf32>
    %c1_143 = arith.constant 1 : index
    %c0_144 = arith.constant 0 : index
    %c0_145 = arith.constant 0 : index
    %262 = vector.load %arg20[%c1_143, %c0_144, %c0_145] : memref<2x32x32xf32, #tpu.memory_space<vmem>>, vector<1x32x32xf32>
    %263 = vector.shape_cast %262 : vector<1x32x32xf32> to vector<32x32xf32>
    %cst_146 = arith.constant dense<0.000000e+00> : vector<16x32xf32>
    %264 = tpu.matmul %258, %263, %cst_146 {dimension_numbers = #tpu.dot_dimension_numbers<[1], [0], [0], [1], [0, 0, 1, 1], [], []>} : vector<16x32xf32>, vector<32x32xf32>, vector<16x32xf32> -> vector<16x32xf32>
    %265 = arith.addf %261, %264 : vector<16x32xf32>
    %c1_147 = arith.constant 1 : index
    %c0_148 = arith.constant 0 : index
    %c0_149 = arith.constant 0 : index
    %266 = vector.load %arg21[%c1_147, %c0_148, %c0_149] : memref<2x1x32xf32, #tpu.memory_space<vmem>>, vector<1x1x32xf32>
    %267 = vector.shape_cast %266 : vector<1x1x32xf32> to vector<1x32xf32>
    %268 = vector.broadcast %267 : vector<1x32xf32> to vector<16x32xf32>
    %269 = arith.addf %265, %268 : vector<16x32xf32>
    %270 = math.absf %269 : vector<16x32xf32>
    %cst_150 = arith.constant 0.000000e+00 : f32
    %271 = vector.broadcast %cst_150 : f32 to vector<16x32xf32>
    %272 = arith.subf %271, %270 : vector<16x32xf32>
    %273 = math.exp %272 : vector<16x32xf32>
    %cst_151 = arith.constant 1.000000e+00 : f32
    %274 = vector.broadcast %cst_151 : f32 to vector<16x32xf32>
    %275 = arith.addf %274, %273 : vector<16x32xf32>
    %276 = tpu.reciprocal %275 {approx = true} : vector<16x32xf32> -> vector<16x32xf32>
    %cst_152 = arith.constant 0.000000e+00 : f32
    %277 = vector.broadcast %cst_152 : f32 to vector<16x32xf32>
    %278 = arith.cmpf oge, %269, %277 : vector<16x32xf32>
    %279 = arith.mulf %273, %276 : vector<16x32xf32>
    %280 = arith.select %278, %276, %279 : vector<16x32xi1>, vector<16x32xf32>
    %281 = arith.mulf %269, %280 : vector<16x32xf32>
    %c1_153 = arith.constant 1 : index
    %c0_154 = arith.constant 0 : index
    %c0_155 = arith.constant 0 : index
    %282 = vector.load %arg22[%c1_153, %c0_154, %c0_155] : memref<2x32x32xf32, #tpu.memory_space<vmem>>, vector<1x32x32xf32>
    %283 = vector.shape_cast %282 : vector<1x32x32xf32> to vector<32x32xf32>
    %cst_156 = arith.constant dense<0.000000e+00> : vector<16x32xf32>
    %284 = tpu.matmul %281, %283, %cst_156 {dimension_numbers = #tpu.dot_dimension_numbers<[1], [0], [0], [1], [0, 0, 1, 1], [], []>} : vector<16x32xf32>, vector<32x32xf32>, vector<16x32xf32> -> vector<16x32xf32>
    %c1_157 = arith.constant 1 : index
    %c0_158 = arith.constant 0 : index
    %c0_159 = arith.constant 0 : index
    %285 = vector.load %arg23[%c1_157, %c0_158, %c0_159] : memref<2x1x32xf32, #tpu.memory_space<vmem>>, vector<1x1x32xf32>
    %286 = vector.shape_cast %285 : vector<1x1x32xf32> to vector<1x32xf32>
    %287 = vector.broadcast %286 : vector<1x32xf32> to vector<16x32xf32>
    %288 = arith.addf %284, %287 : vector<16x32xf32>
    %289 = arith.addf %199, %288 : vector<16x32xf32>
    %290 = arith.addf %43, %289 : vector<16x32xf32>
    %cst_160 = arith.constant dense<0.000000e+00> : vector<16xf32>
    %291 = vector.multi_reduction <add>, %290, %cst_160 [1] : vector<16x32xf32> to vector<16xf32>
    %292 = vector.shape_cast %291 : vector<16xf32> to vector<16x1xf32>
    %cst_161 = arith.constant 3.200000e+01 : f32
    %293 = vector.broadcast %cst_161 : f32 to vector<16x1xf32>
    %294 = arith.divf %292, %293 : vector<16x1xf32>
    %295 = vector.broadcast %294 : vector<16x1xf32> to vector<16x32xf32>
    %296 = arith.subf %290, %295 : vector<16x32xf32>
    %297 = arith.mulf %296, %296 : vector<16x32xf32>
    %cst_162 = arith.constant dense<0.000000e+00> : vector<16xf32>
    %298 = vector.multi_reduction <add>, %297, %cst_162 [1] : vector<16x32xf32> to vector<16xf32>
    %299 = vector.shape_cast %298 : vector<16xf32> to vector<16x1xf32>
    %cst_163 = arith.constant 3.200000e+01 : f32
    %300 = vector.broadcast %cst_163 : f32 to vector<16x1xf32>
    %301 = arith.divf %299, %300 : vector<16x1xf32>
    %cst_164 = arith.constant 9.99999974E-6 : f32
    %302 = vector.broadcast %cst_164 : f32 to vector<16x1xf32>
    %303 = arith.addf %301, %302 : vector<16x1xf32>
    %304 = math.rsqrt %303 : vector<16x1xf32>
    %305 = vector.broadcast %304 : vector<16x1xf32> to vector<16x32xf32>
    %306 = arith.mulf %296, %305 : vector<16x32xf32>
    %c0_165 = arith.constant 0 : index
    %c0_166 = arith.constant 0 : index
    %307 = vector.load %arg24[%c0_165, %c0_166] : memref<1x32xf32, #tpu.memory_space<vmem>>, vector<1x32xf32>
    %308 = vector.broadcast %307 : vector<1x32xf32> to vector<16x32xf32>
    %309 = arith.mulf %306, %308 : vector<16x32xf32>
    %c0_167 = arith.constant 0 : index
    %c0_168 = arith.constant 0 : index
    %310 = vector.load %arg25[%c0_167, %c0_168] : memref<1x32xf32, #tpu.memory_space<vmem>>, vector<1x32xf32>
    %311 = vector.broadcast %310 : vector<1x32xf32> to vector<16x32xf32>
    %312 = arith.addf %309, %311 : vector<16x32xf32>
    %cst_169 = arith.constant dense<0.000000e+00> : vector<32xf32>
    %313 = vector.multi_reduction <add>, %312, %cst_169 [0] : vector<16x32xf32> to vector<32xf32>
    %314 = vector.shape_cast %313 : vector<32xf32> to vector<1x32xf32>
    %c0_170 = arith.constant 0 : index
    %c0_171 = arith.constant 0 : index
    %315 = vector.load %arg26[%c0_170, %c0_171] : memref<1x32xf32, #tpu.memory_space<vmem>>, vector<1x32xf32>
    tpu.vector_store %arg26[%c0_170, %c0_171], %314 {strides = array<i32>} : memref<1x32xf32, #tpu.memory_space<vmem>>, vector<1x32xf32>,
    return
  }
}

</mosaic_0001>

<bundles_post_ra>
// kernel: tpu_custom_call.1
= control target key start
LH: loop header
LB: loop body
LE: loop exit
PB: predicated region body
PF: predicated region fallthrough
CT: control target
= control target key end

     0   :  { %s6255_s0 = inlined_call_operand.hbm [shape: f32[16,11], index: 0, kind: input, shape index: {}]   ;;  %s6256_s1 = inlined_call_operand.vmem [shape: f32[16,3], index: 1, kind: input, shape index: {}]   ;;  %s6257_s2 = inlined_call_operand.vmem [shape: f32[48,3], index: 2, kind: input, shape index: {}]   ;;  %s6258_s3 = inlined_call_operand.vmem [shape: s32[48,2], index: 3, kind: input, shape index: {}]   ;;  %s6259_s4 = inlined_call_operand.hbm [shape: s32[2,48], index: 4, kind: input, shape index: {}]   ;;  %s6260_s5 = inlined_call_operand.hbm [shape: f32[11,32], index: 5, kind: input, shape index: {}]   ;;  %s6261_s6 = inlined_call_operand.hbm [shape: f32[1,32], index: 6, kind: input, shape index: {}]   ;;  %s6262_s7 = inlined_call_operand.vmem [shape: f32[9,8], index: 7, kind: input, shape index: {}]   ;;  %s6263_s8 = inlined_call_operand.hbm [shape: f32[1,8], index: 8, kind: input, shape index: {}]   ;;  %s6264_s9 = inlined_call_operand.vmem [shape: f32[2,32,32], index: 9, kind: input, shape index: {}]   ;;  %s6265_s10 = inlined_call_operand.vmem [shape: f32[2,32,32], index: 10, kind: input, shape index: {}]   ;;  %s6266_s11 = inlined_call_operand.hbm [shape: f32[2,1,32], index: 11, kind: input, shape index: {}]   ;;  %s6267_s12 = inlined_call_operand.hbm [shape: f32[2,8,32], index: 12, kind: input, shape index: {}]   ;;  %s6268_s13 = inlined_call_operand.vmem [shape: f32[2,1,32], index: 13, kind: input, shape index: {}]   ;;  %s6269_s14 = inlined_call_operand.vmem [shape: f32[2,32,32], index: 14, kind: input, shape index: {}]   ;;  %s6270_s15 = inlined_call_operand.vmem [shape: f32[2,1,32], index: 15, kind: input, shape index: {}]   ;;  %s6271_s16 = inlined_call_operand.vmem [shape: f32[2,32,32], index: 16, kind: input, shape index: {}]   ;;  %s6272_s17 = inlined_call_operand.vmem [shape: f32[2,1,32], index: 17, kind: input, shape index: {}]   ;;  %s6273_s18 = inlined_call_operand.vmem [shape: f32[2,32,1], index: 18, kind: input, shape index: {}]   ;;  %s6274_s19 = inlined_call_operand.hbm [shape: f32[2,32,32], index: 19, kind: input, shape index: {}]   ;;  %s6275_s20 = inlined_call_operand.hbm [shape: f32[2,32,32], index: 20, kind: input, shape index: {}]   ;;  %s6276_s21 = inlined_call_operand.vmem [shape: f32[2,1,32], index: 21, kind: input, shape index: {}]   ;;  %s6277_s22 = inlined_call_operand.hbm [shape: f32[2,32,32], index: 22, kind: input, shape index: {}]   ;;  %s6278_s23 = inlined_call_operand.vmem [shape: f32[2,1,32], index: 23, kind: input, shape index: {}]   ;;  %s6279_s24 = inlined_call_operand.vmem [shape: f32[1,32], index: 24, kind: input, shape index: {}]   ;;  %s6280_s25 = inlined_call_operand.vmem [shape: f32[1,32], index: 25, kind: input, shape index: {}]   ;;  %s6281_s26 = inlined_call_operand.hbm [shape: f32[1,32], index: 26, kind: output, shape index: {}]  }
   0x1   :  { %6295 = sst [smem:[#allocation27_spill]] %s6255_s0 }
   0x2   :  { %6296 = sst [smem:[#allocation28_spill]] %s6256_s1 }
   0x3   :  { %6297 = sst [smem:[#allocation29_spill]] %s6257_s2 }
   0x4   :  { %6298 = sst [smem:[#allocation30_spill]] %s6258_s3 }
   0x5   :  { %6299 = sst [smem:[#allocation31_spill]] %s6259_s4 }
   0x6   :  { %6300 = sst [smem:[#allocation32_spill]] %s6260_s5 }
   0x7   :  { %6301 = sst [smem:[#allocation33_spill]] %s6261_s6 }
   0x8   :  { %6302 = sst [smem:[#allocation34_spill]] %s6262_s7 }
   0x9   :  { %6303 = sst [smem:[#allocation35_spill]] %s6263_s8 }
   0xa   :  { %6304 = sst [smem:[#allocation36_spill]] %s6264_s9 }
   0xb   :  { %6305 = sst [smem:[#allocation37_spill]] %s6265_s10 }
   0xc   :  { %6306 = sst [smem:[#allocation38_spill]] %s6281_s26 }
   0xd   :  { %31 = vsyncpa [#allocation3], 0 }
   0xe   :  { %32 = vsyncpa [#allocation6], 0 }
   0xf   :  { %33 = vsyncpa [#allocation9], 0 }
  0x10   :  { %34 = vsyncpa [#allocation12], 0 }
  0x11   :  { %35 = vsyncpa [#allocation15], 0 }
  0x12   :  { %36 = vsyncpa [#allocation18], 0 }
  0x13   :  { %37 = vsyncpa [#allocation4], 0  ;;  %s5167_s27 = smov [#allocation5]   ;;  %s5168_s7 = smov [#allocation8]  }
  0x14   :  { %s62_s3 = sshll.u32 %s5167_s27, 4  ;;  %s84_s28 = sshll.u32 %s5168_s7, 4  ;;  %s63_s3 = int_to_ptr.vmem [resolvable:$true] %s62_s3  ;;  %s85_s28 = int_to_ptr.vmem [resolvable:$true] %s84_s28 }
  0x15   :  { %s6307_s29 = sld [smem:[#allocation31_spill]] }
  0x1b   :  { %s4911_s0 = scalar_lea.hbm %s6307_s29, 32 }
  0x1c   :  { %p4912_p0 = scmp.ne.s32.totalorder %s6307_s29, %s4911_s0  ;;  %p4915_p1 = scmp.lt.u32.totalorder %s4911_s0, %s6307_s29 }
  0x1e   :  { %p4917_p2 = pnand %p4915_p1, %p4912_p0 }
  0x20   :  { %4920 = shalt.err (!%p4917_p2)
}
  0x21   :  { %s4921_s10 = scalar_lea.vmem %s63_s3, 32  ;;  %p4926_p4 = scmp.lt.s32.totalorder %s63_s3, %s63_s3 }
  0x22   :  { %p4922_p3 = scmp.ne.s32.totalorder %s63_s3, %s4921_s10  ;;  %p4927_p5 = scmp.lt.s32.totalorder %s4921_s10, %s4921_s10 }
  0x24   :  { %p4928_p6 = por %p4927_p5, %p4926_p4 }
  0x26   :  { %p4929_p7 = pnand %p4928_p6, %p4922_p3 }
  0x28   :  { %4932 = shalt.err (!%p4929_p7)
}
  0x29   :  { %65 = dma.hbm_to_vmem [thread:$0]  %s6307_s29, 32, %s63_s3, [#allocation6]  }
  0x2a   :  { %s6308_s8 = sld [smem:[#allocation33_spill]] }
  0x30   :  { %s4933_s4 = scalar_lea.hbm %s6308_s8, 16 }
  0x31   :  { %p4934_p8 = scmp.ne.s32.totalorder %s6308_s8, %s4933_s4  ;;  %p4937_p9 = scmp.lt.u32.totalorder %s4933_s4, %s6308_s8 }
  0x33   :  { %p4939_p10 = pnand %p4937_p9, %p4934_p8 }
  0x35   :  { %4942 = shalt.err (!%p4939_p10)
}
  0x36   :  { %s4943_s5 = scalar_lea.vmem %s85_s28, 16  ;;  %s4947_s10 = scalar_lea.vmem %s85_s28, 32 }
  0x37   :  { %p4944_p11 = scmp.ne.s32.totalorder %s85_s28, %s4943_s5  ;;  %p4948_p12 = scmp.lt.s32.totalorder %s85_s28, %s85_s28 }
  0x38   :  { %p4949_p13 = scmp.lt.s32.totalorder %s4947_s10, %s4943_s5 }
  0x3a   :  { %p4950_p0 = por %p4949_p13, %p4948_p12 }
  0x3c   :  { %p4951_p1 = pnand %p4950_p0, %p4944_p11 }
  0x3e   :  { %4954 = shalt.err (!%p4951_p1)
}
  0x3f   :  { %87 = dma.hbm_to_vmem [thread:$0]  %s6308_s8, 16, %s85_s28, [#allocation9]  }
  0x40   :  { %s5169_s6 = smov [#allocation11]   ;;  %s4955_s4 = scalar_lea.hbm %s6266_s11, 32 }
  0x41   :  { %s109_s1 = sshll.u32 %s5169_s6, 4  ;;  %p4956_p2 = scmp.ne.s32.totalorder %s6266_s11, %s4955_s4  ;;  %s110_s1 = int_to_ptr.vmem [resolvable:$true] %s109_s1 }
  0x42   :  { %p4959_p3 = scmp.lt.u32.totalorder %s4955_s4, %s6266_s11 }
  0x44   :  { %p4961_p4 = pnand %p4959_p3, %p4956_p2 }
  0x46   :  { %4964 = shalt.err (!%p4961_p4)
}
  0x47   :  { %s4965_s5 = scalar_lea.vmem %s110_s1, 32  ;;  %p4970_p6 = scmp.lt.s32.totalorder %s110_s1, %s110_s1 }
  0x48   :  { %p4966_p5 = scmp.ne.s32.totalorder %s110_s1, %s4965_s5  ;;  %p4971_p7 = scmp.lt.s32.totalorder %s4965_s5, %s4965_s5 }
  0x4a   :  { %p4972_p8 = por %p4971_p7, %p4970_p6 }
  0x4c   :  { %p4973_p9 = pnand %p4972_p8, %p4966_p5 }
  0x4e   :  { %4976 = shalt.err (!%p4973_p9)
}
  0x4f   :  { %s5170_s28 = smov 16   ;;  %s5171_s8 = smov 1  }
  0x50   :  { %115 = dma.hbm_to_vmem [thread:$0]  %s6266_s11, 32, %s110_s1, [#allocation12], %s5170_s28, %s5170_s28, %s5171_s8  }
  0x51   :  { %s5172_s29 = smov [#allocation14]   ;;  %s5173_s27 = smov [#allocation2]  }
  0x52   :  { %s145_s6 = sshll.u32 %s5172_s29, 4  ;;  %s43_s7 = sshll.u32 %s5173_s27, 4  ;;  %s146_s6 = int_to_ptr.vmem [resolvable:$true] %s145_s6  ;;  %s44_s7 = int_to_ptr.vmem [resolvable:$true] %s43_s7 }
  0x53   :  { %s4977_s30 = scalar_lea.hbm %s6274_s19, 1024 }
  0x54   :  { %p4978_p10 = scmp.ne.s32.totalorder %s6274_s19, %s4977_s30  ;;  %p4981_p11 = scmp.lt.u32.totalorder %s4977_s30, %s6274_s19 }
  0x56   :  { %p4983_p12 = pnand %p4981_p11, %p4978_p10 }
  0x58   :  { %4986 = shalt.err (!%p4983_p12)
}
  0x59   :  { %s4987_s11 = scalar_lea.vmem %s146_s6, 1024  ;;  %p4992_p0 = scmp.lt.s32.totalorder %s146_s6, %s146_s6 }
  0x5a   :  { %p4988_p13 = scmp.ne.s32.totalorder %s146_s6, %s4987_s11  ;;  %p4993_p1 = scmp.lt.s32.totalorder %s4987_s11, %s4987_s11 }
  0x5c   :  { %p4994_p2 = por %p4993_p1, %p4992_p0 }
  0x5e   :  { %p4995_p3 = pnand %p4994_p2, %p4988_p13 }
  0x60   :  { %4998 = shalt.err (!%p4995_p3)
}
  0x61   :  { %s5174_s1 = smov 128   ;;  %s5175_s28 = smov 8  }
  0x62   :  { %151 = dma.hbm_to_vmem [thread:$0]  %s6274_s19, 1024, %s146_s6, [#allocation15], %s5174_s1, %s5174_s1, %s5175_s28  }
  0x63   :  { %s6309_s29 = sld [smem:[#allocation27_spill]] }
  0x69   :  { %s4999_s27 = scalar_lea.hbm %s6309_s29, 256 }
  0x6a   :  { %p5000_p4 = scmp.ne.s32.totalorder %s6309_s29, %s4999_s27  ;;  %p5003_p5 = scmp.lt.u32.totalorder %s4999_s27, %s6309_s29 }
  0x6c   :  { %p5005_p6 = pnand %p5003_p5, %p5000_p4 }
  0x6e   :  { %5008 = shalt.err (!%p5005_p6)
}
  0x6f   :  { %s5009_s2 = scalar_lea.vmem %s44_s7, 256  ;;  %p5014_p8 = scmp.lt.s32.totalorder %s44_s7, %s44_s7 }
  0x70   :  { %p5010_p7 = scmp.ne.s32.totalorder %s44_s7, %s5009_s2  ;;  %p5015_p9 = scmp.lt.s32.totalorder %s5009_s2, %s5009_s2 }
  0x72   :  { %p5016_p10 = por %p5015_p9, %p5014_p8 }
  0x74   :  { %p5017_p11 = pnand %p5016_p10, %p5010_p7 }
  0x76   :  { %5020 = shalt.err (!%p5017_p11)
}
  0x77   :  { %49 = dma.hbm_to_vmem [thread:$0]  %s6309_s29, 256, %s44_s7, [#allocation3], %s5174_s1, %s5174_s1, %s5175_s28  }
  0x78   :  { %s5176_s5 = smov [#allocation7]   ;;  %s5177_s8 = smov [#allocation10]  }
  0x79   :  { %s71_s11 = sshll.u32 %s5176_s5, 4  ;;  %s96_s10 = sshll.u32 %s5177_s8, 4  ;;  %s72_s11 = int_to_ptr.vmem [resolvable:$true] %s71_s11  ;;  %s97_s10 = int_to_ptr.vmem [resolvable:$true] %s96_s10 }
  0x7a   :  { %s6310_s27 = sld [smem:[#allocation32_spill]] }
  0x80   :  { %s5021_s4 = scalar_lea.hbm %s6310_s27, 256 }
  0x81   :  { %p5022_p12 = scmp.ne.s32.totalorder %s6310_s27, %s5021_s4  ;;  %p5025_p13 = scmp.lt.u32.totalorder %s5021_s4, %s6310_s27 }
  0x83   :  { %p5027_p0 = pnand %p5025_p13, %p5022_p12 }
  0x85   :  { %5030 = shalt.err (!%p5027_p0)
}
  0x86   :  { %s5031_s7 = scalar_lea.vmem %s72_s11, 256  ;;  %p5036_p2 = scmp.lt.s32.totalorder %s72_s11, %s72_s11 }
  0x87   :  { %p5032_p1 = scmp.ne.s32.totalorder %s72_s11, %s5031_s7  ;;  %p5037_p3 = scmp.lt.s32.totalorder %s5031_s7, %s5031_s7 }
  0x89   :  { %p5038_p4 = por %p5037_p3, %p5036_p2 }
  0x8b   :  { %p5039_p5 = pnand %p5038_p4, %p5032_p1 }
  0x8d   :  { %5042 = shalt.err (!%p5039_p5)
}
  0x8e   :  { %77 = dma.hbm_to_vmem [thread:$0]  %s6310_s27, 256, %s72_s11, [#allocation6], %s5174_s1, %s5174_s1, %s5175_s28  }
  0x8f   :  { %s6311_s8 = sld [smem:[#allocation35_spill]] }
  0x95   :  { %s5043_s26 = scalar_lea.hbm %s6311_s8, 16 }
  0x96   :  { %p5044_p6 = scmp.ne.s32.totalorder %s6311_s8, %s5043_s26  ;;  %p5047_p7 = scmp.lt.u32.totalorder %s5043_s26, %s6311_s8 }
  0x98   :  { %p5049_p8 = pnand %p5047_p7, %p5044_p6 }
  0x9a   :  { %5052 = shalt.err (!%p5049_p8)
}
  0x9b   :  { %s5053_s0 = scalar_lea.vmem %s97_s10, 16  ;;  %s5057_s2 = scalar_lea.vmem %s97_s10, 32 }
  0x9c   :  { %p5054_p9 = scmp.ne.s32.totalorder %s97_s10, %s5053_s0  ;;  %p5058_p10 = scmp.lt.s32.totalorder %s97_s10, %s97_s10 }
  0x9d   :  { %p5059_p11 = scmp.lt.s32.totalorder %s5057_s2, %s5053_s0 }
  0x9f   :  { %p5060_p12 = por %p5059_p11, %p5058_p10 }
  0xa1   :  { %p5061_p13 = pnand %p5060_p12, %p5054_p9 }
  0xa3   :  { %5064 = shalt.err (!%p5061_p13)
}
  0xa4   :  { %99 = dma.hbm_to_vmem [thread:$0]  %s6311_s8, 16, %s97_s10, [#allocation9]  }
  0xa5   :  { %s5178_s7 = smov [#allocation13]   ;;  %s5179_s19 = smov [#allocation16]  }
  0xa6   :  { %s121_s29 = sshll.u32 %s5178_s7, 4  ;;  %s157_s6 = sshll.u32 %s5179_s19, 4  ;;  %s122_s29 = int_to_ptr.vmem [resolvable:$true] %s121_s29  ;;  %s158_s6 = int_to_ptr.vmem [resolvable:$true] %s157_s6 }
  0xa7   :  { %s5065_s3 = scalar_lea.hbm %s6267_s12, 256 }
  0xa8   :  { %p5066_p0 = scmp.ne.s32.totalorder %s6267_s12, %s5065_s3  ;;  %p5069_p1 = scmp.lt.u32.totalorder %s5065_s3, %s6267_s12 }
  0xaa   :  { %p5071_p2 = pnand %p5069_p1, %p5066_p0 }
  0xac   :  { %5074 = shalt.err (!%p5071_p2)
}
  0xad   :  { %s5075_s10 = scalar_lea.vmem %s122_s29, 256  ;;  %p5080_p4 = scmp.lt.s32.totalorder %s122_s29, %s122_s29 }
  0xae   :  { %p5076_p3 = scmp.ne.s32.totalorder %s122_s29, %s5075_s10  ;;  %p5081_p5 = scmp.lt.s32.totalorder %s5075_s10, %s5075_s10 }
  0xb0   :  { %p5082_p6 = por %p5081_p5, %p5080_p4 }
  0xb2   :  { %p5083_p7 = pnand %p5082_p6, %p5076_p3 }
  0xb4   :  { %5086 = shalt.err (!%p5083_p7)
}
  0xb5   :  { %127 = dma.hbm_to_vmem [thread:$0]  %s6267_s12, 256, %s122_s29, [#allocation12], %s5174_s1, %s5174_s1, %s5175_s28  }
  0xb6   :  { %s5087_s7 = scalar_lea.hbm %s6275_s20, 1024 }
  0xb7   :  { %p5088_p8 = scmp.ne.s32.totalorder %s6275_s20, %s5087_s7  ;;  %p5091_p9 = scmp.lt.u32.totalorder %s5087_s7, %s6275_s20 }
  0xb9   :  { %p5093_p10 = pnand %p5091_p9, %p5088_p8 }
  0xbb   :  { %5096 = shalt.err (!%p5093_p10)
}
  0xbc   :  { %s5097_s4 = scalar_lea.vmem %s158_s6, 1024  ;;  %p5102_p12 = scmp.lt.s32.totalorder %s158_s6, %s158_s6 }
  0xbd   :  { %p5098_p11 = scmp.ne.s32.totalorder %s158_s6, %s5097_s4  ;;  %p5103_p13 = scmp.lt.s32.totalorder %s5097_s4, %s5097_s4 }
  0xbf   :  { %p5104_p0 = por %p5103_p13, %p5102_p12 }
  0xc1   :  { %p5105_p1 = pnand %p5104_p0, %p5098_p11 }
  0xc3   :  { %5108 = shalt.err (!%p5105_p1)
}
  0xc4   :  { %163 = dma.hbm_to_vmem [thread:$0]  %s6275_s20, 1024, %s158_s6, [#allocation15], %s5174_s1, %s5174_s1, %s5175_s28  }
  0xc5   :  { %s5180_s9 = smov [#allocation17]   ;;  %s5109_s8 = scalar_lea.hbm %s6277_s22, 1024 }
  0xc6   :  { %s171_s30 = sshll.u32 %s5180_s9, 4  ;;  %p5110_p2 = scmp.ne.s32.totalorder %s6277_s22, %s5109_s8  ;;  %s172_s30 = int_to_ptr.vmem [resolvable:$true] %s171_s30 }
  0xc7   :  { %p5113_p3 = scmp.lt.u32.totalorder %s5109_s8, %s6277_s22 }
  0xc9   :  { %p5115_p4 = pnand %p5113_p3, %p5110_p2 }
  0xcb   :  { %5118 = shalt.err (!%p5115_p4)
}
  0xcc   :  { %s5119_s19 = scalar_lea.vmem %s172_s30, 1024  ;;  %p5124_p6 = scmp.lt.s32.totalorder %s172_s30, %s172_s30 }
  0xcd   :  { %p5120_p5 = scmp.ne.s32.totalorder %s172_s30, %s5119_s19  ;;  %p5125_p7 = scmp.lt.s32.totalorder %s5119_s19, %s5119_s19 }
  0xcf   :  { %p5126_p8 = por %p5125_p7, %p5124_p6 }
  0xd1   :  { %p5127_p9 = pnand %p5126_p8, %p5120_p5 }
  0xd3   :  { %5130 = shalt.err (!%p5127_p9)
}
  0xd4   :  { %177 = dma.hbm_to_vmem [thread:$0]  %s6277_s22, 1024, %s172_s30, [#allocation18], %s5174_s1, %s5174_s1, %s5175_s28  }
  0xd5   :  { %5153 = dma.done.wait [#allocation3], 256  }
  0xd6   :  { %5154 = vsyncadd [#allocation3], 4294967040 }
  0xd7   :  { %5155 = dma.done.wait [#allocation6], 288  }
  0xd8   :  { %5156 = vsyncadd [#allocation6], 4294967008 }
  0xd9   :  { %5157 = dma.done.wait [#allocation9], 32  }
  0xda   :  { %5158 = vsyncadd [#allocation9], 4294967264 }
  0xdb   :  { %5159 = dma.done.wait [#allocation12], 288  }
  0xdc   :  { %5160 = vsyncadd [#allocation12], 4294967008 }
  0xdd   :  { %5161 = dma.done.wait [#allocation15], 2048  }
  0xde   :  { %5162 = vsyncadd [#allocation15], 4294965248 }
  0xdf   :  { %5163 = dma.done.wait [#allocation18], 1024  }
  0xe0   :  { %5164 = vsyncadd [#allocation18], 4294966272  ;;  %v5181_v0 = vmov 1   ;;  %v5182_v1 = vmov 0   ;;  %vm345_vm0 = vcmask 1042432   ;;  %vm5183_vm1 = vmmov 1  }
  0xe1   :  { %4697 = vset.pattern.permute.xlu1 %v5181_v0  ;;  %4696 = vset.pattern.permute.xlu0 %v5182_v1  ;;  %vm5462_vm2 = vmpackc.low %vm345_vm0, %vm5183_vm1  ;;  %vm338_vm3 = vcmask 89088   ;;  %v329_v3 = vld [vmem:[#allocation7] sm:$0xff]  ;;  %v330_v4 = vld [vmem:[#allocation7 + $0x8] sm:$0x7]  ;;  %s6314_s28 = sld [smem:[#allocation29_spill]]  ;;  %vm456_vm4 = vcmask 23552   ;;  %v220_v44 = vlaneseq }
  0xe2   :  { %v4453_v6 = vpack.c.bf16 %v330_v4, %v329_v3  ;;  %v327_v8 = vld [vmem:[#allocation2] sm:$0xff]  ;;  %v328_v18 = vld [vmem:[#allocation2 + $0x8] sm:$0xff]  ;;  %s6315_s11 = sld [smem:[#allocation30_spill]]  ;;  %s6316_s5 = sld [smem:[#allocation34_spill]]  ;;  %vm585_vm5 = vcmask 1040384   ;;  %vm746_vm13 = vcmask 130048  }
  0xe3   :  { %4114 = vmatprep.mubr.msk.f32.mxu0 %vm338_vm3, %v327_v8  ;;  %vm4460_vm6 = vmpackc.low %vm585_vm5, %vm5183_vm1  ;;  %s6317_s10 = sld [smem:[#allocation28_spill]]  ;;  %v5557_v46 = vand.u32 127, %v220_v44 }
  0xe4   :  { %4455 = vmatprep.subr.msk.bf16.mxu0 %vm5462_vm2, %v4453_v6  ;;  %s6319_s1 = sld [smem:[#allocation36_spill]] }
  0xe5   :  { %4458 = vmatpush3.bf16.msk.msra.mxu0 %vm5462_vm2, %v4453_v6  ;;  %v517_v49 = vcvt.s32.f32 %v5557_v46 }
  0xe7   :  { %v444_v5 = vld [vmem:[%s6314_s28] sm:$0xff]  ;;  %v446_v9 = vld [vmem:[%s6314_s28 + $0x10] sm:$0xff]  ;;  %v445_v11 = vld [vmem:[%s6314_s28 + $0x8] sm:$0xff]  ;;  %v5562_v52 = vmul.f32 0.75, %v517_v49 }
  0xe8   :  { %v450_v7 = vmul.f32 %v444_v5, %v444_v5  ;;  %v452_v10 = vmul.f32 %v446_v9, %v446_v9  ;;  %v447_v12 = vld [vmem:[%s6314_s28 + $0x18] sm:$0xff]  ;;  %v448_v13 = vld [vmem:[%s6314_s28 + $0x20] sm:$0xff]  ;;  %v451_v15 = vmul.f32 %v445_v11, %v445_v11  ;;  %v449_v17 = vld [vmem:[%s6314_s28 + $0x28] sm:$0xff]  ;;  %4115 = vmatmul.mubr.msk.f32.vlgmr.msra.gmra.mrb[0].mxu0 %vm338_vm3, %v328_v18 }
  0xe9   :  { %v453_v16 = vmul.f32 %v447_v12, %v447_v12  ;;  %v454_v21 = vmul.f32 %v448_v13, %v448_v13  ;;  %v455_v23 = vmul.f32 %v449_v17, %v449_v17  ;;  %v214_v26 = vld [vmem:[%s6315_s11] sm:$0xff]  ;;  %v215_v27 = vld [vmem:[%s6315_s11 + $0x8] sm:$0xff]  ;;  %v216_v29 = vld [vmem:[%s6315_s11 + $0x10] sm:$0xff] }
  0xea   :  { %v457_v14 = vsel %vm456_vm4, %v450_v7, 0.0  ;;  %v463_v19 = vsel %vm456_vm4, %v452_v10, 0.0  ;;  %v460_v20 = vsel %vm456_vm4, %v451_v15, 0.0  ;;  %v218_v28 = vld [vmem:[%s6315_s11 + $0x20] sm:$0xff]  ;;  %v558_v31 = vld [vmem:[%s6316_s5 + $0x8] sm:$0x1] }
  0xeb   :  { %458 = vadd.xlane.f32.xlu0 %v457_v14  ;;  %464 = vadd.xlane.f32.xlu1 %v463_v19  ;;  %v466_v22 = vsel %vm456_vm4, %v453_v16, 0.0  ;;  %v469_v24 = vsel %vm456_vm4, %v454_v21, 0.0  ;;  %v472_v25 = vsel %vm456_vm4, %v455_v23, 0.0  ;;  %v557_v30 = vld [vmem:[%s6316_s5] sm:$0xff]  ;;  %v217_v32 = vld [vmem:[%s6315_s11 + $0x18] sm:$0xff]  ;;  %v219_v34 = vld [vmem:[%s6315_s11 + $0x28] sm:$0xff] }
  0xec   :  { %v4459_v33 = vpack.c.bf16 %v558_v31, %v557_v30  ;;  %v744_v35 = vld [vmem:[%s6317_s10] sm:$0xff]  ;;  %v745_v36 = vld [vmem:[%s6317_s10 + $0x8] sm:$0xff]  ;;  %s6318_s11 = sld [smem:[#allocation37_spill]]  ;;  %v6294_v15 = vmov 0.0  }
  0xed   :  { %v4465_v37 = vpack.c.bf16 %v745_v36, %v744_v35  ;;  %v884_v40 = vld [vmem:[%s6319_s1] sm:$0xff]  ;;  %v885_v42 = vld [vmem:[%s6319_s1 + $0x8] sm:$0xff] }
  0xee   :  { %4461 = vmatprep.subr.msk.bf16.mxu1 %vm4460_vm6, %v4459_v33  ;;  %v5552_v43 = vpack.c.bf16 %v885_v42, %v884_v40 }
  0xef   :  { %461 = vadd.xlane.f32.xlu0 %v460_v20  ;;  %467 = vadd.xlane.f32.xlu1 %v466_v22 }
  0xf0   :  { %4464 = vmatpush3.bf16.msk.msra.mxu1 %vm4460_vm6, %v4459_v33  ;;  %4466 = vmatprep.subr.bf16.mxu0 %v4465_v37 }
  0xf1   :  { %4468 = vmatpush3.bf16.msra.mxu0 %v4465_v37  ;;  %4470 = vmatprep.subr.bf16.mxu1 %v5552_v43 }
  0xf2   :  { %v970_v38 = vld [vmem:[%s6318_s11] sm:$0xff]  ;;  %v971_v39 = vld [vmem:[%s6318_s11 + $0x8] sm:$0xff]  ;;  %v973_v49 = vld [vmem:[%s6318_s11 + $0x18] sm:$0xff] }
  0xf3   :  { %470 = vadd.xlane.f32.xlu0 %v469_v24  ;;  %473 = vadd.xlane.f32.xlu1 %v472_v25  ;;  %v5547_v41 = vpack.c.bf16 %v971_v39, %v970_v38 }
  0xf5   :  { %4478 = vmatprep.subr.bf16.mxu0 %v5547_v41 }
 0x104   :  { %259 = vperm.xlu1 %4697, %v214_v26  }
 0x108   :  { %4698 = vset.pattern.permute.xlu1 %v5182_v1 }
 0x109   :  { %223 = vperm.xlu0 %4696, %v214_v26   ;;  %226 = vperm.xlu1 %4698, %v215_v27  }
 0x10d   :  { %4705 = vset.pattern.permute.xlu0 %v5181_v0  ;;  %4699 = vset.pattern.permute.xlu1 %v5181_v0 }
 0x10e   :  { %271 = vperm.xlu0 %4705, %v218_v28   ;;  %262 = vperm.xlu1 %4699, %v215_v27  }
 0x112   :  { %4707 = vset.pattern.permute.xlu0 %v5182_v1  ;;  %4700 = vset.pattern.permute.xlu1 %v5182_v1 }
 0x113   :  { %229 = vperm.xlu1 %4700, %v216_v29  }
 0x117   :  { %4701 = vset.pattern.permute.xlu1 %v5181_v0 }
 0x118   :  { %265 = vperm.xlu1 %4701, %v216_v29  }
 0x11c   :  { %4702 = vset.pattern.permute.xlu1 %v5182_v1 }
 0x11d   :  { %232 = vperm.xlu1 %4702, %v217_v32  }
 0x121   :  { %4703 = vset.pattern.permute.xlu1 %v5181_v0 }
 0x122   :  { %268 = vperm.xlu1 %4703, %v217_v32  }
 0x126   :  { %4704 = vset.pattern.permute.xlu1 %v5182_v1 }
 0x127   :  { %235 = vperm.xlu1 %4704, %v218_v28  }
 0x12b   :  { %238 = vperm.xlu1 %4704, %v219_v34  }
 0x12f   :  { %4706 = vset.pattern.permute.xlu1 %v5181_v0 }
 0x130   :  { %274 = vperm.xlu1 %4706, %v219_v34  }
 0x134   :  { %4708 = vset.pattern.permute.xlu1 %v5182_v1 }
 0x178   :  { %v459_v45 = vpop.xlane.xlu0 %458  ;;  %v465_v47 = vpop.xlane.xlu1 %464 }
 0x179   :  { %4709 = vrsqrt.f32 %v459_v45  ;;  %vm477_vm7 = vcmp.eq.f32.partialorder %v459_v45, inf  ;;  %vm479_vm8 = vcmp.eq.f32.partialorder %v459_v45, 0.0  ;;  %v480_v55 = vand.u32 2147483648, %v459_v45 }
 0x17a   :  { %4711 = vrsqrt.f32 %v465_v47  ;;  %vm491_vm9 = vcmp.eq.f32.partialorder %v465_v47, inf  ;;  %vm493_vm10 = vcmp.eq.f32.partialorder %v465_v47, 0.0  ;;  %v494_v56 = vand.u32 2147483648, %v465_v47 }
 0x17c   :  { %v462_v48 = vpop.xlane.xlu0 %461  ;;  %v468_v50 = vpop.xlane.xlu1 %467 }
 0x17d   :  { %4713 = vrsqrt.f32 %v462_v48  ;;  %vm484_vm11 = vcmp.eq.f32.partialorder %v462_v48, inf  ;;  %vm486_vm12 = vcmp.eq.f32.partialorder %v462_v48, 0.0  ;;  %v487_v59 = vand.u32 2147483648, %v462_v48 }
 0x17e   :  { %4715 = vrsqrt.f32 %v468_v50  ;;  %vm498_vm14 = vcmp.eq.f32.partialorder %v468_v50, inf  ;;  %vm500_vm15 = vcmp.eq.f32.partialorder %v468_v50, 0.0  ;;  %v501_v61 = vand.u32 2147483648, %v468_v50 }
 0x180   :  { %v5560_v51 = vpop.xlane.xlu0 %470  ;;  %v5565_v53 = vpop.xlane.xlu1 %473 }
 0x181   :  { %4717 = vrsqrt.f32 %v5560_v51  ;;  %vm505_vm0 = vcmp.eq.f32.partialorder %v5560_v51, inf  ;;  %vm507_vm1 = vcmp.eq.f32.partialorder %v5560_v51, 0.0  ;;  %v508_v0 = vand.u32 2147483648, %v5560_v51 }
 0x182   :  { %4719 = vrsqrt.f32 %v5565_v53  ;;  %vm512_vm2 = vcmp.eq.f32.partialorder %v5565_v53, inf  ;;  %vm514_vm5 = vcmp.eq.f32.partialorder %v5565_v53, 0.0  ;;  %v515_v11 = vand.u32 2147483648, %v5565_v53 }
 0x183   :  { %v4710_v54 = vpop.eup %4709 }
 0x184   :  { %v4712_v57 = vpop.eup %4711  ;;  %v476_v58 = vmul.f32 %v4710_v54, %v459_v45  ;;  %v260_v62 = vpop.permute.xlu1 %259 }
 0x185   :  { %v490_v60 = vmul.f32 %v4712_v57, %v465_v47  ;;  %vm276_vm3 = vcmp.eq.s32.totalorder %v260_v62, %v5557_v46 }
 0x186   :  { %v478_v63 = vsel %vm477_vm7, %v459_v45, %v476_v58  ;;  %v5584_v16 = vsel %vm276_vm3, 1.0, %v6294_v15 }
 0x187   :  { %v4714_v1 = vpop.eup %4713  ;;  %v492_v2 = vsel %vm491_vm9, %v465_v47, %v490_v60  ;;  %v481_v3 = vsel %vm479_vm8, %v480_v55, %v478_v63 }
 0x188   :  { %v4716_v4 = vpop.eup %4715  ;;  %v495_v5 = vsel %vm493_vm10, %v494_v56, %v492_v2  ;;  %v483_v6 = vmul.f32 %v4714_v1, %v462_v48  ;;  %v520_v7 = vsub.f32 %v481_v3, %v5562_v52  ;;  %v224_v8 = vpop.permute.xlu0 %223 }
 0x189   :  { %v522_v9 = vsub.f32 %v495_v5, %v5562_v52  ;;  %v497_v10 = vmul.f32 %v4716_v4, %v468_v50  ;;  %v227_v12 = vpop.permute.xlu1 %226  ;;  %vm240_vm6 = vcmp.eq.s32.totalorder %v224_v8, %v5557_v46 }
 0x18a   :  { %v485_v13 = vsel %vm484_vm11, %v462_v48, %v483_v6  ;;  %v527_v14 = vmul.f32 1.5, %v520_v7  ;;  %v5587_v17 = vsel %vm240_vm6, 1.0, %v6294_v15  ;;  %vm241_vm7 = vcmp.eq.s32.totalorder %v227_v12, %v5557_v46  ;;  %v972_v48 = vld [vmem:[%s6318_s11 + $0x10] sm:$0xff] }
 0x18b   :  { %v4718_v18 = vpop.eup %4717  ;;  %v529_v19 = vmul.f32 1.5, %v522_v9  ;;  %v488_v20 = vsel %vm486_vm12, %v487_v59, %v485_v13  ;;  %v499_v21 = vsel %vm498_vm14, %v468_v50, %v497_v10  ;;  %v5599_v30 = vsub.f32 %v5587_v17, %v5584_v16  ;;  %v886_v9 = vld [vmem:[%s6319_s1 + $0x10] sm:$0xff]  ;;  %v887_v10 = vld [vmem:[%s6319_s1 + $0x18] sm:$0xff] }
 0x18c   :  { %v4720_v22 = vpop.eup %4719  ;;  %v521_v23 = vsub.f32 %v488_v20, %v5562_v52  ;;  %v502_v24 = vsel %vm500_vm15, %v501_v61, %v499_v21  ;;  %v504_v25 = vmul.f32 %v4718_v18, %v5560_v51  ;;  %v533_v26 = vmul.f32 %v527_v14, %v527_v14 }
 0x18d   :  { %v535_v27 = vmul.f32 %v529_v19, %v529_v19  ;;  %v523_v28 = vsub.f32 %v502_v24, %v5562_v52  ;;  %v511_v29 = vmul.f32 %v4720_v22, %v5565_v53  ;;  %v5605_v34 = vsel %vm241_vm7, 1.0, %v6294_v15  ;;  %v263_v35 = vpop.permute.xlu1 %262  ;;  %4134 = vmatprep.mubr.msk.f32.mxu0 %vm746_vm13, %v5599_v30  ;;  %v272_v18 = vpop.permute.xlu0 %271 }
 0x18e   :  { %v528_v31 = vmul.f32 1.5, %v521_v23  ;;  %v506_v32 = vsel %vm505_vm0, %v5560_v51, %v504_v25  ;;  %v539_v33 = vsub.f32 0.0, %v533_v26  ;;  %vm277_vm8 = vcmp.eq.s32.totalorder %v263_v35, %v5557_v46 }
 0x18f   :  { %v541_v36 = vsub.f32 0.0, %v535_v27  ;;  %v530_v37 = vmul.f32 1.5, %v523_v28  ;;  %v509_v38 = vsel %vm507_vm1, %v508_v0, %v506_v32  ;;  %v513_v39 = vsel %vm512_vm2, %v5565_v53, %v511_v29 }
 0x190   :  { %v534_v40 = vmul.f32 %v528_v31, %v528_v31  ;;  %v524_v42 = vsub.f32 %v509_v38, %v5562_v52  ;;  %v516_v45 = vsel %vm514_vm5, %v515_v11, %v513_v39  ;;  %v545_v47 = vmul.f32 1.442695, %v539_v33 }
 0x191   :  { %v549_v50 = vmul.f32 1.442695, %v541_v36  ;;  %v536_v51 = vmul.f32 %v530_v37, %v530_v37  ;;  %v525_v54 = vsub.f32 %v516_v45, %v5562_v52  ;;  %v5626_v53 = vsel %vm277_vm8, 1.0, %v6294_v15  ;;  %v3773_v36 = vld [vmem:[#allocation8] ss:$0 sm:$0xff] }
 0x192   :  { %v540_v55 = vsub.f32 0.0, %v534_v40  ;;  %v531_v56 = vmul.f32 1.5, %v524_v42  ;;  %4721 = vpow2.f32 %v545_v47  ;;  %v5630_v59 = vsub.f32 %v5605_v34, %v5626_v53  ;;  %v230_v60 = vpop.permute.xlu1 %229 }
 0x193   :  { %v542_v57 = vsub.f32 0.0, %v536_v51  ;;  %v532_v58 = vmul.f32 1.5, %v525_v54  ;;  %v4481_v61 = vpack.c.bf16 %v973_v49, %v972_v48  ;;  %4723 = vpow2.f32 %v549_v50 }
 0x194   :  { %v547_v62 = vmul.f32 1.442695, %v540_v55  ;;  %v537_v63 = vmul.f32 %v531_v56, %v531_v56  ;;  %vm242_vm9 = vcmp.eq.s32.totalorder %v230_v60, %v5557_v46  ;;  %4135 = vmatmul.mubr.msk.f32.vlgmr.msra.gmra.mrb[2].mxu0 %vm746_vm13, %v5630_v59  ;;  %vm566_vm11 = vcmask 72704  }
 0x195   :  { %v551_v52 = vmul.f32 1.442695, %v542_v57  ;;  %v538_v0 = vmul.f32 %v532_v58, %v532_v58  ;;  %4480 = vmatpush3.bf16.msra.mxu0 %v5547_v41  ;;  %v5637_v4 = vsel %vm242_vm9, 1.0, %v6294_v15  ;;  %v4473_v13 = vpack.c.bf16 %v887_v10, %v886_v9 }
 0x196   :  { %4725 = vpow2.f32 %v547_v62  ;;  %v543_v1 = vsub.f32 0.0, %v537_v63  ;;  %4482 = vmatprep.subr.bf16.mxu0 %v4481_v61  ;;  %vm280_vm15 = vcmp.eq.s32.totalorder %v272_v18, %v5557_v46  ;;  %vm888_vm6 = vcmask 261120  }
 0x197   :  { %v544_v2 = vsub.f32 0.0, %v538_v0  ;;  %4727 = vpow2.f32 %v551_v52  ;;  %v266_v5 = vpop.permute.xlu1 %265  ;;  %v5677_v26 = vsel %vm280_vm15, 1.0, %v6294_v15 }
 0x198   :  { %v553_v3 = vmul.f32 1.442695, %v543_v1  ;;  %vm278_vm10 = vcmp.eq.s32.totalorder %v266_v5, %v5557_v46 }
 0x199   :  { %v555_v6 = vmul.f32 1.442695, %v544_v2  ;;  %v5641_v7 = vsel %vm278_vm10, 1.0, %v6294_v15  ;;  %4484 = vmatpush3.bf16.msra.mxu0 %v4481_v61  ;;  %vm1295_vm10 = vcmask 64512  }
 0x19a   :  { %4729 = vpow2.f32 %v553_v3  ;;  %v5645_v41 = vsub.f32 %v5637_v4, %v5641_v7 }
 0x19b   :  { %4731 = vpow2.f32 %v555_v6 }
 0x19c   :  { %v4722_v8 = vpop.eup %4721  ;;  %v233_v11 = vpop.permute.xlu1 %232  ;;  %4137 = vmatprep.mubr.msk.f32.mxu0 %vm746_vm13, %v5645_v41 }
 0x19d   :  { %4121 = vmatprep.mubr.msk.f32.mxu1 %vm566_vm11, %v4722_v8  ;;  %v4724_v12 = vpop.eup %4723  ;;  %vm243_vm12 = vcmp.eq.s32.totalorder %v233_v11, %v5557_v46 }
 0x19e   :  { %v5660_v20 = vsel %vm243_vm12, 1.0, %v6294_v15 }
 0x1a0   :  { %v4726_v14 = vpop.eup %4725 }
 0x1a1   :  { %4122 = vmatmul.mubr.msk.f32.vlgmr.msra.gmra.mrb[0].mxu1 %vm566_vm11, %v4726_v14  ;;  %v4728_v19 = vpop.eup %4727  ;;  %v269_v21 = vpop.permute.xlu1 %268 }
 0x1a2   :  { %4124 = vmatprep.mubr.msk.f32.mxu1 %vm566_vm11, %v4724_v12  ;;  %4472 = vmatpush3.bf16.msra.mxu1 %v5552_v43  ;;  %vm279_vm14 = vcmp.eq.s32.totalorder %v269_v21, %v5557_v46 }
 0x1a3   :  { %4474 = vmatprep.subr.bf16.mxu1 %v4473_v13  ;;  %v5665_v23 = vsel %vm279_vm14, 1.0, %v6294_v15 }
 0x1a4   :  { %v4730_v22 = vpop.eup %4729  ;;  %v5671_v24 = vsub.f32 %v5660_v20, %v5665_v23 }
 0x1a5   :  { %4125 = vmatmul.mubr.msk.f32.gmra.mrb[2].mxu1 %vm566_vm11, %v4728_v19  ;;  %v4732_v25 = vpop.eup %4731 }
 0x1a6   :  { %4127 = vmatprep.mubr.msk.f32.mxu1 %vm566_vm11, %v4730_v22  ;;  %4476 = vmatpush3.bf16.msra.mxu1 %v4473_v13  ;;  %v236_v43 = vpop.permute.xlu1 %235 }
 0x1a7   :  { %4138 = vmatmul.mubr.msk.f32.gmra.mrb[4].mxu0 %vm746_vm13, %v5671_v24  ;;  %vm244_vm0 = vcmp.eq.s32.totalorder %v236_v43, %v5557_v46 }
 0x1a8   :  { %v5682_v27 = vsel %vm244_vm0, 1.0, %v6294_v15 }
 0x1a9   :  { %4128 = vmatmul.mubr.msk.f32.gmra.mrb[4].mxu1 %vm566_vm11, %v4732_v25  ;;  %v5686_v28 = vsub.f32 %v5682_v27, %v5677_v26 }
 0x1aa   :  { %v239_v29 = vpop.permute.xlu1 %238 }
 0x1ab   :  { %4140 = vmatprep.mubr.msk.f32.mxu0 %vm746_vm13, %v5686_v28  ;;  %vm245_vm1 = vcmp.eq.s32.totalorder %v239_v29, %v5557_v46 }
 0x1ac   :  { %v5692_v31 = vsel %vm245_vm1, 1.0, %v6294_v15 }
 0x1af   :  { %v275_v32 = vpop.permute.xlu1 %274 }
 0x1b0   :  { %vm281_vm2 = vcmp.eq.s32.totalorder %v275_v32, %v5557_v46 }
 0x1b1   :  { %v5696_v33 = vsel %vm281_vm2, 1.0, %v6294_v15 }
 0x1b2   :  { %v5700_v35 = vsub.f32 %v5692_v31, %v5696_v33 }
 0x1b4   :  { %4141 = vmatmul.mubr.msk.f32.gmra.mrb[6].mxu0 %vm746_vm13, %v5700_v35 }
 0x1bb   :  { %v4116_v37 = vpop.f32.mrb[0].mxu0 }
 0x1bc   :  { %v421_v38 = vadd.f32 %v4116_v37, %v3773_v36  ;;  %v415_v39 = vpop.f32.mrb[1].mxu0 }
 0x1bd   :  { %v416_v40 = vadd.f32 %v3773_v36, %v415_v39  ;;  %v3777_v39 = vld [vmem:[#allocation10] ss:$0 sm:$0xff] }
 0x1be   :  { %v425_v42 = vand.u32 2147483647, %v421_v38  ;;  %vm437_vm3 = vcmp.ge.f32.partialorder %v421_v38, 0.0 }
 0x1bf   :  { %v424_v45 = vand.u32 2147483647, %v416_v40  ;;  %vm436_vm5 = vcmp.ge.f32.partialorder %v416_v40, 0.0 }
 0x1c0   :  { %v427_v47 = vsub.f32 0.0, %v425_v42 }
 0x1c1   :  { %v426_v48 = vsub.f32 0.0, %v424_v45 }
 0x1c2   :  { %v430_v46 = vmul.f32 1.442695, %v427_v47 }
 0x1c3   :  { %v428_v49 = vmul.f32 1.442695, %v426_v48 }
 0x1c4   :  { %4733 = vpow2.f32 %v430_v46 }
 0x1c5   :  { %4735 = vpow2.f32 %v428_v49 }
 0x1ce   :  { %v4734_v50 = vpop.eup %4733 }
 0x1cf   :  { %v4736_v51 = vpop.eup %4735  ;;  %v433_v54 = vadd.f32 1.0, %v4734_v50 }
 0x1d0   :  { %v432_v55 = vadd.f32 1.0, %v4736_v51 }
 0x1d1   :  { %4737 = vrcp.f32 %v433_v54 }
 0x1d2   :  { %4739 = vrcp.f32 %v432_v55 }
 0x1db   :  { %v4738_v56 = vpop.eup %4737 }
 0x1dc   :  { %v4740_v57 = vpop.eup %4739  ;;  %v439_v58 = vmul.f32 %v4738_v56, %v4734_v50 }
 0x1dd   :  { %v438_v60 = vmul.f32 %v4740_v57, %v4736_v51 }
 0x1de   :  { %v441_v61 = vsel %vm437_vm3, %v4738_v56, %v439_v58 }
 0x1df   :  { %v440_v62 = vsel %vm436_vm5, %v4740_v57, %v438_v60  ;;  %v5706_v52 = vmul.f32 %v441_v61, %v421_v38 }
 0x1e0   :  { %v5704_v63 = vmul.f32 %v440_v62, %v416_v40 }
 0x1e2   :  { %4151 = vmatprep.mubr.msk.f32.mxu1 %vm888_vm6, %v5704_v63  ;;  %4162 = vmatprep.mubr.msk.f32.mxu0 %vm888_vm6, %v5704_v63 }
 0x1e3   :  { %4152 = vmatmul.mubr.msk.f32.vlgmr.msra.gmra.mrb[6].mxu1 %vm888_vm6, %v5706_v52  ;;  %4163 = vmatmul.mubr.msk.f32.vlgmr.msra.gmra.mrb[8].mxu0 %vm888_vm6, %v5706_v52 }
 0x1e4   :  { %4169 = vmatprep.mubr.msk.f32.mxu1 %vm746_vm13, %v5584_v16 }
 0x267   :  { %v5718_v0 = vpop.f32.mrb[2].mxu0 }
 0x268   :  { %v861_v1 = vmul.f32 %v5718_v0, %v5718_v0  ;;  %v5722_v2 = vpop.f32.mrb[3].mxu0 }
 0x269   :  { %v860_v3 = vmul.f32 %v5722_v2, %v5722_v2 }
 0x26a   :  { %v869_v5 = vsel %vm456_vm4, %v861_v1, 0.0 }
 0x26b   :  { %870 = vadd.xlane.f32.xlu1 %v869_v5  ;;  %v866_v6 = vsel %vm456_vm4, %v860_v3, 0.0 }
 0x26c   :  { %867 = vadd.xlane.f32.xlu0 %v866_v6 }
 0x274   :  { %v4123_v8 = vpop.f32.mrb[0].mxu1 }
 0x275   :  { %v655_v9 = vpop.f32.mrb[1].mxu1  ;;  %v5750_v42 = vadd.f32 %v4123_v8, %v3777_v39 }
 0x276   :  { %v5748_v40 = vadd.f32 %v3777_v39, %v655_v9 }
 0x277   :  { %v685_v48 = vand.u32 2147483647, %v5750_v42  ;;  %vm721_vm8 = vcmp.ge.f32.partialorder %v5750_v42, 0.0 }
 0x278   :  { %v4126_v10 = vpop.f32.mrb[2].mxu1  ;;  %v684_v45 = vand.u32 2147483647, %v5748_v40  ;;  %vm720_vm7 = vcmp.ge.f32.partialorder %v5748_v40, 0.0 }
 0x279   :  { %v665_v11 = vpop.f32.mrb[3].mxu1  ;;  %v5756_v46 = vadd.f32 %v4126_v10, %v3777_v39  ;;  %v691_v54 = vsub.f32 0.0, %v685_v48  ;;  %v1294_v48 = vld [vmem:[#allocation13] sm:$0xff] }
 0x27a   :  { %v5728_v12 = vpop.f32.mrb[4].mxu0  ;;  %v5753_v47 = vadd.f32 %v3777_v39, %v665_v11  ;;  %v690_v49 = vsub.f32 0.0, %v684_v45 }
 0x27b   :  { %v5730_v13 = vpop.f32.mrb[5].mxu0  ;;  %v863_v18 = vmul.f32 %v5728_v12, %v5728_v12  ;;  %v687_v55 = vand.u32 2147483647, %v5756_v46  ;;  %v698_v61 = vmul.f32 1.442695, %v691_v54  ;;  %vm723_vm11 = vcmp.ge.f32.partialorder %v5756_v46, 0.0 }
 0x27c   :  { %v4129_v14 = vpop.f32.mrb[4].mxu1  ;;  %v862_v19 = vmul.f32 %v5730_v13, %v5730_v13  ;;  %v686_v50 = vand.u32 2147483647, %v5753_v47  ;;  %v696_v57 = vmul.f32 1.442695, %v690_v49  ;;  %vm722_vm9 = vcmp.ge.f32.partialorder %v5753_v47, 0.0 }
 0x27d   :  { %v675_v21 = vpop.f32.mrb[5].mxu1  ;;  %v875_v25 = vsel %vm456_vm4, %v863_v18, 0.0  ;;  %v5762_v56 = vadd.f32 %v4129_v14, %v3777_v39  ;;  %v693_v62 = vsub.f32 0.0, %v687_v55 }
 0x27e   :  { %v872_v22 = vsel %vm456_vm4, %v862_v19, 0.0  ;;  %v5759_v51 = vadd.f32 %v3777_v39, %v675_v21  ;;  %v692_v58 = vsub.f32 0.0, %v686_v50  ;;  %4741 = vpow2.f32 %v696_v57 }
 0x27f   :  { %873 = vadd.xlane.f32.xlu0 %v872_v22  ;;  %v689_v1 = vand.u32 2147483647, %v5762_v56  ;;  %4743 = vpow2.f32 %v698_v61  ;;  %v702_v6 = vmul.f32 1.442695, %v693_v62  ;;  %vm725_vm14 = vcmp.ge.f32.partialorder %v5762_v56, 0.0 }
 0x280   :  { %v688_v60 = vand.u32 2147483647, %v5759_v51  ;;  %v700_v3 = vmul.f32 1.442695, %v692_v58  ;;  %vm724_vm12 = vcmp.ge.f32.partialorder %v5759_v51, 0.0 }
 0x281   :  { %v695_v8 = vsub.f32 0.0, %v689_v1 }
 0x282   :  { %v694_v5 = vsub.f32 0.0, %v688_v60  ;;  %4745 = vpow2.f32 %v700_v3 }
 0x283   :  { %876 = vadd.xlane.f32.xlu0 %v875_v25  ;;  %4747 = vpow2.f32 %v702_v6  ;;  %v706_v10 = vmul.f32 1.442695, %v695_v8 }
 0x284   :  { %v704_v9 = vmul.f32 1.442695, %v694_v5 }
 0x286   :  { %4749 = vpow2.f32 %v704_v9 }
 0x287   :  { %v5738_v43 = vpop.f32.mrb[6].mxu0  ;;  %4751 = vpow2.f32 %v706_v10 }
 0x288   :  { %v865_v29 = vmul.f32 %v5738_v43, %v5738_v43  ;;  %v5742_v32 = vpop.f32.mrb[7].mxu0  ;;  %v4742_v11 = vpop.eup %4741 }
 0x289   :  { %v864_v36 = vmul.f32 %v5742_v32, %v5742_v32 }
 0x28a   :  { %v881_v37 = vsel %vm456_vm4, %v865_v29, 0.0  ;;  %v4744_v29 = vpop.eup %4743 }
 0x28b   :  { %882 = vadd.xlane.f32.xlu0 %v881_v37  ;;  %v878_v38 = vsel %vm456_vm4, %v864_v36, 0.0  ;;  %v708_v36 = vadd.f32 1.0, %v4742_v11 }
 0x28c   :  { %879 = vadd.xlane.f32.xlu1 %v878_v38  ;;  %v4746_v37 = vpop.eup %4745  ;;  %v709_v38 = vadd.f32 1.0, %v4744_v29 }
 0x28d   :  { %v4748_v39 = vpop.eup %4747  ;;  %4753 = vrcp.f32 %v708_v36  ;;  %v710_v45 = vadd.f32 1.0, %v4746_v37 }
 0x28e   :  { %4755 = vrcp.f32 %v709_v38  ;;  %v711_v50 = vadd.f32 1.0, %v4748_v39 }
 0x28f   :  { %4757 = vrcp.f32 %v710_v45 }
 0x290   :  { %v4750_v49 = vpop.eup %4749  ;;  %4759 = vrcp.f32 %v711_v50  ;;  %v3807_v50 = vld [vmem:[#allocation11] ss:$0 sm:$0xff] }
 0x291   :  { %v4752_v54 = vpop.eup %4751  ;;  %v712_v55 = vadd.f32 1.0, %v4750_v49 }
 0x292   :  { %v713_v57 = vadd.f32 1.0, %v4752_v54 }
 0x293   :  { %4761 = vrcp.f32 %v712_v55 }
 0x294   :  { %4763 = vrcp.f32 %v713_v57 }
 0x297   :  { %v4754_v58 = vpop.eup %4753 }
 0x298   :  { %v4756_v60 = vpop.eup %4755  ;;  %v726_v61 = vmul.f32 %v4754_v58, %v4742_v11 }
 0x299   :  { %v4758_v62 = vpop.eup %4757  ;;  %v727_v1 = vmul.f32 %v4756_v60, %v4744_v29 }
 0x29a   :  { %v4760_v3 = vpop.eup %4759  ;;  %v732_v5 = vsel %vm720_vm7, %v4754_v58, %v726_v61  ;;  %v728_v6 = vmul.f32 %v4758_v62, %v4746_v37  ;;  %v3814_v61 = vld [vmem:[%s6268_s13] ss:$0 sm:$0xff] }
 0x29b   :  { %v733_v9 = vsel %vm721_vm8, %v4756_v60, %v727_v1  ;;  %v5790_v10 = vmul.f32 %v732_v5, %v5748_v40  ;;  %v729_v11 = vmul.f32 %v4760_v3, %v4748_v39  ;;  %v1490_v39 = vld [vmem:[%s6269_s14 + $0x10] sm:$0xff] }
 0x29d   :  { %v4762_v8 = vpop.eup %4761 }
 0x2b6   :  { %v4153_v14 = vpop.f32.mrb[6].mxu1  ;;  %v4164_v18 = vpop.f32.mrb[8].mxu0 }
 0x2b7   :  { %v961_v19 = vpop.f32.mrb[7].mxu1  ;;  %v1040_v21 = vpop.f32.mrb[9].mxu0 }
 0x2b8   :  { %v4489_v22 = vpack.c.bf16 %v4153_v14, %v961_v19  ;;  %v4485_v25 = vpack.c.bf16 %v4164_v18, %v1040_v21  ;;  %v4764_v14 = vpop.eup %4763  ;;  %v734_v18 = vsel %vm722_vm9, %v4758_v62, %v728_v6  ;;  %v730_v19 = vmul.f32 %v4762_v8, %v4750_v49 }
 0x2b9   :  { %v5799_v21 = vmul.f32 %v733_v9, %v5750_v42  ;;  %v5802_v40 = vmul.f32 %v734_v18, %v5753_v47 }
 0x2ba   :  { %4486 = vmatprep.subr.bf16.mxu1 %v4485_v25  ;;  %v736_v29 = vsel %vm724_vm12, %v4762_v8, %v730_v19 }
 0x2bb   :  { %4488 = vmatpush3.bf16.msra.mxu1 %v4485_v25  ;;  %v731_v25 = vmul.f32 %v4764_v14, %v4752_v54  ;;  %v5813_v42 = vmul.f32 %v736_v29, %v5759_v51  ;;  %v1489_v51 = vld [vmem:[%s6269_s14 + $0x8] sm:$0xff] }
 0x2bc   :  { %4490 = vmatprep.subr.bf16.mxu1 %v4489_v22 }
 0x2bd   :  { %v737_v37 = vsel %vm725_vm14, %v4764_v14, %v731_v25 }
 0x2be   :  { %4170 = vmatmul.mubr.msk.f32.vlgmr.msra.gmra.mrb[8].mxu1 %vm746_vm13, %v5626_v53  ;;  %v5820_v47 = vmul.f32 %v737_v37, %v5762_v56  ;;  %v1491_v56 = vld [vmem:[%s6269_s14 + $0x18] sm:$0xff] }
 0x2bf   :  { %4172 = vmatprep.mubr.msk.f32.mxu1 %vm746_vm13, %v5641_v7  ;;  %4492 = vmatpush3.bf16.msra.mxu1 %v4489_v22  ;;  %v735_v22 = vsel %vm723_vm11, %v4760_v3, %v729_v11  ;;  %v4497_v45 = vpack.c.bf16 %v1491_v56, %v1490_v39 }
 0x2c0   :  { %4191 = vmatprep.subr.mxu1 %v1294_v48  ;;  %v5810_v36 = vmul.f32 %v735_v22, %v5756_v46  ;;  %v1488_v46 = vld [vmem:[%s6269_s14] sm:$0xff] }
 0x2c1   :  { %v4493_v38 = vpack.c.bf16 %v1489_v51, %v1488_v46 }
 0x2c2   :  { %4173 = vmatmul.mubr.msk.f32.gmra.mrb[10].mxu1 %vm746_vm13, %v5665_v23 }
 0x2c3   :  { %4175 = vmatprep.mubr.msk.f32.mxu1 %vm746_vm13, %v5677_v26  ;;  %4494 = vmatprep.subr.bf16.mxu0 %v4493_v38 }
 0x2c4   :  { %4496 = vmatpush3.bf16.msra.mxu0 %v4493_v38 }
 0x2c5   :  { %4498 = vmatprep.subr.bf16.mxu0 %v4497_v45 }
 0x2c6   :  { %4176 = vmatmul.mubr.msk.f32.gmra.mrb[12].mxu1 %vm746_vm13, %v5696_v33 }
 0x2c7   :  { %4182 = vmatprep.mubr.msk.f32.mxu1 %vm746_vm13, %v5587_v17 }
 0x2c8   :  { %4500 = vmatpush3.bf16.msra.mxu0 %v4497_v45 }
 0x2ca   :  { %4183 = vmatmul.mubr.msk.f32.vlgmr.msra.gmra.mrb[8].mxu1 %vm746_vm13, %v5605_v34 }
 0x2cb   :  { %4185 = vmatprep.mubr.msk.f32.mxu1 %vm746_vm13, %v5637_v4  ;;  %4192 = vmatpush3.msra.mxu1 %v1294_v48 }
 0x2ce   :  { %4186 = vmatmul.mubr.msk.f32.gmra.mrb[10].mxu1 %vm746_vm13, %v5660_v20 }
 0x2cf   :  { %4188 = vmatprep.mubr.msk.f32.mxu1 %vm746_vm13, %v5682_v27 }
 0x2d2   :  { %4189 = vmatmul.mubr.msk.f32.gmra.mrb[12].mxu1 %vm746_vm13, %v5692_v31 }
 0x2d3   :  { %4193 = vmatprep.mubr.msk.f32.mxu1 %vm1295_vm10, %v5790_v10 }
 0x2d6   :  { %4194 = vmatmul.mubr.msk.f32.vlgmr.msra.gmra.mrb[8].mxu1 %vm1295_vm10, %v5799_v21 }
 0x2d7   :  { %4196 = vmatprep.mubr.msk.f32.mxu1 %vm1295_vm10, %v5802_v40 }
 0x2da   :  { %4197 = vmatmul.mubr.msk.f32.gmra.mrb[10].mxu1 %vm1295_vm10, %v5810_v36 }
 0x2db   :  { %4199 = vmatprep.mubr.msk.f32.mxu1 %vm1295_vm10, %v5813_v42 }
 0x2de   :  { %4200 = vmatmul.mubr.msk.f32.gmra.mrb[12].mxu1 %vm1295_vm10, %v5820_v47 }
 0x2f8   :  { %v871_v54 = vpop.xlane.xlu1 %870 }
 0x2f9   :  { %v868_v48 = vpop.xlane.xlu0 %867  ;;  %v1283_v55 = vmul.f32 %v3807_v50, %v871_v54 }
 0x2fa   :  { %v1282_v57 = vmul.f32 %v3807_v50, %v868_v48 }
 0x30c   :  { %v874_v49 = vpop.xlane.xlu0 %873 }
 0x30d   :  { %v1284_v8 = vmul.f32 %v3807_v50, %v874_v49 }
 0x310   :  { %v877_v58 = vpop.xlane.xlu0 %876 }
 0x311   :  { %v1285_v5 = vmul.f32 %v3807_v50, %v877_v58 }
 0x318   :  { %v883_v9 = vpop.xlane.xlu0 %882 }
 0x319   :  { %v880_v18 = vpop.xlane.xlu1 %879  ;;  %v1287_v46 = vmul.f32 %v3807_v50, %v883_v9 }
 0x31a   :  { %v1286_v39 = vmul.f32 %v3807_v50, %v880_v18 }
 0x3a9   :  { %v4195_v60 = vpop.f32.mrb[8].mxu1 }
 0x3aa   :  { %v4637_v62 = vadd.f32 %v4195_v60, %v1283_v55  ;;  %v1380_v1 = vpop.f32.mrb[9].mxu1 }
 0x3ab   :  { %v4638_v3 = vadd.f32 %v1380_v1, %v1282_v57 }
 0x3ac   :  { %v5839_v6 = vadd.f32 %v4637_v62, %v3814_v61 }
 0x3ad   :  { %v5841_v11 = vadd.f32 %v4638_v3, %v3814_v61  ;;  %v4198_v14 = vpop.f32.mrb[10].mxu1 }
 0x3ae   :  { %v1429_v19 = vand.u32 2147483647, %v5839_v6  ;;  %v4639_v22 = vadd.f32 %v4198_v14, %v1285_v5  ;;  %v1390_v25 = vpop.f32.mrb[11].mxu1  ;;  %vm1465_vm15 = vcmp.ge.f32.partialorder %v5839_v6, 0.0 }
 0x3af   :  { %v1428_v29 = vand.u32 2147483647, %v5841_v11  ;;  %v4640_v37 = vadd.f32 %v1390_v25, %v1284_v8  ;;  %vm1464_vm0 = vcmp.ge.f32.partialorder %v5841_v11, 0.0 }
 0x3b0   :  { %v1435_v51 = vsub.f32 0.0, %v1429_v19  ;;  %v5845_v38 = vadd.f32 %v4639_v22, %v3814_v61 }
 0x3b1   :  { %v1434_v56 = vsub.f32 0.0, %v1428_v29  ;;  %v5847_v45 = vadd.f32 %v4640_v37, %v3814_v61  ;;  %v4201_v48 = vpop.f32.mrb[12].mxu1 }
 0x3b2   :  { %v1442_v49 = vmul.f32 1.442695, %v1435_v51  ;;  %v1431_v54 = vand.u32 2147483647, %v5845_v38  ;;  %v4641_v55 = vadd.f32 %v4201_v48, %v1287_v46  ;;  %v1400_v57 = vpop.f32.mrb[13].mxu1  ;;  %vm1467_vm1 = vcmp.ge.f32.partialorder %v5845_v38, 0.0 }
 0x3b3   :  { %v1440_v58 = vmul.f32 1.442695, %v1434_v56  ;;  %v1430_v60 = vand.u32 2147483647, %v5847_v45  ;;  %v4642_v62 = vadd.f32 %v1400_v57, %v1286_v39  ;;  %vm1466_vm2 = vcmp.ge.f32.partialorder %v5847_v45, 0.0 }
 0x3b4   :  { %4765 = vpow2.f32 %v1442_v49  ;;  %v1437_v1 = vsub.f32 0.0, %v1431_v54  ;;  %v5851_v3 = vadd.f32 %v4641_v55, %v3814_v61 }
 0x3b5   :  { %4767 = vpow2.f32 %v1440_v58  ;;  %v1436_v5 = vsub.f32 0.0, %v1430_v60  ;;  %v5853_v50 = vadd.f32 %v4642_v62, %v3814_v61 }
 0x3b6   :  { %v1446_v8 = vmul.f32 1.442695, %v1437_v1  ;;  %v1433_v9 = vand.u32 2147483647, %v5851_v3  ;;  %vm1469_vm3 = vcmp.ge.f32.partialorder %v5851_v3, 0.0 }
 0x3b7   :  { %v1444_v14 = vmul.f32 1.442695, %v1436_v5  ;;  %v1432_v18 = vand.u32 2147483647, %v5853_v50  ;;  %vm1468_vm5 = vcmp.ge.f32.partialorder %v5853_v50, 0.0 }
 0x3b8   :  { %4769 = vpow2.f32 %v1446_v8  ;;  %v1439_v19 = vsub.f32 0.0, %v1433_v9 }
 0x3b9   :  { %4771 = vpow2.f32 %v1444_v14  ;;  %v1438_v22 = vsub.f32 0.0, %v1432_v18 }
 0x3ba   :  { %v1450_v25 = vmul.f32 1.442695, %v1439_v19 }
 0x3bb   :  { %v1448_v29 = vmul.f32 1.442695, %v1438_v22 }
 0x3bc   :  { %4773 = vpow2.f32 %v1450_v25 }
 0x3bd   :  { %4775 = vpow2.f32 %v1448_v29 }
 0x3be   :  { %v4766_v37 = vpop.eup %4765 }
 0x3bf   :  { %v4768_v46 = vpop.eup %4767  ;;  %v1453_v51 = vadd.f32 1.0, %v4766_v37 }
 0x3c0   :  { %v1452_v39 = vadd.f32 1.0, %v4768_v46 }
 0x3c1   :  { %4777 = vrcp.f32 %v1453_v51 }
 0x3c2   :  { %v4770_v61 = vpop.eup %4769  ;;  %4779 = vrcp.f32 %v1452_v39 }
 0x3c3   :  { %v4772_v56 = vpop.eup %4771  ;;  %v1455_v48 = vadd.f32 1.0, %v4770_v61 }
 0x3c4   :  { %v1454_v49 = vadd.f32 1.0, %v4772_v56 }
 0x3c5   :  { %4781 = vrcp.f32 %v1455_v48 }
 0x3c6   :  { %v4774_v54 = vpop.eup %4773  ;;  %4783 = vrcp.f32 %v1454_v49 }
 0x3c7   :  { %v4776_v55 = vpop.eup %4775  ;;  %v1457_v57 = vadd.f32 1.0, %v4774_v54 }
 0x3c8   :  { %v1456_v58 = vadd.f32 1.0, %v4776_v55 }
 0x3c9   :  { %4785 = vrcp.f32 %v1457_v57 }
 0x3ca   :  { %4787 = vrcp.f32 %v1456_v58 }
 0x3cb   :  { %v4778_v60 = vpop.eup %4777 }
 0x3cc   :  { %v4780_v62 = vpop.eup %4779  ;;  %v1471_v1 = vmul.f32 %v4778_v60, %v4766_v37 }
 0x3cd   :  { %v1470_v5 = vmul.f32 %v4780_v62, %v4768_v46 }
 0x3ce   :  { %v1477_v8 = vsel %vm1465_vm15, %v4778_v60, %v1471_v1  ;;  %v1856_v60 = vld [vmem:[%s6273_s18] sm:$0xff] }
 0x3cf   :  { %v4782_v9 = vpop.eup %4781  ;;  %v1476_v14 = vsel %vm1464_vm0, %v4780_v62, %v1470_v5  ;;  %v1483_v25 = vmul.f32 %v1477_v8, %v5839_v6  ;;  %v1857_v62 = vld [vmem:[%s6273_s18 + $0x8] sm:$0xff]  ;;  %v3815_v5 = vld [vmem:[%s6270_s15] ss:$0 sm:$0xff] }
 0x3d0   :  { %v4784_v18 = vpop.eup %4783  ;;  %v1482_v19 = vmul.f32 %v1476_v14, %v5841_v11  ;;  %v1473_v22 = vmul.f32 %v4782_v9, %v4770_v61  ;;  %v5893_v1 = vpack.c.bf16 %v1857_v62, %v1856_v60 }
 0x3d1   :  { %v1472_v29 = vmul.f32 %v4784_v18, %v4772_v56 }
 0x3d2   :  { %v1479_v51 = vsel %vm1467_vm1, %v4782_v9, %v1473_v22  ;;  %4210 = vmatprep.mubr.msk.f32.mxu0 %vm888_vm6, %v1482_v19  ;;  %vm314_vm1 = vcmask 392192  }
 0x3d3   :  { %v4786_v37 = vpop.eup %4785  ;;  %v1478_v46 = vsel %vm1466_vm2, %v4784_v18, %v1472_v29  ;;  %4211 = vmatmul.mubr.msk.f32.vlgmr.msra.gmra.mrb[10].mxu0 %vm888_vm6, %v1483_v25  ;;  %v1485_v11 = vmul.f32 %v1479_v51, %v5845_v38  ;;  %v1672_v38 = vld [vmem:[%s6271_s16] sm:$0xff] }
 0x3d4   :  { %v4788_v39 = vpop.eup %4787  ;;  %v1484_v48 = vmul.f32 %v1478_v46, %v5847_v45  ;;  %v1475_v49 = vmul.f32 %v4786_v37, %v4774_v54  ;;  %v1673_v45 = vld [vmem:[%s6271_s16 + $0x8] sm:$0xff] }
 0x3d5   :  { %v1474_v6 = vmul.f32 %v4788_v39, %v4776_v55  ;;  %v4501_v54 = vpack.c.bf16 %v1673_v45, %v1672_v38 }
 0x3d6   :  { %v1481_v61 = vsel %vm1469_vm3, %v4786_v37, %v1475_v49  ;;  %4213 = vmatprep.mubr.msk.f32.mxu0 %vm888_vm6, %v1484_v48 }
 0x3d7   :  { %v1480_v56 = vsel %vm1468_vm5, %v4788_v39, %v1474_v6  ;;  %4214 = vmatmul.mubr.msk.f32.gmra.mrb[12].mxu0 %vm888_vm6, %v1485_v11  ;;  %v1487_v58 = vmul.f32 %v1481_v61, %v5851_v3  ;;  %4502 = vmatprep.subr.bf16.mxu0 %v4501_v54  ;;  %v1675_v3 = vld [vmem:[%s6271_s16 + $0x18] sm:$0xff] }
 0x3d8   :  { %v1486_v57 = vmul.f32 %v1480_v56, %v5853_v50  ;;  %4504 = vmatpush3.bf16.msra.mxu0 %v4501_v54  ;;  %v1674_v50 = vld [vmem:[%s6271_s16 + $0x10] sm:$0xff] }
 0x3d9   :  { %v4505_v55 = vpack.c.bf16 %v1675_v3, %v1674_v50 }
 0x3da   :  { %4216 = vmatprep.mubr.msk.f32.mxu0 %vm888_vm6, %v1486_v57 }
 0x3db   :  { %4217 = vmatmul.mubr.msk.f32.gmra.mrb[14].mxu0 %vm888_vm6, %v1487_v58  ;;  %4506 = vmatprep.subr.bf16.mxu0 %v4505_v55 }
 0x3dc   :  { %4508 = vmatpush3.bf16.msra.mxu0 %v4505_v55 }
 0x3dd   :  { %4510 = vmatprep.subr.bf16.mxu0 %v5893_v1 }
 0x4a6   :  { %v4212_v8 = vpop.f32.mrb[10].mxu0 }
 0x4a7   :  { %v5899_v9 = vadd.f32 %v4212_v8, %v3815_v5  ;;  %v1583_v14 = vpop.f32.mrb[11].mxu0 }
 0x4a8   :  { %v5901_v18 = vadd.f32 %v3815_v5, %v1583_v14 }
 0x4a9   :  { %v1613_v19 = vand.u32 2147483647, %v5899_v9  ;;  %vm1649_vm7 = vcmp.ge.f32.partialorder %v5899_v9, 0.0 }
 0x4aa   :  { %v1612_v22 = vand.u32 2147483647, %v5901_v18  ;;  %v4215_v25 = vpop.f32.mrb[12].mxu0  ;;  %vm1648_vm8 = vcmp.ge.f32.partialorder %v5901_v18, 0.0 }
 0x4ab   :  { %v1619_v29 = vsub.f32 0.0, %v1613_v19  ;;  %v5905_v51 = vadd.f32 %v4215_v25, %v3815_v5  ;;  %v1593_v37 = vpop.f32.mrb[13].mxu0 }
 0x4ac   :  { %v1618_v46 = vsub.f32 0.0, %v1612_v22  ;;  %v5907_v39 = vadd.f32 %v3815_v5, %v1593_v37 }
 0x4ad   :  { %v1626_v48 = vmul.f32 1.442695, %v1619_v29  ;;  %v1615_v49 = vand.u32 2147483647, %v5905_v51  ;;  %vm1651_vm9 = vcmp.ge.f32.partialorder %v5905_v51, 0.0 }
 0x4ae   :  { %v1624_v11 = vmul.f32 1.442695, %v1618_v46  ;;  %v1614_v6 = vand.u32 2147483647, %v5907_v39  ;;  %v4218_v61 = vpop.f32.mrb[14].mxu0  ;;  %vm1650_vm11 = vcmp.ge.f32.partialorder %v5907_v39, 0.0 }
 0x4af   :  { %4789 = vpow2.f32 %v1626_v48  ;;  %v1621_v56 = vsub.f32 0.0, %v1615_v49  ;;  %v5911_v57 = vadd.f32 %v4218_v61, %v3815_v5  ;;  %v1603_v58 = vpop.f32.mrb[15].mxu0 }
 0x4b0   :  { %4791 = vpow2.f32 %v1624_v11  ;;  %v1620_v38 = vsub.f32 0.0, %v1614_v6  ;;  %v5913_v45 = vadd.f32 %v3815_v5, %v1603_v58 }
 0x4b1   :  { %v1630_v54 = vmul.f32 1.442695, %v1621_v56  ;;  %v1617_v50 = vand.u32 2147483647, %v5911_v57  ;;  %vm1653_vm12 = vcmp.ge.f32.partialorder %v5911_v57, 0.0 }
 0x4b2   :  { %v1628_v3 = vmul.f32 1.442695, %v1620_v38  ;;  %v1616_v55 = vand.u32 2147483647, %v5913_v45  ;;  %vm1652_vm14 = vcmp.ge.f32.partialorder %v5913_v45, 0.0 }
 0x4b3   :  { %4793 = vpow2.f32 %v1630_v54  ;;  %v1623_v60 = vsub.f32 0.0, %v1617_v50 }
 0x4b4   :  { %4795 = vpow2.f32 %v1628_v3  ;;  %v1622_v62 = vsub.f32 0.0, %v1616_v55  ;;  %v1858_v3 = vld [vmem:[%s6273_s18 + $0x10] sm:$0xff]  ;;  %v1859_v55 = vld [vmem:[%s6273_s18 + $0x18] sm:$0xff] }
 0x4b5   :  { %v1634_v8 = vmul.f32 1.442695, %v1623_v60 }
 0x4b6   :  { %v1632_v14 = vmul.f32 1.442695, %v1622_v62 }
 0x4b7   :  { %4797 = vpow2.f32 %v1634_v8 }
 0x4b8   :  { %4799 = vpow2.f32 %v1632_v14 }
 0x4b9   :  { %v4790_v19 = vpop.eup %4789 }
 0x4ba   :  { %v4792_v22 = vpop.eup %4791  ;;  %v1637_v25 = vadd.f32 1.0, %v4790_v19 }
 0x4bb   :  { %v1636_v29 = vadd.f32 1.0, %v4792_v22 }
 0x4bc   :  { %4801 = vrcp.f32 %v1637_v25 }
 0x4bd   :  { %v4794_v5 = vpop.eup %4793  ;;  %4803 = vrcp.f32 %v1636_v29  ;;  %v4513_v29 = vpack.c.bf16 %v1859_v55, %v1858_v3 }
 0x4be   :  { %v4796_v37 = vpop.eup %4795  ;;  %v1639_v46 = vadd.f32 1.0, %v4794_v5 }
 0x4bf   :  { %v1638_v48 = vadd.f32 1.0, %v4796_v37 }
 0x4c0   :  { %4805 = vrcp.f32 %v1639_v46 }
 0x4c1   :  { %v4798_v49 = vpop.eup %4797  ;;  %4807 = vrcp.f32 %v1638_v48 }
 0x4c2   :  { %v4800_v11 = vpop.eup %4799  ;;  %v1641_v6 = vadd.f32 1.0, %v4798_v49 }
 0x4c3   :  { %v1640_v61 = vadd.f32 1.0, %v4800_v11 }
 0x4c4   :  { %4809 = vrcp.f32 %v1641_v6 }
 0x4c5   :  { %4811 = vrcp.f32 %v1640_v61 }
 0x4c6   :  { %v4802_v56 = vpop.eup %4801 }
 0x4c7   :  { %v4804_v58 = vpop.eup %4803  ;;  %v1655_v38 = vmul.f32 %v4802_v56, %v4790_v19 }
 0x4c8   :  { %v1654_v54 = vmul.f32 %v4804_v58, %v4792_v22 }
 0x4c9   :  { %v1661_v50 = vsel %vm1649_vm7, %v4802_v56, %v1655_v38 }
 0x4ca   :  { %v4806_v60 = vpop.eup %4805  ;;  %v1667_v62 = vmul.f32 %v1661_v50, %v5899_v9  ;;  %v1660_v8 = vsel %vm1648_vm8, %v4804_v58, %v1654_v54 }
 0x4cb   :  { %v4808_v14 = vpop.eup %4807  ;;  %v1666_v19 = vmul.f32 %v1660_v8, %v5901_v18  ;;  %v1657_v25 = vmul.f32 %v4806_v60, %v4794_v5 }
 0x4cc   :  { %v1656_v22 = vmul.f32 %v4808_v14, %v4796_v37 }
 0x4cd   :  { %v1663_v46 = vsel %vm1651_vm9, %v4806_v60, %v1657_v25  ;;  %4227 = vmatprep.mubr.msk.f32.mxu0 %vm888_vm6, %v1666_v19  ;;  %v5930_v48 = vpack.c.bf16 %v1667_v62, %v1666_v19 }
 0x4ce   :  { %v4810_v6 = vpop.eup %4809  ;;  %v1669_v61 = vmul.f32 %v1663_v46, %v5905_v51  ;;  %v1662_v9 = vsel %vm1650_vm11, %v4808_v14, %v1656_v22  ;;  %4228 = vmatmul.mubr.msk.f32.vlgmr.msra.gmra.mrb[16].mxu0 %vm888_vm6, %v1667_v62 }
 0x4cf   :  { %v4812_v56 = vpop.eup %4811  ;;  %v1668_v18 = vmul.f32 %v1662_v9, %v5907_v39  ;;  %v1659_v5 = vmul.f32 %v4810_v6, %v4798_v49  ;;  %4512 = vmatpush3.bf16.msra.mxu0 %v5893_v1  ;;  %v302_v49 = vshrl.u32 %v220_v44, 7  ;;  %v3822_v44 = vld [vmem:[%s6272_s17] ss:$0 sm:$0xff] }
 0x4d0   :  { %v1658_v37 = vmul.f32 %v4812_v56, %v4800_v11  ;;  %4514 = vmatprep.subr.bf16.mxu0 %v4513_v29  ;;  %v300_v11 = vld [vmem:[#allocation5] sm:$0x3] }
 0x4d1   :  { %v1665_v58 = vsel %vm1653_vm12, %v4810_v6, %v1659_v5  ;;  %4230 = vmatprep.mubr.msk.f32.mxu0 %vm888_vm6, %v1668_v18  ;;  %v5939_v38 = vpack.c.bf16 %v1669_v61, %v1668_v18  ;;  %v5950_v50 = vadd.s32 8, %v302_v49 }
 0x4d2   :  { %v1671_v51 = vmul.f32 %v1665_v58, %v5911_v57  ;;  %v1664_v54 = vsel %vm1652_vm14, %v4812_v56, %v1658_v37  ;;  %4231 = vmatmul.mubr.msk.f32.gmra.mrb[18].mxu0 %vm888_vm6, %v1669_v61  ;;  %v306_v57 = vsub.s32 0, %v302_v49 }
 0x4d3   :  { %v1670_v39 = vmul.f32 %v1664_v54, %v5913_v45  ;;  %4516 = vmatpush3.bf16.msra.mxu0 %v4513_v29 }
 0x4d4   :  { %4530 = vmatprep.subr.bf16.mxu0 %v5930_v48  ;;  %v5952_v3 = vrot.slane %v300_v11, %v306_v57 }
 0x4d5   :  { %4233 = vmatprep.mubr.msk.f32.mxu0 %vm888_vm6, %v1670_v39  ;;  %v5946_v1 = vpack.c.bf16 %v1671_v51, %v1670_v39 }
 0x4d6   :  { %4234 = vmatmul.mubr.msk.f32.gmra.mrb[20].mxu0 %vm888_vm6, %v1671_v51  ;;  %vm308_vm15 = vcmp.eq.s32.totalorder %v302_v49, %v5952_v3  ;;  %vm309_vm0 = vcmp.eq.s32.totalorder %v5950_v50, %v5952_v3 }
 0x4d7   :  { %v5958_v45 = vsel %vm308_vm15, 1.0, %v6294_v15 }
 0x4d8   :  { %4265 = vmatprep.mubr.msk.f32.mxu1 %vm314_vm1, %v5958_v45  ;;  %v315_v3 = vsel %vm314_vm1, %v5958_v45, 0.0 }
 0x5a1   :  { %v4229_v55 = vpop.f32.mrb[16].mxu0 }
 0x5a2   :  { %v5965_v60 = vadd.f32 %v4229_v55, %v3822_v44  ;;  %v1767_v62 = vpop.f32.mrb[17].mxu0 }
 0x5a3   :  { %v1768_v8 = vadd.f32 %v3822_v44, %v1767_v62 }
 0x5a4   :  { %v1797_v14 = vand.u32 2147483647, %v5965_v60  ;;  %vm1833_vm2 = vcmp.ge.f32.partialorder %v5965_v60, 0.0 }
 0x5a5   :  { %v1796_v19 = vand.u32 2147483647, %v1768_v8  ;;  %v4232_v25 = vpop.f32.mrb[18].mxu0  ;;  %vm1832_vm3 = vcmp.ge.f32.partialorder %v1768_v8, 0.0 }
 0x5a6   :  { %v1803_v22 = vsub.f32 0.0, %v1797_v14  ;;  %v5968_v29 = vadd.f32 %v4232_v25, %v3822_v44  ;;  %v1777_v46 = vpop.f32.mrb[19].mxu0 }
 0x5a7   :  { %v1802_v6 = vsub.f32 0.0, %v1796_v19  ;;  %v5970_v61 = vadd.f32 %v3822_v44, %v1777_v46 }
 0x5a8   :  { %v1810_v9 = vmul.f32 1.442695, %v1803_v22  ;;  %v1799_v56 = vand.u32 2147483647, %v5968_v29  ;;  %vm1835_vm5 = vcmp.ge.f32.partialorder %v5968_v29, 0.0 }
 0x5a9   :  { %v1808_v18 = vmul.f32 1.442695, %v1802_v6  ;;  %v1798_v5 = vand.u32 2147483647, %v5970_v61  ;;  %v4235_v37 = vpop.f32.mrb[20].mxu0  ;;  %vm1834_vm7 = vcmp.ge.f32.partialorder %v5970_v61, 0.0 }
 0x5aa   :  { %4813 = vpow2.f32 %v1810_v9  ;;  %v1805_v58 = vsub.f32 0.0, %v1799_v56  ;;  %v5974_v51 = vadd.f32 %v4235_v37, %v3822_v44  ;;  %v1787_v54 = vpop.f32.mrb[21].mxu0 }
 0x5ab   :  { %4815 = vpow2.f32 %v1808_v18  ;;  %v1804_v39 = vsub.f32 0.0, %v1798_v5  ;;  %v5976_v49 = vadd.f32 %v3822_v44, %v1787_v54 }
 0x5ac   :  { %v1814_v11 = vmul.f32 1.442695, %v1805_v58  ;;  %v1801_v57 = vand.u32 2147483647, %v5974_v51  ;;  %vm1837_vm8 = vcmp.ge.f32.partialorder %v5974_v51, 0.0 }
 0x5ad   :  { %v1812_v55 = vmul.f32 1.442695, %v1804_v39  ;;  %v1800_v62 = vand.u32 2147483647, %v5976_v49  ;;  %vm1836_vm9 = vcmp.ge.f32.partialorder %v5976_v49, 0.0 }
 0x5ae   :  { %4817 = vpow2.f32 %v1814_v11  ;;  %v1807_v14 = vsub.f32 0.0, %v1801_v57 }
 0x5af   :  { %4819 = vpow2.f32 %v1812_v55  ;;  %v1806_v19 = vsub.f32 0.0, %v1800_v62 }
 0x5b0   :  { %v1818_v25 = vmul.f32 1.442695, %v1807_v14 }
 0x5b1   :  { %v1816_v22 = vmul.f32 1.442695, %v1806_v19 }
 0x5b2   :  { %4821 = vpow2.f32 %v1818_v25 }
 0x5b3   :  { %4823 = vpow2.f32 %v1816_v22 }
 0x5b4   :  { %v4814_v46 = vpop.eup %4813 }
 0x5b5   :  { %v4816_v6 = vpop.eup %4815  ;;  %v1821_v9 = vadd.f32 1.0, %v4814_v46 }
 0x5b6   :  { %v1820_v56 = vadd.f32 1.0, %v4816_v6 }
 0x5b7   :  { %4825 = vrcp.f32 %v1821_v9 }
 0x5b8   :  { %v4818_v44 = vpop.eup %4817  ;;  %4827 = vrcp.f32 %v1820_v56 }
 0x5b9   :  { %v4820_v18 = vpop.eup %4819  ;;  %v1823_v5 = vadd.f32 1.0, %v4818_v44 }
 0x5ba   :  { %v1822_v37 = vadd.f32 1.0, %v4820_v18 }
 0x5bb   :  { %4829 = vrcp.f32 %v1823_v5 }
 0x5bc   :  { %v4822_v58 = vpop.eup %4821  ;;  %4831 = vrcp.f32 %v1822_v37 }
 0x5bd   :  { %v4824_v54 = vpop.eup %4823  ;;  %v1825_v39 = vadd.f32 1.0, %v4822_v58 }
 0x5be   :  { %v1824_v11 = vadd.f32 1.0, %v4824_v54 }
 0x5bf   :  { %4833 = vrcp.f32 %v1825_v39 }
 0x5c0   :  { %4835 = vrcp.f32 %v1824_v11 }
 0x5c1   :  { %v4826_v57 = vpop.eup %4825 }
 0x5c2   :  { %v4828_v55 = vpop.eup %4827  ;;  %v1839_v62 = vmul.f32 %v4826_v57, %v4814_v46 }
 0x5c3   :  { %v1838_v14 = vmul.f32 %v4828_v55, %v4816_v6 }
 0x5c4   :  { %v1845_v19 = vsel %vm1833_vm2, %v4826_v57, %v1839_v62 }
 0x5c5   :  { %v4830_v25 = vpop.eup %4829  ;;  %v1844_v22 = vsel %vm1832_vm3, %v4828_v55, %v1838_v14  ;;  %v1851_v37 = vmul.f32 %v1845_v19, %v5965_v60 }
 0x5c6   :  { %v4832_v9 = vpop.eup %4831  ;;  %v1850_v56 = vmul.f32 %v1844_v22, %v1768_v8  ;;  %v1841_v5 = vmul.f32 %v4830_v25, %v4818_v44 }
 0x5c7   :  { %v1840_v15 = vmul.f32 %v4832_v9, %v4820_v18 }
 0x5c8   :  { %v1847_v39 = vsel %vm1835_vm5, %v4830_v25, %v1841_v5  ;;  %4244 = vmatprep.mubr.msk.f32.mxu0 %vm888_vm6, %v1850_v56 }
 0x5c9   :  { %v4834_v46 = vpop.eup %4833  ;;  %v1846_v11 = vsel %vm1834_vm7, %v4832_v9, %v1840_v15  ;;  %4245 = vmatmul.mubr.msk.f32.vlgmr.msra.gmra.mrb[22].mxu0 %vm888_vm6, %v1851_v37  ;;  %v1853_v60 = vmul.f32 %v1847_v39, %v5968_v29  ;;  %v6320_v29 = vmov 0.0  }
 0x5ca   :  { %v4836_v6 = vpop.eup %4835  ;;  %v1852_v57 = vmul.f32 %v1846_v11, %v5970_v61  ;;  %v1843_v55 = vmul.f32 %v4834_v46, %v4822_v58  ;;  %4532 = vmatpush3.bf16.msra.mxu0 %v5930_v48 }
 0x5cb   :  { %v1842_v8 = vmul.f32 %v4836_v6, %v4824_v54  ;;  %4534 = vmatprep.subr.bf16.mxu0 %v5939_v38 }
 0x5cc   :  { %v1849_v44 = vsel %vm1837_vm8, %v4834_v46, %v1843_v55  ;;  %4247 = vmatprep.mubr.msk.f32.mxu0 %vm888_vm6, %v1852_v57  ;;  %v2173_v55 = vld [vmem:[#allocation16] sm:$0xff] }
 0x5cd   :  { %v1848_v15 = vsel %vm1836_vm9, %v4836_v6, %v1842_v8  ;;  %4248 = vmatmul.mubr.msk.f32.gmra.mrb[24].mxu0 %vm888_vm6, %v1853_v60  ;;  %v1855_v48 = vmul.f32 %v1849_v44, %v5974_v51  ;;  %v2174_v60 = vld [vmem:[#allocation16 + $0x8] sm:$0xff] }
 0x5ce   :  { %v1854_v61 = vmul.f32 %v1848_v15, %v5976_v49  ;;  %4536 = vmatpush3.bf16.msra.mxu0 %v5939_v38  ;;  %v6007_v49 = vsel %vm309_vm0, 1.0, %v6320_v29  ;;  %v4541_v44 = vpack.c.bf16 %v2174_v60, %v2173_v55  ;;  %v2175_v15 = vld [vmem:[#allocation16 + $0x10] sm:$0xff]  ;;  %v4910_v55 = vld [vmem:[%s6317_s10] sm:$0xff] }
 0x5cf   :  { %4538 = vmatprep.subr.bf16.mxu0 %v5946_v1  ;;  %v318_v50 = vsel %vm314_vm1, %v6007_v49, 0.0  ;;  %v2171_v29 = vld [vmem:[#allocation14 + $0x10] sm:$0xff] }
 0x5d0   :  { %4250 = vmatprep.mubr.msk.f32.mxu0 %vm888_vm6, %v1854_v61  ;;  %v2176_v61 = vld [vmem:[#allocation16 + $0x18] sm:$0xff] }
 0x5d1   :  { %4251 = vmatmul.mubr.msk.f32.gmra.mrb[26].mxu0 %vm888_vm6, %v1855_v48  ;;  %v2170_v48 = vld [vmem:[#allocation14 + $0x8] sm:$0xff] }
 0x5d2   :  { %4540 = vmatpush3.bf16.msra.mxu0 %v5946_v1  ;;  %4280 = vmatprep.mubr.msk.f32.mxu0 %vm314_vm1, %v5958_v45 }
 0x5d5   :  { %4281 = vmatmul.mubr.msk.f32.vlgmr.msra.gmra.mrb[28].mxu0 %vm314_vm1, %v6007_v49 }
 0x69c   :  { %v4246_v38 = vpop.f32.mrb[22].mxu0 }
 0x69d   :  { %1980 = vperm.xlu0 %4707, %v4246_v38   ;;  %v1944_v51 = vpop.f32.mrb[23].mxu0 }
 0x69e   :  { %1975 = vperm.xlu1 %4708, %v1944_v51   ;;  %v2362_v51 = vld [vmem:[#allocation17] sm:$0xff] }
 0x6a0   :  { %v4249_v18 = vpop.f32.mrb[24].mxu0 }
 0x6a1   :  { %v1954_v58 = vpop.f32.mrb[25].mxu0 }
 0x6a2   :  { %1990 = vperm.xlu1 %4708, %v4249_v18   ;;  %v2363_v18 = vld [vmem:[#allocation17 + $0x8] sm:$0xff] }
 0x6a4   :  { %v4252_v1 = vpop.f32.mrb[26].mxu0 }
 0x6a5   :  { %v1964_v54 = vpop.f32.mrb[27].mxu0 }
 0x6a6   :  { %1985 = vperm.xlu1 %4708, %v1954_v58   ;;  %v4557_v58 = vpack.c.bf16 %v2363_v18, %v2362_v51 }
 0x6a8   :  { %v4282_v62 = vpop.f32.mrb[28].mxu0  ;;  %4558 = vmatprep.subr.bf16.mxu0 %v4557_v58 }
 0x6a9   :  { %v2160_v14 = vpop.f32.mrb[29].mxu0  ;;  %4560 = vmatpush3.bf16.msra.mxu0 %v4557_v58 }
 0x6aa   :  { %1995 = vperm.xlu1 %4708, %v1964_v54   ;;  %v2365_v54 = vld [vmem:[#allocation17 + $0x18] sm:$0xff] }
 0x6ae   :  { %2000 = vperm.xlu1 %4708, %v4252_v1   ;;  %v2364_v1 = vld [vmem:[#allocation17 + $0x10] sm:$0xff] }
 0x6bc   :  { %319 = vadd.xlane.f32.xlu0 %v318_v50  ;;  %v3854_v50 = vld [vmem:[%s6319_s1 + $0x28] sm:$0xff] }
 0x6d2   :  { %316 = vadd.xlane.f32.xlu1 %v315_v3 }
 0x71c   :  { %v1981_v19 = vpop.permute.xlu0 %1980 }
 0x71d   :  { %v2004_v25 = vmul.f32 %v5718_v0, %v1981_v19  ;;  %v1976_v22 = vpop.permute.xlu1 %1975 }
 0x71e   :  { %v2003_v9 = vmul.f32 %v1976_v22, %v5722_v2 }
 0x720   :  { %v4517_v56 = vpack.c.bf16 %v2004_v25, %v2003_v9 }
 0x721   :  { %v1991_v5 = vpop.permute.xlu1 %1990 }
 0x722   :  { %4518 = vmatprep.subr.bf16.mxu1 %v4517_v56  ;;  %v2006_v39 = vmul.f32 %v5728_v12, %v1991_v5  ;;  %v4545_v12 = vpack.c.bf16 %v2176_v61, %v2175_v15 }
 0x723   :  { %4520 = vmatpush3.bf16.msra.mxu1 %v4517_v56 }
 0x725   :  { %v1986_v37 = vpop.permute.xlu1 %1985 }
 0x726   :  { %v2005_v46 = vmul.f32 %v1986_v37, %v5730_v13  ;;  %v2169_v13 = vld [vmem:[#allocation14] sm:$0xff] }
 0x728   :  { %v4521_v11 = vpack.c.bf16 %v2006_v39, %v2005_v46 }
 0x729   :  { %v1996_v6 = vpop.permute.xlu1 %1995 }
 0x72a   :  { %4522 = vmatprep.subr.bf16.mxu1 %v4521_v11  ;;  %v2007_v0 = vmul.f32 %v1996_v6, %v5742_v32  ;;  %v4549_v32 = vpack.c.bf16 %v2170_v48, %v2169_v13  ;;  %v4909_v6 = vld [vmem:[%s6317_s10 + $0x8] sm:$0xff] }
 0x72b   :  { %4524 = vmatpush3.bf16.msra.mxu1 %v4521_v11 }
 0x72d   :  { %v2001_v57 = vpop.permute.xlu1 %2000 }
 0x72e   :  { %v2008_v2 = vmul.f32 %v5738_v43, %v2001_v57  ;;  %v2172_v43 = vld [vmem:[#allocation14 + $0x18] sm:$0xff] }
 0x72f   :  { %v4553_v38 = vpack.c.bf16 %v2172_v43, %v2171_v29 }
 0x730   :  { %v4525_v8 = vpack.c.bf16 %v2008_v2, %v2007_v0  ;;  %v3843_v2 = vld [vmem:[%s6276_s21] ss:$0 sm:$0xff] }
 0x732   :  { %4526 = vmatprep.subr.bf16.mxu1 %v4525_v8 }
 0x733   :  { %4528 = vmatpush3.bf16.msra.mxu1 %v4525_v8 }
 0x734   :  { %4542 = vmatprep.subr.bf16.mxu1 %v4541_v44 }
 0x736   :  { %4266 = vmatmul.mubr.msk.f32.vlgmr.msra.gmra.mrb[14].mxu1 %vm314_vm1, %v6007_v49 }
 0x737   :  { %4544 = vmatpush3.bf16.msra.mxu1 %v4541_v44  ;;  %4291 = vmatprep.mubr.msk.f32.mxu1 %vm888_vm6, %v2160_v14  ;;  %v4561_v14 = vpack.c.bf16 %v2365_v54, %v2364_v1 }
 0x738   :  { %4546 = vmatprep.subr.bf16.mxu1 %v4545_v12 }
 0x739   :  { %4562 = vmatprep.subr.bf16.mxu0 %v4561_v14 }
 0x73a   :  { %4564 = vmatpush3.bf16.msra.mxu0 %v4561_v14 }
 0x73b   :  { %4548 = vmatpush3.bf16.msra.mxu1 %v4545_v12 }
 0x73c   :  { %4550 = vmatprep.subr.bf16.mxu1 %v4549_v32 }
 0x73e   :  { %4292 = vmatmul.mubr.msk.f32.vlgmr.msra.gmra.mrb[16].mxu1 %vm888_vm6, %v4282_v62  ;;  %v3853_v62 = vld [vmem:[%s6319_s1 + $0x20] sm:$0xff] }
 0x73f   :  { %4552 = vmatpush3.bf16.msra.mxu1 %v4549_v32  ;;  %4302 = vmatprep.mubr.msk.f32.mxu1 %vm888_vm6, %v5704_v63  ;;  %v4569_v3 = vpack.c.bf16 %v3854_v50, %v3853_v62 }
 0x740   :  { %4554 = vmatprep.subr.bf16.mxu1 %v4553_v38 }
 0x743   :  { %4556 = vmatpush3.bf16.msra.mxu1 %v4553_v38 }
 0x744   :  { %4570 = vmatprep.subr.bf16.mxu1 %v4569_v3 }
 0x746   :  { %4303 = vmatmul.mubr.msk.f32.vlgmr.msra.gmra.mrb[16].mxu1 %vm888_vm6, %v5706_v52 }
 0x747   :  { %4572 = vmatpush3.bf16.msra.mxu1 %v4569_v3  ;;  %v3859_v3 = vld [vmem:[%s6318_s11 + $0x20] sm:$0xff] }
 0x749   :  { %v320_v19 = vpop.xlane.xlu0 %319 }
 0x74a   :  { %v322_v22 = vmax.f32 %v320_v19, 1.0  ;;  %v3860_v19 = vld [vmem:[%s6318_s11 + $0x28] sm:$0xff] }
 0x74c   :  { %4837 = vrcp.f32 %v322_v22 }
 0x756   :  { %v4838_v56 = vpop.eup %4837 }
 0x75f   :  { %v317_v25 = vpop.xlane.xlu1 %316 }
 0x760   :  { %v321_v9 = vmax.f32 %v317_v25, 1.0 }
 0x762   :  { %4839 = vrcp.f32 %v321_v9 }
 0x76c   :  { %v4840_v5 = vpop.eup %4839 }
 0x809   :  { %v4267_v37 = vpop.f32.mrb[14].mxu1 }
 0x80a   :  { %v2091_v39 = vmul.f32 %v4838_v56, %v4267_v37  ;;  %v2081_v46 = vpop.f32.mrb[15].mxu1  ;;  %v4577_v56 = vpack.c.bf16 %v3860_v19, %v3859_v3  ;;  %v2952_v3 = vld [vmem:[#allocation13 + $0x8] sm:$0xff] }
 0x80b   :  { %v2090_v11 = vmul.f32 %v4840_v5, %v2081_v46 }
 0x80c   :  { %v2093_v57 = vadd.f32 %v4909_v6, %v2091_v39 }
 0x80d   :  { %v2092_v60 = vadd.f32 %v4910_v55, %v2090_v11 }
 0x80f   :  { %v4565_v0 = vpack.c.bf16 %v2093_v57, %v2092_v60 }
 0x811   :  { %4566 = vmatprep.subr.bf16.mxu0 %v4565_v0 }
 0x819   :  { %v4304_v8 = vpop.f32.mrb[16].mxu1 }
 0x81a   :  { %v2341_v44 = vadd.f32 %v4304_v8, %v3843_v2  ;;  %v2324_v15 = vpop.f32.mrb[17].mxu1 }
 0x81b   :  { %v2340_v61 = vadd.f32 %v3843_v2, %v2324_v15 }
 0x81c   :  { %v2343_v12 = vand.u32 2147483647, %v2341_v44  ;;  %vm2355_vm11 = vcmp.ge.f32.partialorder %v2341_v44, 0.0 }
 0x81d   :  { %v2342_v13 = vand.u32 2147483647, %v2340_v61  ;;  %vm2354_vm12 = vcmp.ge.f32.partialorder %v2340_v61, 0.0 }
 0x81e   :  { %v2345_v48 = vsub.f32 0.0, %v2343_v12 }
 0x81f   :  { %v2344_v32 = vsub.f32 0.0, %v2342_v13 }
 0x820   :  { %v2348_v29 = vmul.f32 1.442695, %v2345_v48 }
 0x821   :  { %v2346_v43 = vmul.f32 1.442695, %v2344_v32 }
 0x822   :  { %4841 = vpow2.f32 %v2348_v29 }
 0x823   :  { %4843 = vpow2.f32 %v2346_v43 }
 0x82c   :  { %v4842_v38 = vpop.eup %4841 }
 0x82d   :  { %v4844_v51 = vpop.eup %4843  ;;  %v2351_v18 = vadd.f32 1.0, %v4842_v38 }
 0x82e   :  { %v2350_v58 = vadd.f32 1.0, %v4844_v51 }
 0x82f   :  { %4845 = vrcp.f32 %v2351_v18 }
 0x830   :  { %4847 = vrcp.f32 %v2350_v58 }
 0x839   :  { %v4846_v1 = vpop.eup %4845 }
 0x83a   :  { %v4848_v54 = vpop.eup %4847  ;;  %v2357_v14 = vmul.f32 %v4846_v1, %v4842_v38 }
 0x83b   :  { %v2356_v62 = vmul.f32 %v4848_v54, %v4844_v51 }
 0x83c   :  { %v2359_v50 = vsel %vm2355_vm11, %v4846_v1, %v2357_v14 }
 0x83d   :  { %v2358_v25 = vsel %vm2354_vm12, %v4848_v54, %v2356_v62  ;;  %v2361_v9 = vmul.f32 %v2359_v50, %v2341_v44  ;;  %vm3737_vm12 = vcmask 253952  }
 0x83e   :  { %v2360_v22 = vmul.f32 %v2358_v25, %v2340_v61 }
 0x840   :  { %4313 = vmatprep.mubr.msk.f32.mxu0 %vm888_vm6, %v2360_v22 }
 0x841   :  { %4314 = vmatmul.mubr.msk.f32.vlgmr.msra.gmra.mrb[30].mxu0 %vm888_vm6, %v2361_v9 }
 0x842   :  { %4568 = vmatpush3.bf16.msra.mxu0 %v4565_v0  ;;  %4320 = vmatprep.mubr.msk.f32.mxu0 %vm746_vm13, %v5599_v30  ;;  %v3861_v30 = vld [vmem:[%s6318_s11 + $0x30] sm:$0xff] }
 0x843   :  { %4578 = vmatprep.subr.bf16.mxu0 %v4577_v56 }
 0x845   :  { %4321 = vmatmul.mubr.msk.f32.vlgmr.msra.gmra.mrb[32].mxu0 %vm746_vm13, %v5630_v59  ;;  %v3862_v59 = vld [vmem:[%s6318_s11 + $0x38] sm:$0xff] }
 0x846   :  { %4323 = vmatprep.mubr.msk.f32.mxu0 %vm746_vm13, %v5645_v41  ;;  %4580 = vmatpush3.bf16.msra.mxu0 %v4577_v56  ;;  %v3855_v41 = vld [vmem:[%s6319_s1 + $0x30] sm:$0xff]  ;;  %v4581_v5 = vpack.c.bf16 %v3862_v59, %v3861_v30 }
 0x848   :  { %4582 = vmatprep.subr.bf16.mxu0 %v4581_v5 }
 0x849   :  { %4324 = vmatmul.mubr.msk.f32.gmra.mrb[34].mxu0 %vm746_vm13, %v5671_v24  ;;  %v3856_v24 = vld [vmem:[%s6319_s1 + $0x38] sm:$0xff] }
 0x84a   :  { %4326 = vmatprep.mubr.msk.f32.mxu0 %vm746_vm13, %v5686_v28  ;;  %v4573_v28 = vpack.c.bf16 %v3856_v24, %v3855_v41  ;;  %4584 = vmatpush3.bf16.msra.mxu0 %v4581_v5 }
 0x84c   :  { %4574 = vmatprep.subr.bf16.mxu1 %v4573_v28 }
 0x84d   :  { %4327 = vmatmul.mubr.msk.f32.gmra.mrb[36].mxu0 %vm746_vm13, %v5700_v35  ;;  %4576 = vmatpush3.bf16.msra.mxu1 %v4573_v28  ;;  %v3844_v35 = vld [vmem:[%s6278_s23] ss:$0 sm:$0xff] }
 0x914   :  { %v4315_v37 = vpop.f32.mrb[30].mxu0 }
 0x915   :  { %v2451_v39 = vadd.f32 %v4315_v37, %v3844_v35  ;;  %v2445_v46 = vpop.f32.mrb[31].mxu0 }
 0x916   :  { %v2446_v11 = vadd.f32 %v3844_v35, %v2445_v46 }
 0x917   :  { %v6083_v55 = vadd.f32 %v2451_v39, %v5706_v52 }
 0x918   :  { %v6080_v6 = vadd.f32 %v2446_v11, %v5704_v63  ;;  %v4322_v57 = vpop.f32.mrb[32].mxu0 }
 0x919   :  { %v2522_v60 = vpop.f32.mrb[33].mxu0  ;;  %v2552_v2 = vmul.f32 %v4322_v57, %v4322_v57 }
 0x91a   :  { %v2551_v0 = vmul.f32 %v2522_v60, %v2522_v60  ;;  %4337 = vmatprep.mubr.msk.f32.mxu1 %vm888_vm6, %v6080_v6  ;;  %4348 = vmatprep.mubr.msk.f32.mxu0 %vm888_vm6, %v6080_v6 }
 0x91b   :  { %4338 = vmatmul.mubr.msk.f32.vlgmr.msra.gmra.mrb[18].mxu1 %vm888_vm6, %v6083_v55  ;;  %4349 = vmatmul.mubr.msk.f32.vlgmr.msra.gmra.mrb[38].mxu0 %vm888_vm6, %v6083_v55  ;;  %v2560_v48 = vsel %vm456_vm4, %v2552_v2, 0.0 }
 0x91c   :  { %v4325_v8 = vpop.f32.mrb[34].mxu0  ;;  %4355 = vmatprep.mubr.msk.f32.mxu1 %vm746_vm13, %v5584_v16  ;;  %v2557_v44 = vsel %vm456_vm4, %v2551_v0, 0.0 }
 0x91d   :  { %2558 = vadd.xlane.f32.xlu1 %v2557_v44  ;;  %v2532_v15 = vpop.f32.mrb[35].mxu0  ;;  %v2554_v12 = vmul.f32 %v4325_v8, %v4325_v8 }
 0x91e   :  { %v2553_v61 = vmul.f32 %v2532_v15, %v2532_v15 }
 0x91f   :  { %v2566_v51 = vsel %vm456_vm4, %v2554_v12, 0.0 }
 0x920   :  { %v4328_v13 = vpop.f32.mrb[36].mxu0  ;;  %v2563_v32 = vsel %vm456_vm4, %v2553_v61, 0.0 }
 0x921   :  { %2561 = vadd.xlane.f32.xlu1 %v2560_v48  ;;  %2564 = vadd.xlane.f32.xlu0 %v2563_v32  ;;  %v2542_v29 = vpop.f32.mrb[37].mxu0  ;;  %v2556_v38 = vmul.f32 %v4328_v13, %v4328_v13 }
 0x922   :  { %v2555_v43 = vmul.f32 %v2542_v29, %v2542_v29 }
 0x923   :  { %v2572_v18 = vsel %vm456_vm4, %v2556_v38, 0.0 }
 0x924   :  { %v2569_v16 = vsel %vm456_vm4, %v2555_v43, 0.0 }
 0x925   :  { %2567 = vadd.xlane.f32.xlu1 %v2566_v51  ;;  %2570 = vadd.xlane.f32.xlu0 %v2569_v16 }
 0x929   :  { %2573 = vadd.xlane.f32.xlu1 %v2572_v18 }
 0x9ee   :  { %v4339_v58 = vpop.f32.mrb[18].mxu1  ;;  %v4350_v1 = vpop.f32.mrb[38].mxu0 }
 0x9ef   :  { %v2652_v54 = vpop.f32.mrb[19].mxu1  ;;  %v2732_v14 = vpop.f32.mrb[39].mxu0 }
 0x9f0   :  { %v4589_v62 = vpack.c.bf16 %v4339_v58, %v2652_v54  ;;  %v4585_v50 = vpack.c.bf16 %v4350_v1, %v2732_v14 }
 0x9f2   :  { %4586 = vmatprep.subr.bf16.mxu1 %v4585_v50 }
 0x9f3   :  { %4588 = vmatpush3.bf16.msra.mxu1 %v4585_v50 }
 0x9f4   :  { %4590 = vmatprep.subr.bf16.mxu1 %v4589_v62 }
 0x9f6   :  { %4356 = vmatmul.mubr.msk.f32.vlgmr.msra.gmra.mrb[20].mxu1 %vm746_vm13, %v5626_v53 }
 0x9f7   :  { %4358 = vmatprep.mubr.msk.f32.mxu1 %vm746_vm13, %v5641_v7  ;;  %4592 = vmatpush3.bf16.msra.mxu1 %v4589_v62  ;;  %v3889_v7 = vld [vmem:[%s6269_s14 + $0x38] sm:$0xff] }
 0x9f8   :  { %4377 = vmatprep.subr.mxu1 %v2952_v3 }
 0x9fa   :  { %4359 = vmatmul.mubr.msk.f32.gmra.mrb[22].mxu1 %vm746_vm13, %v5665_v23  ;;  %v2559_v23 = vpop.xlane.xlu1 %2558 }
 0x9fb   :  { %4361 = vmatprep.mubr.msk.f32.mxu1 %vm746_vm13, %v5677_v26 }
 0x9fe   :  { %4362 = vmatmul.mubr.msk.f32.gmra.mrb[24].mxu1 %vm746_vm13, %v5696_v33  ;;  %v2562_v26 = vpop.xlane.xlu1 %2561 }
 0x9ff   :  { %4368 = vmatprep.mubr.msk.f32.mxu1 %vm746_vm13, %v5587_v17  ;;  %v3886_v17 = vld [vmem:[%s6269_s14 + $0x20] sm:$0xff] }
 0xa02   :  { %4369 = vmatmul.mubr.msk.f32.vlgmr.msra.gmra.mrb[20].mxu1 %vm746_vm13, %v5605_v34  ;;  %v3887_v34 = vld [vmem:[%s6269_s14 + $0x28] sm:$0xff] }
 0xa03   :  { %4371 = vmatprep.mubr.msk.f32.mxu1 %vm746_vm13, %v5637_v4  ;;  %4378 = vmatpush3.msra.mxu1 %v2952_v3  ;;  %v4593_v53 = vpack.c.bf16 %v3887_v34, %v3886_v17  ;;  %v3888_v4 = vld [vmem:[%s6269_s14 + $0x30] sm:$0xff] }
 0xa05   :  { %4594 = vmatprep.subr.bf16.mxu0 %v4593_v53 }
 0xa06   :  { %4372 = vmatmul.mubr.msk.f32.gmra.mrb[22].mxu1 %vm746_vm13, %v5660_v20  ;;  %4596 = vmatpush3.bf16.msra.mxu0 %v4593_v53  ;;  %v4597_v20 = vpack.c.bf16 %v3889_v7, %v3888_v4 }
 0xa07   :  { %4374 = vmatprep.mubr.msk.f32.mxu1 %vm746_vm13, %v5682_v27  ;;  %v3877_v27 = vld [vmem:[#allocation11 + $0x1] ss:$0 sm:$0xff] }
 0xa08   :  { %4598 = vmatprep.subr.bf16.mxu0 %v4597_v20  ;;  %v2940_v33 = vmul.f32 %v3877_v27, %v2562_v26 }
 0xa0a   :  { %4375 = vmatmul.mubr.msk.f32.gmra.mrb[24].mxu1 %vm746_vm13, %v5692_v31  ;;  %4600 = vmatpush3.bf16.msra.mxu0 %v4597_v20  ;;  %v2568_v31 = vpop.xlane.xlu1 %2567 }
 0xa0b   :  { %4379 = vmatprep.mubr.msk.f32.mxu1 %vm1295_vm10, %v5790_v10  ;;  %v2565_v10 = vpop.xlane.xlu0 %2564  ;;  %v2942_v25 = vmul.f32 %v3877_v27, %v2568_v31 }
 0xa0c   :  { %v2941_v9 = vmul.f32 %v3877_v27, %v2565_v10 }
 0xa0e   :  { %4380 = vmatmul.mubr.msk.f32.vlgmr.msra.gmra.mrb[20].mxu1 %vm1295_vm10, %v5799_v21  ;;  %v2939_v21 = vmul.f32 %v3877_v27, %v2559_v23  ;;  %v2574_v56 = vpop.xlane.xlu1 %2573 }
 0xa0f   :  { %4382 = vmatprep.mubr.msk.f32.mxu1 %vm1295_vm10, %v5802_v40  ;;  %v2571_v41 = vpop.xlane.xlu0 %2570  ;;  %v2944_v39 = vmul.f32 %v3877_v27, %v2574_v56 }
 0xa10   :  { %v2943_v57 = vmul.f32 %v3877_v27, %v2571_v41 }
 0xa12   :  { %4383 = vmatmul.mubr.msk.f32.gmra.mrb[22].mxu1 %vm1295_vm10, %v5810_v36  ;;  %v3885_v36 = vld [vmem:[%s6268_s13 + $0x1] ss:$0 sm:$0xff] }
 0xa13   :  { %4385 = vmatprep.mubr.msk.f32.mxu1 %vm1295_vm10, %v5813_v42 }
 0xa16   :  { %4386 = vmatmul.mubr.msk.f32.gmra.mrb[24].mxu1 %vm1295_vm10, %v5820_v47 }
 0xae1   :  { %v4381_v40 = vpop.f32.mrb[20].mxu1 }
 0xae2   :  { %v4643_v42 = vadd.f32 %v4381_v40, %v2940_v33  ;;  %v3019_v47 = vpop.f32.mrb[21].mxu1 }
 0xae3   :  { %v4644_v19 = vadd.f32 %v3019_v47, %v2939_v21 }
 0xae4   :  { %v6150_v22 = vadd.f32 %v4643_v42, %v3885_v36 }
 0xae5   :  { %v6152_v30 = vadd.f32 %v4644_v19, %v3885_v36  ;;  %v4384_v59 = vpop.f32.mrb[22].mxu1 }
 0xae6   :  { %v3069_v5 = vand.u32 2147483647, %v6150_v22  ;;  %v4645_v24 = vadd.f32 %v4384_v59, %v2942_v25  ;;  %v3029_v28 = vpop.f32.mrb[23].mxu1  ;;  %vm3105_vm4 = vcmp.ge.f32.partialorder %v6150_v22, 0.0 }
 0xae7   :  { %v3068_v35 = vand.u32 2147483647, %v6152_v30  ;;  %v4646_v37 = vadd.f32 %v3029_v28, %v2941_v9  ;;  %vm3104_vm13 = vcmp.ge.f32.partialorder %v6152_v30, 0.0 }
 0xae8   :  { %v3075_v46 = vsub.f32 0.0, %v3069_v5  ;;  %v6156_v11 = vadd.f32 %v4645_v24, %v3885_v36 }
 0xae9   :  { %v3074_v60 = vsub.f32 0.0, %v3068_v35  ;;  %v6158_v0 = vadd.f32 %v4646_v37, %v3885_v36  ;;  %v4387_v2 = vpop.f32.mrb[24].mxu1 }
 0xaea   :  { %v3082_v8 = vmul.f32 1.442695, %v3075_v46  ;;  %v3071_v44 = vand.u32 2147483647, %v6156_v11  ;;  %v4647_v15 = vadd.f32 %v4387_v2, %v2944_v39  ;;  %v3039_v61 = vpop.f32.mrb[25].mxu1  ;;  %vm3107_vm10 = vcmp.ge.f32.partialorder %v6156_v11, 0.0 }
 0xaeb   :  { %v3080_v12 = vmul.f32 1.442695, %v3074_v60  ;;  %v3070_v13 = vand.u32 2147483647, %v6158_v0  ;;  %v4648_v48 = vadd.f32 %v3039_v61, %v2943_v57  ;;  %vm3106_vm14 = vcmp.ge.f32.partialorder %v6158_v0, 0.0 }
 0xaec   :  { %4849 = vpow2.f32 %v3082_v8  ;;  %v3077_v32 = vsub.f32 0.0, %v3071_v44  ;;  %v6162_v29 = vadd.f32 %v4647_v15, %v3885_v36 }
 0xaed   :  { %4851 = vpow2.f32 %v3080_v12  ;;  %v3076_v43 = vsub.f32 0.0, %v3070_v13  ;;  %v6164_v38 = vadd.f32 %v4648_v48, %v3885_v36 }
 0xaee   :  { %v3086_v51 = vmul.f32 1.442695, %v3077_v32  ;;  %v3073_v16 = vand.u32 2147483647, %v6162_v29  ;;  %vm3109_vm15 = vcmp.ge.f32.partialorder %v6162_v29, 0.0 }
 0xaef   :  { %v3084_v18 = vmul.f32 1.442695, %v3076_v43  ;;  %v3072_v58 = vand.u32 2147483647, %v6164_v38  ;;  %vm3108_vm0 = vcmp.ge.f32.partialorder %v6164_v38, 0.0 }
 0xaf0   :  { %4853 = vpow2.f32 %v3086_v51  ;;  %v3079_v1 = vsub.f32 0.0, %v3073_v16 }
 0xaf1   :  { %4855 = vpow2.f32 %v3084_v18  ;;  %v3078_v54 = vsub.f32 0.0, %v3072_v58 }
 0xaf2   :  { %v3090_v14 = vmul.f32 1.442695, %v3079_v1 }
 0xaf3   :  { %v3088_v62 = vmul.f32 1.442695, %v3078_v54 }
 0xaf4   :  { %4857 = vpow2.f32 %v3090_v14 }
 0xaf5   :  { %4859 = vpow2.f32 %v3088_v62 }
 0xaf6   :  { %v4850_v50 = vpop.eup %4849 }
 0xaf7   :  { %v4852_v3 = vpop.eup %4851  ;;  %v3093_v17 = vadd.f32 1.0, %v4850_v50 }
 0xaf8   :  { %v3092_v34 = vadd.f32 1.0, %v4852_v3 }
 0xaf9   :  { %4861 = vrcp.f32 %v3093_v17 }
 0xafa   :  { %v4854_v53 = vpop.eup %4853  ;;  %4863 = vrcp.f32 %v3092_v34 }
 0xafb   :  { %v4856_v4 = vpop.eup %4855  ;;  %v3095_v7 = vadd.f32 1.0, %v4854_v53 }
 0xafc   :  { %v3094_v20 = vadd.f32 1.0, %v4856_v4 }
 0xafd   :  { %4865 = vrcp.f32 %v3095_v7 }
 0xafe   :  { %v4858_v23 = vpop.eup %4857  ;;  %4867 = vrcp.f32 %v3094_v20 }
 0xaff   :  { %v4860_v26 = vpop.eup %4859  ;;  %v3097_v27 = vadd.f32 1.0, %v4858_v23 }
 0xb00   :  { %v3096_v31 = vadd.f32 1.0, %v4860_v26 }
 0xb01   :  { %4869 = vrcp.f32 %v3097_v27 }
 0xb02   :  { %4871 = vrcp.f32 %v3096_v31 }
 0xb03   :  { %v4862_v33 = vpop.eup %4861 }
 0xb04   :  { %v4864_v10 = vpop.eup %4863  ;;  %v3111_v21 = vmul.f32 %v4862_v33, %v4850_v50 }
 0xb05   :  { %v3110_v40 = vmul.f32 %v4864_v10, %v4852_v3 }
 0xb06   :  { %v3117_v36 = vsel %vm3105_vm4, %v4862_v33, %v3111_v21 }
 0xb07   :  { %v4866_v42 = vpop.eup %4865  ;;  %v3116_v47 = vsel %vm3104_vm13, %v4864_v10, %v3110_v40  ;;  %v3123_v56 = vmul.f32 %v3117_v36, %v6150_v22 }
 0xb08   :  { %v4868_v19 = vpop.eup %4867  ;;  %v3122_v25 = vmul.f32 %v3116_v47, %v6152_v30  ;;  %v3113_v9 = vmul.f32 %v4866_v42, %v4854_v53 }
 0xb09   :  { %v3112_v59 = vmul.f32 %v4868_v19, %v4856_v4 }
 0xb0a   :  { %v3119_v41 = vsel %vm3107_vm10, %v4866_v42, %v3113_v9  ;;  %4396 = vmatprep.mubr.msk.f32.mxu0 %vm888_vm6, %v3122_v25 }
 0xb0b   :  { %v4870_v5 = vpop.eup %4869  ;;  %v3118_v24 = vsel %vm3106_vm14, %v4868_v19, %v3112_v59  ;;  %4397 = vmatmul.mubr.msk.f32.vlgmr.msra.gmra.mrb[40].mxu0 %vm888_vm6, %v3123_v56  ;;  %v3125_v30 = vmul.f32 %v3119_v41, %v6156_v11  ;;  %v3891_v11 = vld [vmem:[%s6270_s15 + $0x1] ss:$0 sm:$0xff] }
 0xb0c   :  { %v4872_v28 = vpop.eup %4871  ;;  %v3124_v35 = vmul.f32 %v3118_v24, %v6158_v0  ;;  %v3115_v37 = vmul.f32 %v4870_v5, %v4858_v23 }
 0xb0d   :  { %v3114_v22 = vmul.f32 %v4872_v28, %v4860_v26 }
 0xb0e   :  { %v3121_v39 = vsel %vm3109_vm15, %v4870_v5, %v3115_v37  ;;  %4399 = vmatprep.mubr.msk.f32.mxu0 %vm888_vm6, %v3124_v35 }
 0xb0f   :  { %v3120_v46 = vsel %vm3108_vm0, %v4872_v28, %v3114_v22  ;;  %4400 = vmatmul.mubr.msk.f32.gmra.mrb[42].mxu0 %vm888_vm6, %v3125_v30  ;;  %v3127_v60 = vmul.f32 %v3121_v39, %v6162_v29 }
 0xb10   :  { %v3126_v57 = vmul.f32 %v3120_v46, %v6164_v38 }
 0xb12   :  { %4402 = vmatprep.mubr.msk.f32.mxu0 %vm888_vm6, %v3126_v57 }
 0xb13   :  { %4403 = vmatmul.mubr.msk.f32.gmra.mrb[44].mxu0 %vm888_vm6, %v3127_v60 }
 0xb14   :  { %4417 = vmatprep.mubr.msk.f32.mxu0 %vm314_vm1, %v5958_v45 }
 0xbde   :  { %v4398_v0 = vpop.f32.mrb[40].mxu0 }
 0xbdf   :  { %v3231_v2 = vadd.f32 %v4398_v0, %v3891_v11  ;;  %v3225_v8 = vpop.f32.mrb[41].mxu0 }
 0xbe0   :  { %v3226_v44 = vadd.f32 %v3891_v11, %v3225_v8 }
 0xbe1   :  { %v3255_v15 = vand.u32 2147483647, %v3231_v2  ;;  %vm3291_vm2 = vcmp.ge.f32.partialorder %v3231_v2, 0.0 }
 0xbe2   :  { %v3254_v61 = vand.u32 2147483647, %v3226_v44  ;;  %v4401_v12 = vpop.f32.mrb[42].mxu0  ;;  %vm3290_vm3 = vcmp.ge.f32.partialorder %v3226_v44, 0.0 }
 0xbe3   :  { %v3261_v13 = vsub.f32 0.0, %v3255_v15  ;;  %v6191_v48 = vadd.f32 %v4401_v12, %v3891_v11  ;;  %v3235_v32 = vpop.f32.mrb[43].mxu0 }
 0xbe4   :  { %v3260_v29 = vsub.f32 0.0, %v3254_v61  ;;  %v6193_v43 = vadd.f32 %v3891_v11, %v3235_v32  ;;  %v3395_v32 = vld [vmem:[#allocation16 + $0x20] sm:$0xff] }
 0xbe5   :  { %v3268_v38 = vmul.f32 1.442695, %v3261_v13  ;;  %v3257_v45 = vand.u32 2147483647, %v6191_v48  ;;  %vm3293_vm5 = vcmp.ge.f32.partialorder %v6191_v48, 0.0 }
 0xbe6   :  { %v3266_v51 = vmul.f32 1.442695, %v3260_v29  ;;  %v3256_v16 = vand.u32 2147483647, %v6193_v43  ;;  %v4404_v18 = vpop.f32.mrb[44].mxu0  ;;  %vm3292_vm7 = vcmp.ge.f32.partialorder %v6193_v43, 0.0 }
 0xbe7   :  { %4873 = vpow2.f32 %v3268_v38  ;;  %v3263_v58 = vsub.f32 0.0, %v3257_v45  ;;  %v6197_v1 = vadd.f32 %v4404_v18, %v3891_v11  ;;  %v3245_v54 = vpop.f32.mrb[45].mxu0  ;;  %v3396_v29 = vld [vmem:[#allocation16 + $0x28] sm:$0xff]  ;;  %v3397_v45 = vld [vmem:[#allocation16 + $0x30] sm:$0xff]  ;;  %v3390_v18 = vld [vmem:[#allocation14 + $0x20] sm:$0xff] }
 0xbe8   :  { %4875 = vpow2.f32 %v3266_v51  ;;  %v3262_v14 = vsub.f32 0.0, %v3256_v16  ;;  %v6199_v62 = vadd.f32 %v3891_v11, %v3245_v54  ;;  %v4613_v38 = vpack.c.bf16 %v3396_v29, %v3395_v32  ;;  %v3398_v51 = vld [vmem:[#allocation16 + $0x38] sm:$0xff]  ;;  %v3392_v54 = vld [vmem:[#allocation14 + $0x30] sm:$0xff] }
 0xbe9   :  { %v3272_v50 = vmul.f32 1.442695, %v3263_v58  ;;  %v3259_v3 = vand.u32 2147483647, %v6197_v1  ;;  %vm3295_vm8 = vcmp.ge.f32.partialorder %v6197_v1, 0.0  ;;  %v4617_v16 = vpack.c.bf16 %v3398_v51, %v3397_v45  ;;  %v3391_v58 = vld [vmem:[#allocation14 + $0x28] sm:$0xff] }
 0xbea   :  { %v3270_v17 = vmul.f32 1.442695, %v3262_v14  ;;  %v3258_v34 = vand.u32 2147483647, %v6199_v62  ;;  %vm3294_vm9 = vcmp.ge.f32.partialorder %v6199_v62, 0.0  ;;  %v3393_v14 = vld [vmem:[#allocation14 + $0x38] sm:$0xff] }
 0xbeb   :  { %4877 = vpow2.f32 %v3272_v50  ;;  %v3265_v53 = vsub.f32 0.0, %v3259_v3  ;;  %v4625_v3 = vpack.c.bf16 %v3393_v14, %v3392_v54 }
 0xbec   :  { %4879 = vpow2.f32 %v3270_v17  ;;  %v3264_v4 = vsub.f32 0.0, %v3258_v34  ;;  %v3587_v17 = vld [vmem:[#allocation17 + $0x28] sm:$0xff] }
 0xbed   :  { %v3276_v7 = vmul.f32 1.442695, %v3265_v53  ;;  %v3588_v53 = vld [vmem:[#allocation17 + $0x30] sm:$0xff] }
 0xbee   :  { %v3274_v20 = vmul.f32 1.442695, %v3264_v4  ;;  %v3589_v4 = vld [vmem:[#allocation17 + $0x38] sm:$0xff] }
 0xbef   :  { %4881 = vpow2.f32 %v3276_v7  ;;  %v4633_v7 = vpack.c.bf16 %v3589_v4, %v3588_v53 }
 0xbf0   :  { %4883 = vpow2.f32 %v3274_v20  ;;  %v3905_v20 = vld [vmem:[%s6276_s21 + $0x1] ss:$0 sm:$0xff] }
 0xbf1   :  { %v4874_v23 = vpop.eup %4873 }
 0xbf2   :  { %v4876_v26 = vpop.eup %4875  ;;  %v3279_v27 = vadd.f32 1.0, %v4874_v23 }
 0xbf3   :  { %v3278_v31 = vadd.f32 1.0, %v4876_v26 }
 0xbf4   :  { %4885 = vrcp.f32 %v3279_v27 }
 0xbf5   :  { %v4878_v33 = vpop.eup %4877  ;;  %4887 = vrcp.f32 %v3278_v31 }
 0xbf6   :  { %v4880_v10 = vpop.eup %4879  ;;  %v3281_v21 = vadd.f32 1.0, %v4878_v33 }
 0xbf7   :  { %v3280_v40 = vadd.f32 1.0, %v4880_v10 }
 0xbf8   :  { %4889 = vrcp.f32 %v3281_v21 }
 0xbf9   :  { %v4882_v36 = vpop.eup %4881  ;;  %4891 = vrcp.f32 %v3280_v40 }
 0xbfa   :  { %v4884_v42 = vpop.eup %4883  ;;  %v3283_v47 = vadd.f32 1.0, %v4882_v36 }
 0xbfb   :  { %v3282_v19 = vadd.f32 1.0, %v4884_v42 }
 0xbfc   :  { %4893 = vrcp.f32 %v3283_v47 }
 0xbfd   :  { %4895 = vrcp.f32 %v3282_v19 }
 0xbfe   :  { %v4886_v25 = vpop.eup %4885 }
 0xbff   :  { %v4888_v9 = vpop.eup %4887  ;;  %v3297_v56 = vmul.f32 %v4886_v25, %v4874_v23 }
 0xc00   :  { %v3296_v59 = vmul.f32 %v4888_v9, %v4876_v26 }
 0xc01   :  { %v3303_v41 = vsel %vm3291_vm2, %v4886_v25, %v3297_v56 }
 0xc02   :  { %v4890_v5 = vpop.eup %4889  ;;  %v3309_v24 = vmul.f32 %v3303_v41, %v3231_v2  ;;  %v3302_v28 = vsel %vm3290_vm3, %v4888_v9, %v3296_v59 }
 0xc03   :  { %v4892_v35 = vpop.eup %4891  ;;  %v3308_v37 = vmul.f32 %v3302_v28, %v3226_v44  ;;  %v3299_v30 = vmul.f32 %v4890_v5, %v4878_v33 }
 0xc04   :  { %v3298_v22 = vmul.f32 %v4892_v35, %v4880_v10 }
 0xc05   :  { %v3305_v39 = vsel %vm3293_vm5, %v4890_v5, %v3299_v30  ;;  %v4601_v46 = vpack.c.bf16 %v3309_v24, %v3308_v37  ;;  %v3907_v30 = vld [vmem:[%s6278_s23 + $0x1] ss:$0 sm:$0xff] }
 0xc06   :  { %v4894_v57 = vpop.eup %4893  ;;  %v3311_v60 = vmul.f32 %v3305_v39, %v6191_v48  ;;  %v3304_v11 = vsel %vm3292_vm7, %v4892_v35, %v3298_v22 }
 0xc07   :  { %v4896_v0 = vpop.eup %4895  ;;  %v3310_v8 = vmul.f32 %v3304_v11, %v6193_v43  ;;  %v3301_v15 = vmul.f32 %v4894_v57, %v4882_v36  ;;  %4602 = vmatprep.subr.bf16.mxu0 %v4601_v46 }
 0xc08   :  { %v3300_v2 = vmul.f32 %v4896_v0, %v4884_v42  ;;  %4604 = vmatpush3.bf16.msra.mxu0 %v4601_v46 }
 0xc09   :  { %v3307_v44 = vsel %vm3295_vm8, %v4894_v57, %v3301_v15  ;;  %v4605_v61 = vpack.c.bf16 %v3311_v60, %v3310_v8 }
 0xc0a   :  { %v3313_v12 = vmul.f32 %v3307_v44, %v6197_v1  ;;  %v3306_v13 = vsel %vm3294_vm9, %v4896_v0, %v3300_v2  ;;  %v4621_v1 = vpack.c.bf16 %v3391_v58, %v3390_v18  ;;  %v3910_v58 = vld [vmem:[%s6279_s24] ss:$0 sm:$0xff]  ;;  %s5185_s24 = smov [#allocation19]  }
 0xc0b   :  { %v3312_v48 = vmul.f32 %v3306_v13, %v6199_v62  ;;  %4606 = vmatprep.subr.bf16.mxu0 %v4605_v61  ;;  %s3745_s20 = sshll.u32 %s5185_s24, 4  ;;  %s3746_s20 = int_to_ptr.vmem [resolvable:$true] %s3745_s20 }
 0xc0c   :  { %4608 = vmatpush3.bf16.msra.mxu0 %v4605_v61  ;;  %s5135_s16 = scalar_lea.vmem %s3746_s20, 32  ;;  %p5136_p11 = scmp.lt.s32.totalorder %s3746_s20, %s3746_s20 }
 0xc0d   :  { %v4609_v43 = vpack.c.bf16 %v3313_v12, %v3312_v48 }
 0xc0f   :  { %4610 = vmatprep.subr.bf16.mxu0 %v4609_v43 }
 0xc10   :  { %4612 = vmatpush3.bf16.msra.mxu0 %v4609_v43 }
 0xc11   :  { %4614 = vmatprep.subr.bf16.mxu0 %v4613_v38 }
 0xc13   :  { %4418 = vmatmul.mubr.msk.f32.vlgmr.msra.gmra.mrb[46].mxu0 %vm314_vm1, %v6007_v49  ;;  %v3586_v49 = vld [vmem:[#allocation17 + $0x20] sm:$0xff] }
 0xc14   :  { %4616 = vmatpush3.bf16.msra.mxu0 %v4613_v38  ;;  %v4629_v34 = vpack.c.bf16 %v3587_v17, %v3586_v49 }
 0xc15   :  { %4618 = vmatprep.subr.bf16.mxu0 %v4617_v16 }
 0xc16   :  { %4630 = vmatprep.subr.bf16.mxu1 %v4629_v34 }
 0xc17   :  { %4632 = vmatpush3.bf16.msra.mxu1 %v4629_v34 }
 0xc18   :  { %4620 = vmatpush3.bf16.msra.mxu0 %v4617_v16  ;;  %4634 = vmatprep.subr.bf16.mxu1 %v4633_v7 }
 0xc19   :  { %4622 = vmatprep.subr.bf16.mxu0 %v4621_v1 }
 0xc1b   :  { %4636 = vmatpush3.bf16.msra.mxu1 %v4633_v7 }
 0xce6   :  { %v4419_v62 = vpop.f32.mrb[46].mxu0 }
 0xce7   :  { %v3380_v50 = vpop.f32.mrb[47].mxu0 }
 0xce8   :  { %4428 = vmatprep.mubr.msk.f32.mxu0 %vm888_vm6, %v3380_v50 }
 0xce9   :  { %4429 = vmatmul.mubr.msk.f32.vlgmr.msra.gmra.mrb[48].mxu0 %vm888_vm6, %v4419_v62  ;;  %v3911_v62 = vld [vmem:[%s6280_s25] ss:$0 sm:$0xff]  ;;  %s5131_s25 = scalar_lea.vmem %s3746_s20, 16 }
 0xcea   :  { %4624 = vmatpush3.bf16.msra.mxu0 %v4621_v1  ;;  %4439 = vmatprep.mubr.msk.f32.mxu0 %vm888_vm6, %v6080_v6  ;;  %p5132_p10 = scmp.ne.s32.totalorder %s3746_s20, %s5131_s25  ;;  %p5137_p12 = scmp.lt.s32.totalorder %s5135_s16, %s5131_s25 }
 0xceb   :  { %4626 = vmatprep.subr.bf16.mxu0 %v4625_v3 }
 0xcec   :  { %p5138_p13 = por %p5137_p12, %p5136_p11 }
 0xcee   :  { %4628 = vmatpush3.bf16.msra.mxu0 %v4625_v3  ;;  %p5139_p0 = pnand %p5138_p13, %p5132_p10 }
 0xcf1   :  { %4440 = vmatmul.mubr.msk.f32.vlgmr.msra.gmra.mrb[48].mxu0 %vm888_vm6, %v6083_v55 }
 0xdc4   :  { %v4441_v23 = vpop.f32.mrb[48].mxu0 }
 0xdc5   :  { %v3564_v26 = vadd.f32 %v4441_v23, %v3905_v20  ;;  %v3546_v27 = vpop.f32.mrb[49].mxu0 }
 0xdc6   :  { %v3563_v31 = vadd.f32 %v3905_v20, %v3546_v27 }
 0xdc7   :  { %v3566_v33 = vand.u32 2147483647, %v3564_v26  ;;  %vm3578_vm1 = vcmp.ge.f32.partialorder %v3564_v26, 0.0 }
 0xdc8   :  { %v3565_v10 = vand.u32 2147483647, %v3563_v31  ;;  %vm3577_vm11 = vcmp.ge.f32.partialorder %v3563_v31, 0.0 }
 0xdc9   :  { %v3568_v21 = vsub.f32 0.0, %v3566_v33 }
 0xdca   :  { %v3567_v40 = vsub.f32 0.0, %v3565_v10 }
 0xdcb   :  { %v3571_v36 = vmul.f32 1.442695, %v3568_v21 }
 0xdcc   :  { %v3569_v42 = vmul.f32 1.442695, %v3567_v40 }
 0xdcd   :  { %4897 = vpow2.f32 %v3571_v36 }
 0xdce   :  { %4899 = vpow2.f32 %v3569_v42 }
 0xdd7   :  { %v4898_v47 = vpop.eup %4897 }
 0xdd8   :  { %v4900_v19 = vpop.eup %4899  ;;  %v3574_v25 = vadd.f32 1.0, %v4898_v47 }
 0xdd9   :  { %v3573_v9 = vadd.f32 1.0, %v4900_v19 }
 0xdda   :  { %4901 = vrcp.f32 %v3574_v25 }
 0xddb   :  { %4903 = vrcp.f32 %v3573_v9 }
 0xde4   :  { %v4902_v56 = vpop.eup %4901 }
 0xde5   :  { %v4904_v59 = vpop.eup %4903  ;;  %v3580_v41 = vmul.f32 %v4902_v56, %v4898_v47 }
 0xde6   :  { %v3579_v5 = vmul.f32 %v4904_v59, %v4900_v19 }
 0xde7   :  { %v3582_v24 = vsel %vm3578_vm1, %v4902_v56, %v3580_v41 }
 0xde8   :  { %v3581_v28 = vsel %vm3577_vm11, %v4904_v59, %v3579_v5  ;;  %v3584_v37 = vmul.f32 %v3582_v24, %v3564_v26 }
 0xde9   :  { %v3583_v35 = vmul.f32 %v3581_v28, %v3563_v31 }
 0xdeb   :  { %4450 = vmatprep.mubr.msk.f32.mxu1 %vm888_vm6, %v3583_v35 }
 0xdec   :  { %4451 = vmatmul.mubr.msk.f32.vlgmr.msra.gmra.mrb[26].mxu1 %vm888_vm6, %v3584_v37 }
 0xebf   :  { %v4452_v22 = vpop.f32.mrb[26].mxu1 }
 0xec0   :  { %v3676_v39 = vadd.f32 %v4452_v22, %v3907_v30  ;;  %v3670_v46 = vpop.f32.mrb[27].mxu1 }
 0xec1   :  { %v3671_v57 = vadd.f32 %v3907_v30, %v3670_v46 }
 0xec2   :  { %v3680_v60 = vadd.f32 %v3676_v39, %v6083_v55 }
 0xec3   :  { %v3679_v11 = vadd.f32 %v3671_v57, %v6080_v6 }
 0xec4   :  { %v3682_v0 = vadd.f32 %v3680_v60, %v5706_v52 }
 0xec5   :  { %v3681_v8 = vadd.f32 %v3679_v11, %v5704_v63 }
 0xec6   :  { %v3686_v15 = vsel %vm888_vm6, %v3682_v0, 0.0 }
 0xec7   :  { %3687 = vadd.xlane.f32.xlu1 %v3686_v15  ;;  %v3683_v2 = vsel %vm888_vm6, %v3681_v8, 0.0 }
 0xec8   :  { %3684 = vadd.xlane.f32.xlu0 %v3683_v2 }
 0xf54   :  { %v3688_v44 = vpop.xlane.xlu1 %3687 }
 0xf55   :  { %v3691_v61 = vmul.f32 0.03125, %v3688_v44  ;;  %v3685_v12 = vpop.xlane.xlu0 %3684 }
 0xf56   :  { %v3690_v13 = vmul.f32 0.03125, %v3685_v12 }
 0xf57   :  { %v3693_v32 = vsub.f32 %v3682_v0, %v3691_v61 }
 0xf58   :  { %v3692_v29 = vsub.f32 %v3681_v8, %v3690_v13 }
 0xf59   :  { %v3695_v48 = vmul.f32 %v3693_v32, %v3693_v32 }
 0xf5a   :  { %v3694_v55 = vmul.f32 %v3692_v29, %v3692_v29 }
 0xf5b   :  { %v3699_v6 = vsel %vm888_vm6, %v3695_v48, 0.0 }
 0xf5c   :  { %3700 = vadd.xlane.f32.xlu1 %v3699_v6  ;;  %v3696_v52 = vsel %vm888_vm6, %v3694_v55, 0.0 }
 0xf5d   :  { %3697 = vadd.xlane.f32.xlu0 %v3696_v52 }
 0xfe9   :  { %v3701_v63 = vpop.xlane.xlu1 %3700 }
 0xfea   :  { %v3703_v43 = vmul.f32 0.03125, %v3701_v63  ;;  %v3698_v38 = vpop.xlane.xlu0 %3697 }
 0xfeb   :  { %v3702_v45 = vmul.f32 0.03125, %v3698_v38 }
 0xfec   :  { %v3705_v51 = vadd.f32 1e-05, %v3703_v43 }
 0xfed   :  { %v3704_v16 = vadd.f32 1e-05, %v3702_v45 }
 0xfee   :  { %4905 = vrsqrt.f32 %v3705_v51 }
 0xfef   :  { %4907 = vrsqrt.f32 %v3704_v16 }
 0xff8   :  { %v4906_v18 = vpop.eup %4905 }
 0xff9   :  { %v4908_v1 = vpop.eup %4907  ;;  %v3709_v54 = vmul.f32 %v4906_v18, %v3693_v32 }
 0xffa   :  { %v3708_v14 = vmul.f32 %v4908_v1, %v3692_v29 }
 0xffb   :  { %v3718_v50 = vmul.f32 %v3910_v58, %v3709_v54 }
 0xffc   :  { %v3717_v3 = vmul.f32 %v3910_v58, %v3708_v14 }
 0xffd   :  { %v3727_v49 = vadd.f32 %v3911_v62, %v3718_v50 }
 0xffe   :  { %v3726_v17 = vadd.f32 %v3911_v62, %v3717_v3 }
 0xfff   :  { %v3729_v34 = vsel %vm888_vm6, %v3727_v49, 0.0 }
0x1000   :  { %v3728_v53 = vsel %vm888_vm6, %v3726_v17, 0.0 }
0x1001   :  { %v3730_v4 = vadd.f32 %v3729_v34, %v3728_v53 }
0x1003   :  { %v3731_v7 = vrot.slane %v3730_v4, 4 }
0x1005   :  { %v3732_v20 = vadd.f32 %v3731_v7, %v3730_v4 }
0x1007   :  { %v3733_v23 = vrot.slane %v3732_v20, 2 }
0x1009   :  { %v3734_v26 = vadd.f32 %v3733_v23, %v3732_v20 }
0x100b   :  { %v3735_v27 = vrot.slane %v3734_v26, 1 }
0x100d   :  { %v3736_v31 = vadd.f32 %v3735_v27, %v3734_v26 }
0x100f   :  { %3738 = vst.msk [vmem:[#allocation19] sm:$0x1] %vm3737_vm12, %v3736_v31 }
0x1010   :  { %5142 = shalt.err (!%p5139_p0)
}
0x1011   :  { %s6321_s28 = sld [smem:[#allocation38_spill]] }
0x1017   :  { %s5143_s18 = scalar_lea.hbm %s6321_s28, 16 }
0x1018   :  { %p5144_p1 = scmp.ne.s32.totalorder %s6321_s28, %s5143_s18  ;;  %p5147_p2 = scmp.lt.u32.totalorder %s5143_s18, %s6321_s28 }
0x101a   :  { %p5149_p3 = pnand %p5147_p2, %p5144_p1 }
0x101c   :  { %5152 = shalt.err (!%p5149_p3)
}
0x101d   :  { %3748 = dma.vmem_to_hbm [thread:$0]  %s3746_s20, 16, %s6321_s28, [#allocation4]  }
0x101e   :  { %5165 = dma.done.wait [#allocation4], 16  }
0x101f   :  { %5166 = vsyncadd [#allocation4], 4294967280 }
0x1020   :  { %3752 = vsyncpa [#allocation3], 1 }
0x1021   :  { %3753 = vsyncpa [#allocation6], 1 }
0x1022   :  { %3754 = vsyncpa [#allocation9], 1 }
0x1023   :  { %3755 = vsyncpa [#allocation12], 1 }
0x1024   :  { %3756 = vsyncpa [#allocation15], 1 }
0x1025   :  { %3757 = vsyncpa [#allocation18], 1 }
0x1026   :  { %3758 = vsyncpa [#allocation4], 1 }

</bundles_post_ra>
